<compile_context>
chip_gen: v7x
topology: tpu7x:2x2x1
jax: 0.10.0
libtpu: 0.0.40
codegen_flags: <defaults>
</compile_context>

<pallas_src>
import numpy as np
import jax
import jax.numpy as jnp
from jax.experimental import pallas as pl
from jax.experimental.pallas import tpu as pltpu

_POOL_K = 7
_POOL_S = 3


# --------------------------------------------------------------------------
# Small helpers (generation-aware limits, spec builders)
# --------------------------------------------------------------------------
def _round_up(x, m):
    return ((x + m - 1) // m) * m


def _largest_divisor_at_most(n, cap):
    for d in range(min(n, cap), 0, -1):
        if n % d == 0:
            return d
    return 1


def _vmem_limit_bytes():
    # v5e/v6e: 128 MiB physical -> 64 MiB scoped; v7x: 64 MiB -> 48 MiB scoped.
    try:
        cap = int(pltpu.get_tpu_info().vmem_capacity_bytes)
    except Exception:
        cap = 128 * 1024 * 1024
    return max(32 * 1024 * 1024, min((cap * 3) // 4, 64 * 1024 * 1024))


_VMEM_LIMIT = _vmem_limit_bytes()


def _probe_single_buffer_consts():
    """Probe whether pipeline_mode=pl.Buffered(1) is supported on this runtime."""
    try:
        spec = pl.BlockSpec((8, 128), lambda i: (0, 0), pipeline_mode=pl.Buffered(1))

        def k(a_ref, o_ref):
            o_ref[...] = a_ref[...] + 1.0

        fn = pl.pallas_call(
            k,
            out_shape=jax.ShapeDtypeStruct((8, 128), jnp.float32),
            grid=(1,),
            in_specs=[spec],
            out_specs=pl.BlockSpec((8, 128), lambda i: (0, 0)),
        )
        jax.block_until_ready(fn(jnp.zeros((8, 128), jnp.float32)))
        return True
    except Exception:
        return False


_SINGLE_BUFFER_OK = _probe_single_buffer_consts()


def _const_spec(shape):
    """BlockSpec for a grid-invariant (resident) input on a 1-D grid."""
    idx = lambda i: tuple(0 for _ in shape)
    if _SINGLE_BUFFER_OK:
        # Constants don't need double buffering; halve their VMEM footprint.
        return pl.BlockSpec(shape, idx, pipeline_mode=pl.Buffered(1))
    return pl.BlockSpec(shape, idx)


# --------------------------------------------------------------------------
# Kernel 1: fused 1x1 conv + separable SoftPool(7, stride 3)  (per batch block)
# --------------------------------------------------------------------------
def _conv1_softpool_kernel(x_ref, w1_ref, b1_ref, pwt_ref, o_ref, hp_ref):
    bb, _, _ = x_ref.shape
    f = w1_ref.shape[0]
    W, Wo = pwt_ref.shape
    Ho = o_ref.shape[2]

    w1 = w1_ref[...]                         # (f, C) bf16, resident
    b1 = b1_ref[...]                         # (f, 1) f32

    for b in range(bb):
        xb = x_ref[b].astype(jnp.bfloat16)   # (C, H*W)
        y = jnp.dot(w1, xb, preferred_element_type=jnp.float32) + b1   # (f, H*W)
        # Stabilised exp: the per-channel shift cancels exactly in sex/se; the
        # -60 clamp keeps every window sum strictly positive (no 0/0 -> NaN).
        m = jnp.max(y, axis=1, keepdims=True)
        e = jnp.exp(jnp.maximum(y - m, -60.0))
        ey = e * y
        # H-direction pooling: 7 shifted adds per output row, done directly on
        # the flat lane layout (W-wide static lane slices, no reshapes).
        for oh in range(Ho):
            base = _POOL_S * oh * W
            ae = e[:, base:base + W]
            ay = ey[:, base:base + W]
            for d in range(1, _POOL_K):
                lo = base + d * W
                ae = ae + e[:, lo:lo + W]
                ay = ay + ey[:, lo:lo + W]
            hp_ref[b * f:(b + 1) * f, oh:oh + 1, :] = ae[:, None, :]
            hp_ref[(bb + b) * f:(bb + b + 1) * f, oh:oh + 1, :] = ay[:, None, :]

    # W-direction pooling: one MXU matmul against the tiny (W, Wo) 0/1 matrix,
    # with sum_h(e) and sum_h(e*y) stacked along M (M = 2*bb*f*Ho rows), f32.
    hp = hp_ref[...].reshape(2 * bb * f * Ho, W)
    pooled = jnp.dot(hp, pwt_ref[...], preferred_element_type=jnp.float32)
    half = bb * f * Ho
    ratio = pooled[half:] / pooled[:half]                    # (bb*f*Ho, Wo)
    o_ref[...] = ratio.reshape(bb, f, Ho, Wo)


def conv1_softpool(x_flat, w1, b1, pwt):
    """Fused Conv2d(C,f,1) + SoftPool(7, stride 3).

    x_flat: (B, C, H*W) f32, w1: (f, C), b1: (f,), pwt: (W, Wo) 0/1 matrix.
    Returns (B, f, Ho, Wo) f32.
    """
    B, C, HW = x_flat.shape
    f = w1.shape[0]
    W, Wo = pwt.shape
    H = HW // W
    Ho = (H - _POOL_K) // _POOL_S + 1
    bb = _largest_divisor_at_most(B, 4)
    # TODO(synk): for very large H*W on v7x (64 MiB VMEM) add a spatial grid
    # axis with a (POOL_K - POOL_S)-row halo instead of holding full images.
    return pl.pallas_call(
        _conv1_softpool_kernel,
        out_shape=jax.ShapeDtypeStruct((B, f, Ho, Wo), jnp.float32),
        grid=(B // bb,),
        in_specs=[
            pl.BlockSpec((bb, C, HW), lambda i: (i, 0, 0)),
            _const_spec((f, C)),
            _const_spec((f, 1)),
            _const_spec((W, Wo)),
        ],
        out_specs=pl.BlockSpec((bb, f, Ho, Wo), lambda i: (i, 0, 0, 0)),
        scratch_shapes=[pltpu.VMEM((2 * bb * f, Ho, W), jnp.float32)],
        compiler_params=pltpu.CompilerParams(
            dimension_semantics=("parallel",),
            vmem_limit_bytes=_VMEM_LIMIT),
    )(x_flat.astype(jnp.float32),
      w1.astype(jnp.bfloat16),
      b1.reshape(f, 1).astype(jnp.float32),
      pwt.astype(jnp.float32))


# --------------------------------------------------------------------------
# Kernel 2: lane-dense conv-as-matmul for the tiny mid 3x3 convs
#           out (Cout, spatial) = W (Cout, K) @ patches (K, spatial) + b
# --------------------------------------------------------------------------
def _matmul_bias_kernel(apply_sigmoid):
    def kernel(w_ref, b_ref, a_ref, o_ref):
        acc = jnp.dot(w_ref[...], a_ref[...], preferred_element_type=jnp.float32)
        acc = acc + b_ref[...]
        if apply_sigmoid:
            acc = jax.nn.sigmoid(acc)
        o_ref[...] = acc
    return kernel


def conv_matmul(w_mat, bias, patches, apply_sigmoid=False, tn=1024):
    """w_mat: (Cout, K), bias: (Cout,), patches: (K, Nsp).  Returns (Cout, Nsp).

    The big spatial axis sits on lanes (padded to a multiple of 128) so stores
    are unmasked and the MXU N dimension is filled; weights stay resident.
    """
    Cout, K = w_mat.shape
    _, Nsp = patches.shape
    tn = min(tn, _round_up(Nsp, 128))
    Np = _round_up(Nsp, tn)
    if Np != Nsp:
        patches = jnp.pad(patches, ((0, 0), (0, Np - Nsp)))
    out = pl.pallas_call(
        _matmul_bias_kernel(apply_sigmoid),
        out_shape=jax.ShapeDtypeStruct((Cout, Np), jnp.float32),
        grid=(Np // tn,),
        in_specs=[
            _const_spec((Cout, K)),                 # resident weights
            _const_spec((Cout, 1)),                 # resident bias
            pl.BlockSpec((K, tn), lambda i: (0, i)),
        ],
        out_specs=pl.BlockSpec((Cout, tn), lambda i: (0, i)),
        compiler_params=pltpu.CompilerParams(
            dimension_semantics=("parallel",),
            vmem_limit_bytes=_VMEM_LIMIT),
    )(w_mat.astype(jnp.bfloat16),
      bias.reshape(Cout, 1).astype(jnp.float32),
      patches.astype(jnp.bfloat16))
    return out[:, :Nsp]


# --------------------------------------------------------------------------
# Kernel 3: fused separable bilinear upsample + gate + multiply (per batch block)
# --------------------------------------------------------------------------
def _fuse_kernel(x_ref, ws_ref, mwt_ref, mh_ref, o_ref):
    bb, C, H, W = x_ref.shape
    H3, W3 = ws_ref.shape[2], ws_ref.shape[3]

    # Separable bilinear upsample of the small attention map (all f32).
    ws = ws_ref[...].reshape(bb * C * H3, W3)
    t1 = jnp.dot(ws, mwt_ref[...], preferred_element_type=jnp.float32)  # (bbC*H3, W)
    t1 = t1.reshape(bb * C, H3, W)
    mh_b = jnp.broadcast_to(mh_ref[...], (bb * C, H, H3))               # hoisted
    wf = jax.lax.dot_general(                                           # (bbC, H, W)
        mh_b, t1, dimension_numbers=(((2,), (1,)), ((0,), (0,))),
        preferred_element_type=jnp.float32)
    wf = wf.reshape(bb, C, H, W)

    x = x_ref[...]
    g = jax.nn.sigmoid(x[:, 0:1, :, :])       # gate from channel 0 of same block
    o_ref[...] = x * wf * g


def fuse_upsample_gate(x4, ws, mwt, mh):
    """out = x * bilinear_up(ws) * sigmoid(x[:, :1]); x4: (B,C,H,W), ws: (B,C,H3,W3)."""
    B, C, H, W = x4.shape
    _, _, H3, W3 = ws.shape
    bb = _largest_divisor_at_most(B, 4)
    return pl.pallas_call(
        _fuse_kernel,
        out_shape=jax.ShapeDtypeStruct((B, C, H, W), jnp.float32),
        grid=(B // bb,),
        in_specs=[
            pl.BlockSpec((bb, C, H, W), lambda i: (i, 0, 0, 0)),
            pl.BlockSpec((bb, C, H3, W3), lambda i: (i, 0, 0, 0)),
            _const_spec((W3, W)),
            _const_spec((H, H3)),
        ],
        out_specs=pl.BlockSpec((bb, C, H, W), lambda i: (i, 0, 0, 0)),
        compiler_params=pltpu.CompilerParams(
            dimension_semantics=("parallel",),
            vmem_limit_bytes=_VMEM_LIMIT),
    )(x4.astype(jnp.float32), ws.astype(jnp.float32),
      mwt.astype(jnp.float32), mh.astype(jnp.float32))


# --------------------------------------------------------------------------
# Host-side constant builders + layout glue (tiny tensors only)
# --------------------------------------------------------------------------
def _pool_w_matrix(W, Wo):
    """0/1 membership of column w in window ow (W, Wo): w in [3*ow, 3*ow+7)."""
    P = np.zeros((W, Wo), np.float32)
    for ow in range(Wo):
        P[ow * _POOL_S: ow * _POOL_S + _POOL_K, ow] = 1.0
    return P


def _bilinear_matrix(out_size, in_size):
    """Matches F.interpolate(mode='bilinear', align_corners=False)."""
    scale = in_size / out_size
    M = np.zeros((out_size, in_size), np.float32)
    for o in range(out_size):
        src = max((o + 0.5) * scale - 0.5, 0.0)
        i0 = min(int(np.floor(src)), in_size - 1)
        i1 = min(i0 + 1, in_size - 1)
        frac = src - i0
        M[o, i0] += 1.0 - frac
        M[o, i1] += frac
    return M


def im2col_nchw(x, k, stride, pad):
    """(B, C, H, W) -> patches (k*k*C, B*Ho*Wo), rows ordered (kh, kw, ci).

    Only used on the /9-downsampled mid-pipeline maps (tiny).
    TODO(synk): fold stage-3/4 patch extraction into a single Pallas kernel
    (9 shifted in-VMEM accumulations) to remove this HBM round trip entirely.
    """
    B, C, H, W = x.shape
    xp = jnp.pad(x, ((0, 0), (0, 0), (pad, pad), (pad, pad)))
    Ho = (H + 2 * pad - k) // stride + 1
    Wo = (W + 2 * pad - k) // stride + 1
    cols = []
    for kh in range(k):
        for kw in range(k):
            cols.append(xp[:, :, kh:kh + stride * (Ho - 1) + 1:stride,
                              kw:kw + stride * (Wo - 1) + 1:stride])
    p = jnp.stack(cols, axis=0)                    # (k*k, B, C, Ho, Wo)
    p = jnp.transpose(p, (0, 2, 1, 3, 4))          # (k*k, C, B, Ho, Wo)
    return p.reshape(k * k * C, B * Ho * Wo), Ho, Wo


def conv_weight_to_matrix(w):
    """(Cout, Cin, k, k) torch layout -> (Cout, k*k*Cin) with cols (kh, kw, ci)."""
    Cout, Cin, k, _ = w.shape
    return jnp.transpose(w, (0, 2, 3, 1)).reshape(Cout, k * k * Cin)


# --------------------------------------------------------------------------
# LocalAttention forward
# --------------------------------------------------------------------------
def local_attention_forward(x_nchw, params):
    B, C, H, W = x_nchw.shape
    f = params['w1'].shape[0]
    Wo = (W - _POOL_K) // _POOL_S + 1

    # --- Stage 1+2 (fused Pallas): Conv2d(C, f, 1) + SoftPooling2D(7, s=3) ---
    y2 = conv1_softpool(x_nchw.reshape(B, C, H * W),        # metadata-only reshape
                        params['w1'][:, :, 0, 0], params['b1'],
                        jnp.asarray(_pool_w_matrix(W, Wo)))  # (B, f, Ho, Wo)

    # --- Stage 3: Conv2d(f, f, 3, stride=2, pad=1) (lane-dense matmul) ---
    p2, H2, W2 = im2col_nchw(y2, 3, 2, 1)
    y3 = conv_matmul(conv_weight_to_matrix(params['w2']), params['b2'], p2)
    y3 = jnp.transpose(y3.reshape(f, B, H2, W2), (1, 0, 2, 3))

    # --- Stage 4: Conv2d(f, C, 3, pad=1) + Sigmoid (lane-dense matmul) ---
    p3, H3, W3 = im2col_nchw(y3, 3, 1, 1)
    y4 = conv_matmul(conv_weight_to_matrix(params['w3']), params['b3'], p3,
                     apply_sigmoid=True)
    ws = jnp.transpose(y4.reshape(C, B, H3, W3), (1, 0, 2, 3))

    # --- Stage 5 (fused Pallas): separable bilinear upsample + gate + multiply ---
    mh = jnp.asarray(_bilinear_matrix(H, H3))        # (H, H3)
    mwt = jnp.asarray(_bilinear_matrix(W, W3).T)     # (W3, W)
    return fuse_upsample_gate(x_nchw, ws, mwt, mh)


# --------------------------------------------------------------------------
# Deterministic parameter init (shapes from the module __init__)
# --------------------------------------------------------------------------
def init_params(key, channels, f=16):
    ks = jax.random.split(key, 6)

    def conv_init(kw, kb, shape):
        fan_in = shape[1] * shape[2] * shape[3]
        w = jax.random.normal(kw, shape, jnp.float32) / np.sqrt(fan_in)
        b = 0.1 * jax.random.normal(kb, (shape[0],), jnp.float32)
        return w, b

    w1, b1 = conv_init(ks[0], ks[1], (f, channels, 1, 1))
    w2, b2 = conv_init(ks[2], ks[3], (f, f, 3, 3))
    w3, b3 = conv_init(ks[4], ks[5], (channels, f, 3, 3))
    return dict(w1=w1, b1=b1, w2=w2, b2=b2, w3=w3, b3=b3)


# --------------------------------------------------------------------------
# Pure-JAX reference (for validation only)
# --------------------------------------------------------------------------
def reference_forward(x_nchw, params):
    x = jnp.transpose(x_nchw, (0, 2, 3, 1))

    def conv(xn, w, b, stride, pad):
        out = jax.lax.conv_general_dilated(
            xn, jnp.transpose(w, (2, 3, 1, 0)),
            window_strides=(stride, stride),
            padding=((pad, pad), (pad, pad)),
            dimension_numbers=('NHWC', 'HWIO', 'NHWC'))
        return out + b.reshape(1, 1, 1, -1)

    y = conv(x, params['w1'], params['b1'], 1, 0)
    e = jnp.exp(y)
    se = jax.lax.reduce_window(e, 0.0, jax.lax.add, (1, 7, 7, 1), (1, 3, 3, 1), 'VALID')
    sex = jax.lax.reduce_window(e * y, 0.0, jax.lax.add, (1, 7, 7, 1), (1, 3, 3, 1), 'VALID')
    y = sex / se
    y = conv(y, params['w2'], params['b2'], 2, 1)
    y = jax.nn.sigmoid(conv(y, params['w3'], params['b3'], 1, 1))

    B, C, H, W = x_nchw.shape
    mh = jnp.asarray(_bilinear_matrix(H, y.shape[1]))
    mw = jnp.asarray(_bilinear_matrix(W, y.shape[2]))
    wf = jnp.einsum('hp,bpqc,wq->bhwc', mh, y, mw)
    g = jax.nn.sigmoid(x[..., :1])
    return jnp.transpose(x * wf * g, (0, 3, 1, 2))


if __name__ == "__main__":
    key = jax.random.PRNGKey(0)
    kx, kp = jax.random.split(key)
    B, C, H, W = 2, 4, 16, 16
    x = jax.random.normal(kx, (B, C, H, W), jnp.float32)
    params = init_params(kp, C, f=16)

    fwd = jax.jit(local_attention_forward)
    out = jax.block_until_ready(fwd(x, params))
    assert out.shape == (B, C, H, W)

    ref = reference_forward(x, params)
    np.testing.assert_allclose(np.asarray(out), np.asarray(ref), rtol=5e-2, atol=8e-3)

    print("KERNEL_OK")
</pallas_src>

<mosaic_0001>
module attributes {stable_mosaic.version = 11 : i64} {
  func.func @k(%arg0: i32, %arg1: memref<8x128xf32, #tpu.memory_space<vmem>>, %arg2: memref<8x128xf32, #tpu.memory_space<vmem>>) attributes {dimension_semantics = [#tpu.dimension_semantics<arbitrary>], iteration_bounds = array<i64: 1>, scalar_prefetch = 0 : i64, scratch_operands = 0 : i64, tpu.core_type = #tpu.core_type<tc>, window_params = [{pipeline_mode = #tpu.pipeline_mode<synchronous>, transform_indices = @transform_0, window_bounds = array<i64: 8, 128>}, {pipeline_mode = #tpu.pipeline_mode<synchronous>, transform_indices = @transform_1, window_bounds = array<i64: 8, 128>}]} {
    %c0 = arith.constant 0 : index
    %c0_0 = arith.constant 0 : index
    %0 = vector.load %arg1[%c0, %c0_0] : memref<8x128xf32, #tpu.memory_space<vmem>>, vector<8x128xf32>
    %cst = arith.constant 1.000000e+00 : f32
    %1 = vector.broadcast %cst : f32 to vector<8x128xf32>
    %2 = arith.addf %0, %1 : vector<8x128xf32>
    %c0_1 = arith.constant 0 : index
    %c0_2 = arith.constant 0 : index
    %3 = vector.load %arg2[%c0_1, %c0_2] : memref<8x128xf32, #tpu.memory_space<vmem>>, vector<8x128xf32>
    tpu.vector_store %arg2[%c0_1, %c0_2], %2 {strides = array<i32>} : memref<8x128xf32, #tpu.memory_space<vmem>>, vector<8x128xf32>,
    return
  }
  func.func @transform_0(%arg0: i32) -> (i32, i32) {
    %c0_i32 = arith.constant 0 : i32
    %c0_i32_0 = arith.constant 0 : i32
    %c0_i32_1 = arith.constant 0 : i32
    return %c0_i32, %c0_i32_0 : i32, i32
  }
  func.func @transform_1(%arg0: i32) -> (i32, i32) {
    %c0_i32 = arith.constant 0 : i32
    %c0_i32_0 = arith.constant 0 : i32
    %c0_i32_1 = arith.constant 0 : i32
    return %c0_i32, %c0_i32_0 : i32, i32
  }
}

module attributes {stable_mosaic.version = 11 : i64} {
  func.func @_conv1_softpool_kernel(%arg0: i32, %arg1: memref<2x4x256xf32, #tpu.memory_space<vmem>>, %arg2: memref<16x4xbf16, #tpu.memory_space<vmem>>, %arg3: memref<16x1xf32, #tpu.memory_space<vmem>>, %arg4: memref<16x4xf32, #tpu.memory_space<vmem>>, %arg5: memref<2x16x4x4xf32, #tpu.memory_space<vmem>>, %arg6: memref<64x4x16xf32, #tpu.memory_space<vmem>>) attributes {dimension_semantics = [#tpu.dimension_semantics<parallel>], iteration_bounds = array<i64: 1>, scalar_prefetch = 0 : i64, scratch_operands = 1 : i64, tpu.core_type = #tpu.core_type<tc>, window_params = [{transform_indices = @transform_0, window_bounds = array<i64: 2, 4, 256>}, {pipeline_mode = #tpu.pipeline_mode<synchronous>, transform_indices = @transform_1, window_bounds = array<i64: 16, 4>}, {pipeline_mode = #tpu.pipeline_mode<synchronous>, transform_indices = @transform_2, window_bounds = array<i64: 16, 1>}, {pipeline_mode = #tpu.pipeline_mode<synchronous>, transform_indices = @transform_3, window_bounds = array<i64: 16, 4>}, {transform_indices = @transform_4, window_bounds = array<i64: 2, 16, 4, 4>}]} {
    %c0 = arith.constant 0 : index
    %c0_0 = arith.constant 0 : index
    %0 = vector.load %arg2[%c0, %c0_0] : memref<16x4xbf16, #tpu.memory_space<vmem>>, vector<16x4xbf16>
    %c0_1 = arith.constant 0 : index
    %c0_2 = arith.constant 0 : index
    %1 = vector.load %arg3[%c0_1, %c0_2] : memref<16x1xf32, #tpu.memory_space<vmem>>, vector<16x1xf32>
    %c0_3 = arith.constant 0 : index
    %c0_4 = arith.constant 0 : index
    %c0_5 = arith.constant 0 : index
    %2 = vector.load %arg1[%c0_3, %c0_4, %c0_5] : memref<2x4x256xf32, #tpu.memory_space<vmem>>, vector<1x4x256xf32>
    %3 = vector.shape_cast %2 : vector<1x4x256xf32> to vector<4x256xf32>
    %4 = arith.truncf %3 : vector<4x256xf32> to vector<4x256xbf16>
    %cst = arith.constant dense<0.000000e+00> : vector<16x256xf32>
    %5 = tpu.matmul %0, %4, %cst {dimension_numbers = #tpu.dot_dimension_numbers<[1], [0], [0], [1], [0, 0, 1, 1], [], []>} : vector<16x4xbf16>, vector<4x256xbf16>, vector<16x256xf32> -> vector<16x256xf32>
    %6 = vector.broadcast %1 : vector<16x1xf32> to vector<16x256xf32>
    %7 = arith.addf %5, %6 : vector<16x256xf32>
    %cst_6 = arith.constant dense<0xFF800000> : vector<16xf32>
    %8 = vector.multi_reduction <maximumf>, %7, %cst_6 [1] : vector<16x256xf32> to vector<16xf32>
    %9 = vector.shape_cast %8 : vector<16xf32> to vector<16x1xf32>
    %10 = vector.broadcast %9 : vector<16x1xf32> to vector<16x256xf32>
    %11 = arith.subf %7, %10 : vector<16x256xf32>
    %cst_7 = arith.constant -6.000000e+01 : f32
    %12 = vector.broadcast %cst_7 : f32 to vector<16x256xf32>
    %13 = arith.maximumf %11, %12 : vector<16x256xf32>
    %14 = math.exp %13 : vector<16x256xf32>
    %15 = arith.mulf %14, %7 : vector<16x256xf32>
    %16 = vector.extract_strided_slice %14 {offsets = [0, 0], sizes = [16, 16], strides = [1, 1]} : vector<16x256xf32> to vector<16x16xf32>
    %17 = vector.extract_strided_slice %15 {offsets = [0, 0], sizes = [16, 16], strides = [1, 1]} : vector<16x256xf32> to vector<16x16xf32>
    %18 = vector.extract_strided_slice %14 {offsets = [0, 16], sizes = [16, 16], strides = [1, 1]} : vector<16x256xf32> to vector<16x16xf32>
    %19 = arith.addf %16, %18 : vector<16x16xf32>
    %20 = vector.extract_strided_slice %15 {offsets = [0, 16], sizes = [16, 16], strides = [1, 1]} : vector<16x256xf32> to vector<16x16xf32>
    %21 = arith.addf %17, %20 : vector<16x16xf32>
    %22 = vector.extract_strided_slice %14 {offsets = [0, 32], sizes = [16, 16], strides = [1, 1]} : vector<16x256xf32> to vector<16x16xf32>
    %23 = arith.addf %19, %22 : vector<16x16xf32>
    %24 = vector.extract_strided_slice %15 {offsets = [0, 32], sizes = [16, 16], strides = [1, 1]} : vector<16x256xf32> to vector<16x16xf32>
    %25 = arith.addf %21, %24 : vector<16x16xf32>
    %26 = vector.extract_strided_slice %14 {offsets = [0, 48], sizes = [16, 16], strides = [1, 1]} : vector<16x256xf32> to vector<16x16xf32>
    %27 = arith.addf %23, %26 : vector<16x16xf32>
    %28 = vector.extract_strided_slice %15 {offsets = [0, 48], sizes = [16, 16], strides = [1, 1]} : vector<16x256xf32> to vector<16x16xf32>
    %29 = arith.addf %25, %28 : vector<16x16xf32>
    %30 = vector.extract_strided_slice %14 {offsets = [0, 64], sizes = [16, 16], strides = [1, 1]} : vector<16x256xf32> to vector<16x16xf32>
    %31 = arith.addf %27, %30 : vector<16x16xf32>
    %32 = vector.extract_strided_slice %15 {offsets = [0, 64], sizes = [16, 16], strides = [1, 1]} : vector<16x256xf32> to vector<16x16xf32>
    %33 = arith.addf %29, %32 : vector<16x16xf32>
    %34 = vector.extract_strided_slice %14 {offsets = [0, 80], sizes = [16, 16], strides = [1, 1]} : vector<16x256xf32> to vector<16x16xf32>
    %35 = arith.addf %31, %34 : vector<16x16xf32>
    %36 = vector.extract_strided_slice %15 {offsets = [0, 80], sizes = [16, 16], strides = [1, 1]} : vector<16x256xf32> to vector<16x16xf32>
    %37 = arith.addf %33, %36 : vector<16x16xf32>
    %38 = vector.extract_strided_slice %14 {offsets = [0, 96], sizes = [16, 16], strides = [1, 1]} : vector<16x256xf32> to vector<16x16xf32>
    %39 = arith.addf %35, %38 : vector<16x16xf32>
    %40 = vector.extract_strided_slice %15 {offsets = [0, 96], sizes = [16, 16], strides = [1, 1]} : vector<16x256xf32> to vector<16x16xf32>
    %41 = arith.addf %37, %40 : vector<16x16xf32>
    %42 = vector.shape_cast %39 : vector<16x16xf32> to vector<16x1x16xf32>
    %c0_8 = arith.constant 0 : index
    %c0_9 = arith.constant 0 : index
    %c0_10 = arith.constant 0 : index
    %43 = vector.load %arg6[%c0_8, %c0_9, %c0_10] : memref<64x4x16xf32, #tpu.memory_space<vmem>>, vector<16x1x16xf32>
    tpu.vector_store %arg6[%c0_8, %c0_9, %c0_10], %42 {strides = array<i32>} : memref<64x4x16xf32, #tpu.memory_space<vmem>>, vector<16x1x16xf32>,
    %44 = vector.shape_cast %41 : vector<16x16xf32> to vector<16x1x16xf32>
    %c32 = arith.constant 32 : index
    %c0_11 = arith.constant 0 : index
    %c0_12 = arith.constant 0 : index
    %45 = vector.load %arg6[%c32, %c0_11, %c0_12] : memref<64x4x16xf32, #tpu.memory_space<vmem>>, vector<16x1x16xf32>
    tpu.vector_store %arg6[%c32, %c0_11, %c0_12], %44 {strides = array<i32>} : memref<64x4x16xf32, #tpu.memory_space<vmem>>, vector<16x1x16xf32>,
    %46 = vector.extract_strided_slice %14 {offsets = [0, 48], sizes = [16, 16], strides = [1, 1]} : vector<16x256xf32> to vector<16x16xf32>
    %47 = vector.extract_strided_slice %15 {offsets = [0, 48], sizes = [16, 16], strides = [1, 1]} : vector<16x256xf32> to vector<16x16xf32>
    %48 = vector.extract_strided_slice %14 {offsets = [0, 64], sizes = [16, 16], strides = [1, 1]} : vector<16x256xf32> to vector<16x16xf32>
    %49 = arith.addf %46, %48 : vector<16x16xf32>
    %50 = vector.extract_strided_slice %15 {offsets = [0, 64], sizes = [16, 16], strides = [1, 1]} : vector<16x256xf32> to vector<16x16xf32>
    %51 = arith.addf %47, %50 : vector<16x16xf32>
    %52 = vector.extract_strided_slice %14 {offsets = [0, 80], sizes = [16, 16], strides = [1, 1]} : vector<16x256xf32> to vector<16x16xf32>
    %53 = arith.addf %49, %52 : vector<16x16xf32>
    %54 = vector.extract_strided_slice %15 {offsets = [0, 80], sizes = [16, 16], strides = [1, 1]} : vector<16x256xf32> to vector<16x16xf32>
    %55 = arith.addf %51, %54 : vector<16x16xf32>
    %56 = vector.extract_strided_slice %14 {offsets = [0, 96], sizes = [16, 16], strides = [1, 1]} : vector<16x256xf32> to vector<16x16xf32>
    %57 = arith.addf %53, %56 : vector<16x16xf32>
    %58 = vector.extract_strided_slice %15 {offsets = [0, 96], sizes = [16, 16], strides = [1, 1]} : vector<16x256xf32> to vector<16x16xf32>
    %59 = arith.addf %55, %58 : vector<16x16xf32>
    %60 = vector.extract_strided_slice %14 {offsets = [0, 112], sizes = [16, 16], strides = [1, 1]} : vector<16x256xf32> to vector<16x16xf32>
    %61 = arith.addf %57, %60 : vector<16x16xf32>
    %62 = vector.extract_strided_slice %15 {offsets = [0, 112], sizes = [16, 16], strides = [1, 1]} : vector<16x256xf32> to vector<16x16xf32>
    %63 = arith.addf %59, %62 : vector<16x16xf32>
    %64 = vector.extract_strided_slice %14 {offsets = [0, 128], sizes = [16, 16], strides = [1, 1]} : vector<16x256xf32> to vector<16x16xf32>
    %65 = arith.addf %61, %64 : vector<16x16xf32>
    %66 = vector.extract_strided_slice %15 {offsets = [0, 128], sizes = [16, 16], strides = [1, 1]} : vector<16x256xf32> to vector<16x16xf32>
    %67 = arith.addf %63, %66 : vector<16x16xf32>
    %68 = vector.extract_strided_slice %14 {offsets = [0, 144], sizes = [16, 16], strides = [1, 1]} : vector<16x256xf32> to vector<16x16xf32>
    %69 = arith.addf %65, %68 : vector<16x16xf32>
    %70 = vector.extract_strided_slice %15 {offsets = [0, 144], sizes = [16, 16], strides = [1, 1]} : vector<16x256xf32> to vector<16x16xf32>
    %71 = arith.addf %67, %70 : vector<16x16xf32>
    %72 = vector.shape_cast %69 : vector<16x16xf32> to vector<16x1x16xf32>
    %c0_13 = arith.constant 0 : index
    %c1 = arith.constant 1 : index
    %c0_14 = arith.constant 0 : index
    %73 = vector.load %arg6[%c0_13, %c1, %c0_14] : memref<64x4x16xf32, #tpu.memory_space<vmem>>, vector<16x1x16xf32>
    tpu.vector_store %arg6[%c0_13, %c1, %c0_14], %72 {strides = array<i32>} : memref<64x4x16xf32, #tpu.memory_space<vmem>>, vector<16x1x16xf32>,
    %74 = vector.shape_cast %71 : vector<16x16xf32> to vector<16x1x16xf32>
    %c32_15 = arith.constant 32 : index
    %c1_16 = arith.constant 1 : index
    %c0_17 = arith.constant 0 : index
    %75 = vector.load %arg6[%c32_15, %c1_16, %c0_17] : memref<64x4x16xf32, #tpu.memory_space<vmem>>, vector<16x1x16xf32>
    tpu.vector_store %arg6[%c32_15, %c1_16, %c0_17], %74 {strides = array<i32>} : memref<64x4x16xf32, #tpu.memory_space<vmem>>, vector<16x1x16xf32>,
    %76 = vector.extract_strided_slice %14 {offsets = [0, 96], sizes = [16, 16], strides = [1, 1]} : vector<16x256xf32> to vector<16x16xf32>
    %77 = vector.extract_strided_slice %15 {offsets = [0, 96], sizes = [16, 16], strides = [1, 1]} : vector<16x256xf32> to vector<16x16xf32>
    %78 = vector.extract_strided_slice %14 {offsets = [0, 112], sizes = [16, 16], strides = [1, 1]} : vector<16x256xf32> to vector<16x16xf32>
    %79 = arith.addf %76, %78 : vector<16x16xf32>
    %80 = vector.extract_strided_slice %15 {offsets = [0, 112], sizes = [16, 16], strides = [1, 1]} : vector<16x256xf32> to vector<16x16xf32>
    %81 = arith.addf %77, %80 : vector<16x16xf32>
    %82 = vector.extract_strided_slice %14 {offsets = [0, 128], sizes = [16, 16], strides = [1, 1]} : vector<16x256xf32> to vector<16x16xf32>
    %83 = arith.addf %79, %82 : vector<16x16xf32>
    %84 = vector.extract_strided_slice %15 {offsets = [0, 128], sizes = [16, 16], strides = [1, 1]} : vector<16x256xf32> to vector<16x16xf32>
    %85 = arith.addf %81, %84 : vector<16x16xf32>
    %86 = vector.extract_strided_slice %14 {offsets = [0, 144], sizes = [16, 16], strides = [1, 1]} : vector<16x256xf32> to vector<16x16xf32>
    %87 = arith.addf %83, %86 : vector<16x16xf32>
    %88 = vector.extract_strided_slice %15 {offsets = [0, 144], sizes = [16, 16], strides = [1, 1]} : vector<16x256xf32> to vector<16x16xf32>
    %89 = arith.addf %85, %88 : vector<16x16xf32>
    %90 = vector.extract_strided_slice %14 {offsets = [0, 160], sizes = [16, 16], strides = [1, 1]} : vector<16x256xf32> to vector<16x16xf32>
    %91 = arith.addf %87, %90 : vector<16x16xf32>
    %92 = vector.extract_strided_slice %15 {offsets = [0, 160], sizes = [16, 16], strides = [1, 1]} : vector<16x256xf32> to vector<16x16xf32>
    %93 = arith.addf %89, %92 : vector<16x16xf32>
    %94 = vector.extract_strided_slice %14 {offsets = [0, 176], sizes = [16, 16], strides = [1, 1]} : vector<16x256xf32> to vector<16x16xf32>
    %95 = arith.addf %91, %94 : vector<16x16xf32>
    %96 = vector.extract_strided_slice %15 {offsets = [0, 176], sizes = [16, 16], strides = [1, 1]} : vector<16x256xf32> to vector<16x16xf32>
    %97 = arith.addf %93, %96 : vector<16x16xf32>
    %98 = vector.extract_strided_slice %14 {offsets = [0, 192], sizes = [16, 16], strides = [1, 1]} : vector<16x256xf32> to vector<16x16xf32>
    %99 = arith.addf %95, %98 : vector<16x16xf32>
    %100 = vector.extract_strided_slice %15 {offsets = [0, 192], sizes = [16, 16], strides = [1, 1]} : vector<16x256xf32> to vector<16x16xf32>
    %101 = arith.addf %97, %100 : vector<16x16xf32>
    %102 = vector.shape_cast %99 : vector<16x16xf32> to vector<16x1x16xf32>
    %c0_18 = arith.constant 0 : index
    %c2 = arith.constant 2 : index
    %c0_19 = arith.constant 0 : index
    %103 = vector.load %arg6[%c0_18, %c2, %c0_19] : memref<64x4x16xf32, #tpu.memory_space<vmem>>, vector<16x1x16xf32>
    tpu.vector_store %arg6[%c0_18, %c2, %c0_19], %102 {strides = array<i32>} : memref<64x4x16xf32, #tpu.memory_space<vmem>>, vector<16x1x16xf32>,
    %104 = vector.shape_cast %101 : vector<16x16xf32> to vector<16x1x16xf32>
    %c32_20 = arith.constant 32 : index
    %c2_21 = arith.constant 2 : index
    %c0_22 = arith.constant 0 : index
    %105 = vector.load %arg6[%c32_20, %c2_21, %c0_22] : memref<64x4x16xf32, #tpu.memory_space<vmem>>, vector<16x1x16xf32>
    tpu.vector_store %arg6[%c32_20, %c2_21, %c0_22], %104 {strides = array<i32>} : memref<64x4x16xf32, #tpu.memory_space<vmem>>, vector<16x1x16xf32>,
    %106 = vector.extract_strided_slice %14 {offsets = [0, 144], sizes = [16, 16], strides = [1, 1]} : vector<16x256xf32> to vector<16x16xf32>
    %107 = vector.extract_strided_slice %15 {offsets = [0, 144], sizes = [16, 16], strides = [1, 1]} : vector<16x256xf32> to vector<16x16xf32>
    %108 = vector.extract_strided_slice %14 {offsets = [0, 160], sizes = [16, 16], strides = [1, 1]} : vector<16x256xf32> to vector<16x16xf32>
    %109 = arith.addf %106, %108 : vector<16x16xf32>
    %110 = vector.extract_strided_slice %15 {offsets = [0, 160], sizes = [16, 16], strides = [1, 1]} : vector<16x256xf32> to vector<16x16xf32>
    %111 = arith.addf %107, %110 : vector<16x16xf32>
    %112 = vector.extract_strided_slice %14 {offsets = [0, 176], sizes = [16, 16], strides = [1, 1]} : vector<16x256xf32> to vector<16x16xf32>
    %113 = arith.addf %109, %112 : vector<16x16xf32>
    %114 = vector.extract_strided_slice %15 {offsets = [0, 176], sizes = [16, 16], strides = [1, 1]} : vector<16x256xf32> to vector<16x16xf32>
    %115 = arith.addf %111, %114 : vector<16x16xf32>
    %116 = vector.extract_strided_slice %14 {offsets = [0, 192], sizes = [16, 16], strides = [1, 1]} : vector<16x256xf32> to vector<16x16xf32>
    %117 = arith.addf %113, %116 : vector<16x16xf32>
    %118 = vector.extract_strided_slice %15 {offsets = [0, 192], sizes = [16, 16], strides = [1, 1]} : vector<16x256xf32> to vector<16x16xf32>
    %119 = arith.addf %115, %118 : vector<16x16xf32>
    %120 = vector.extract_strided_slice %14 {offsets = [0, 208], sizes = [16, 16], strides = [1, 1]} : vector<16x256xf32> to vector<16x16xf32>
    %121 = arith.addf %117, %120 : vector<16x16xf32>
    %122 = vector.extract_strided_slice %15 {offsets = [0, 208], sizes = [16, 16], strides = [1, 1]} : vector<16x256xf32> to vector<16x16xf32>
    %123 = arith.addf %119, %122 : vector<16x16xf32>
    %124 = vector.extract_strided_slice %14 {offsets = [0, 224], sizes = [16, 16], strides = [1, 1]} : vector<16x256xf32> to vector<16x16xf32>
    %125 = arith.addf %121, %124 : vector<16x16xf32>
    %126 = vector.extract_strided_slice %15 {offsets = [0, 224], sizes = [16, 16], strides = [1, 1]} : vector<16x256xf32> to vector<16x16xf32>
    %127 = arith.addf %123, %126 : vector<16x16xf32>
    %128 = vector.extract_strided_slice %14 {offsets = [0, 240], sizes = [16, 16], strides = [1, 1]} : vector<16x256xf32> to vector<16x16xf32>
    %129 = arith.addf %125, %128 : vector<16x16xf32>
    %130 = vector.extract_strided_slice %15 {offsets = [0, 240], sizes = [16, 16], strides = [1, 1]} : vector<16x256xf32> to vector<16x16xf32>
    %131 = arith.addf %127, %130 : vector<16x16xf32>
    %132 = vector.shape_cast %129 : vector<16x16xf32> to vector<16x1x16xf32>
    %c0_23 = arith.constant 0 : index
    %c3 = arith.constant 3 : index
    %c0_24 = arith.constant 0 : index
    %133 = vector.load %arg6[%c0_23, %c3, %c0_24] : memref<64x4x16xf32, #tpu.memory_space<vmem>>, vector<16x1x16xf32>
    tpu.vector_store %arg6[%c0_23, %c3, %c0_24], %132 {strides = array<i32>} : memref<64x4x16xf32, #tpu.memory_space<vmem>>, vector<16x1x16xf32>,
    %134 = vector.shape_cast %131 : vector<16x16xf32> to vector<16x1x16xf32>
    %c32_25 = arith.constant 32 : index
    %c3_26 = arith.constant 3 : index
    %c0_27 = arith.constant 0 : index
    %135 = vector.load %arg6[%c32_25, %c3_26, %c0_27] : memref<64x4x16xf32, #tpu.memory_space<vmem>>, vector<16x1x16xf32>
    tpu.vector_store %arg6[%c32_25, %c3_26, %c0_27], %134 {strides = array<i32>} : memref<64x4x16xf32, #tpu.memory_space<vmem>>, vector<16x1x16xf32>,
    %c1_28 = arith.constant 1 : index
    %c0_29 = arith.constant 0 : index
    %c0_30 = arith.constant 0 : index
    %136 = vector.load %arg1[%c1_28, %c0_29, %c0_30] : memref<2x4x256xf32, #tpu.memory_space<vmem>>, vector<1x4x256xf32>
    %137 = vector.shape_cast %136 : vector<1x4x256xf32> to vector<4x256xf32>
    %138 = arith.truncf %137 : vector<4x256xf32> to vector<4x256xbf16>
    %cst_31 = arith.constant dense<0.000000e+00> : vector<16x256xf32>
    %139 = tpu.matmul %0, %138, %cst_31 {dimension_numbers = #tpu.dot_dimension_numbers<[1], [0], [0], [1], [0, 0, 1, 1], [], []>} : vector<16x4xbf16>, vector<4x256xbf16>, vector<16x256xf32> -> vector<16x256xf32>
    %140 = vector.broadcast %1 : vector<16x1xf32> to vector<16x256xf32>
    %141 = arith.addf %139, %140 : vector<16x256xf32>
    %cst_32 = arith.constant dense<0xFF800000> : vector<16xf32>
    %142 = vector.multi_reduction <maximumf>, %141, %cst_32 [1] : vector<16x256xf32> to vector<16xf32>
    %143 = vector.shape_cast %142 : vector<16xf32> to vector<16x1xf32>
    %144 = vector.broadcast %143 : vector<16x1xf32> to vector<16x256xf32>
    %145 = arith.subf %141, %144 : vector<16x256xf32>
    %cst_33 = arith.constant -6.000000e+01 : f32
    %146 = vector.broadcast %cst_33 : f32 to vector<16x256xf32>
    %147 = arith.maximumf %145, %146 : vector<16x256xf32>
    %148 = math.exp %147 : vector<16x256xf32>
    %149 = arith.mulf %148, %141 : vector<16x256xf32>
    %150 = vector.extract_strided_slice %148 {offsets = [0, 0], sizes = [16, 16], strides = [1, 1]} : vector<16x256xf32> to vector<16x16xf32>
    %151 = vector.extract_strided_slice %149 {offsets = [0, 0], sizes = [16, 16], strides = [1, 1]} : vector<16x256xf32> to vector<16x16xf32>
    %152 = vector.extract_strided_slice %148 {offsets = [0, 16], sizes = [16, 16], strides = [1, 1]} : vector<16x256xf32> to vector<16x16xf32>
    %153 = arith.addf %150, %152 : vector<16x16xf32>
    %154 = vector.extract_strided_slice %149 {offsets = [0, 16], sizes = [16, 16], strides = [1, 1]} : vector<16x256xf32> to vector<16x16xf32>
    %155 = arith.addf %151, %154 : vector<16x16xf32>
    %156 = vector.extract_strided_slice %148 {offsets = [0, 32], sizes = [16, 16], strides = [1, 1]} : vector<16x256xf32> to vector<16x16xf32>
    %157 = arith.addf %153, %156 : vector<16x16xf32>
    %158 = vector.extract_strided_slice %149 {offsets = [0, 32], sizes = [16, 16], strides = [1, 1]} : vector<16x256xf32> to vector<16x16xf32>
    %159 = arith.addf %155, %158 : vector<16x16xf32>
    %160 = vector.extract_strided_slice %148 {offsets = [0, 48], sizes = [16, 16], strides = [1, 1]} : vector<16x256xf32> to vector<16x16xf32>
    %161 = arith.addf %157, %160 : vector<16x16xf32>
    %162 = vector.extract_strided_slice %149 {offsets = [0, 48], sizes = [16, 16], strides = [1, 1]} : vector<16x256xf32> to vector<16x16xf32>
    %163 = arith.addf %159, %162 : vector<16x16xf32>
    %164 = vector.extract_strided_slice %148 {offsets = [0, 64], sizes = [16, 16], strides = [1, 1]} : vector<16x256xf32> to vector<16x16xf32>
    %165 = arith.addf %161, %164 : vector<16x16xf32>
    %166 = vector.extract_strided_slice %149 {offsets = [0, 64], sizes = [16, 16], strides = [1, 1]} : vector<16x256xf32> to vector<16x16xf32>
    %167 = arith.addf %163, %166 : vector<16x16xf32>
    %168 = vector.extract_strided_slice %148 {offsets = [0, 80], sizes = [16, 16], strides = [1, 1]} : vector<16x256xf32> to vector<16x16xf32>
    %169 = arith.addf %165, %168 : vector<16x16xf32>
    %170 = vector.extract_strided_slice %149 {offsets = [0, 80], sizes = [16, 16], strides = [1, 1]} : vector<16x256xf32> to vector<16x16xf32>
    %171 = arith.addf %167, %170 : vector<16x16xf32>
    %172 = vector.extract_strided_slice %148 {offsets = [0, 96], sizes = [16, 16], strides = [1, 1]} : vector<16x256xf32> to vector<16x16xf32>
    %173 = arith.addf %169, %172 : vector<16x16xf32>
    %174 = vector.extract_strided_slice %149 {offsets = [0, 96], sizes = [16, 16], strides = [1, 1]} : vector<16x256xf32> to vector<16x16xf32>
    %175 = arith.addf %171, %174 : vector<16x16xf32>
    %176 = vector.shape_cast %173 : vector<16x16xf32> to vector<16x1x16xf32>
    %c16 = arith.constant 16 : index
    %c0_34 = arith.constant 0 : index
    %c0_35 = arith.constant 0 : index
    %177 = vector.load %arg6[%c16, %c0_34, %c0_35] : memref<64x4x16xf32, #tpu.memory_space<vmem>>, vector<16x1x16xf32>
    tpu.vector_store %arg6[%c16, %c0_34, %c0_35], %176 {strides = array<i32>} : memref<64x4x16xf32, #tpu.memory_space<vmem>>, vector<16x1x16xf32>,
    %178 = vector.shape_cast %175 : vector<16x16xf32> to vector<16x1x16xf32>
    %c48 = arith.constant 48 : index
    %c0_36 = arith.constant 0 : index
    %c0_37 = arith.constant 0 : index
    %179 = vector.load %arg6[%c48, %c0_36, %c0_37] : memref<64x4x16xf32, #tpu.memory_space<vmem>>, vector<16x1x16xf32>
    tpu.vector_store %arg6[%c48, %c0_36, %c0_37], %178 {strides = array<i32>} : memref<64x4x16xf32, #tpu.memory_space<vmem>>, vector<16x1x16xf32>,
    %180 = vector.extract_strided_slice %148 {offsets = [0, 48], sizes = [16, 16], strides = [1, 1]} : vector<16x256xf32> to vector<16x16xf32>
    %181 = vector.extract_strided_slice %149 {offsets = [0, 48], sizes = [16, 16], strides = [1, 1]} : vector<16x256xf32> to vector<16x16xf32>
    %182 = vector.extract_strided_slice %148 {offsets = [0, 64], sizes = [16, 16], strides = [1, 1]} : vector<16x256xf32> to vector<16x16xf32>
    %183 = arith.addf %180, %182 : vector<16x16xf32>
    %184 = vector.extract_strided_slice %149 {offsets = [0, 64], sizes = [16, 16], strides = [1, 1]} : vector<16x256xf32> to vector<16x16xf32>
    %185 = arith.addf %181, %184 : vector<16x16xf32>
    %186 = vector.extract_strided_slice %148 {offsets = [0, 80], sizes = [16, 16], strides = [1, 1]} : vector<16x256xf32> to vector<16x16xf32>
    %187 = arith.addf %183, %186 : vector<16x16xf32>
    %188 = vector.extract_strided_slice %149 {offsets = [0, 80], sizes = [16, 16], strides = [1, 1]} : vector<16x256xf32> to vector<16x16xf32>
    %189 = arith.addf %185, %188 : vector<16x16xf32>
    %190 = vector.extract_strided_slice %148 {offsets = [0, 96], sizes = [16, 16], strides = [1, 1]} : vector<16x256xf32> to vector<16x16xf32>
    %191 = arith.addf %187, %190 : vector<16x16xf32>
    %192 = vector.extract_strided_slice %149 {offsets = [0, 96], sizes = [16, 16], strides = [1, 1]} : vector<16x256xf32> to vector<16x16xf32>
    %193 = arith.addf %189, %192 : vector<16x16xf32>
    %194 = vector.extract_strided_slice %148 {offsets = [0, 112], sizes = [16, 16], strides = [1, 1]} : vector<16x256xf32> to vector<16x16xf32>
    %195 = arith.addf %191, %194 : vector<16x16xf32>
    %196 = vector.extract_strided_slice %149 {offsets = [0, 112], sizes = [16, 16], strides = [1, 1]} : vector<16x256xf32> to vector<16x16xf32>
    %197 = arith.addf %193, %196 : vector<16x16xf32>
    %198 = vector.extract_strided_slice %148 {offsets = [0, 128], sizes = [16, 16], strides = [1, 1]} : vector<16x256xf32> to vector<16x16xf32>
    %199 = arith.addf %195, %198 : vector<16x16xf32>
    %200 = vector.extract_strided_slice %149 {offsets = [0, 128], sizes = [16, 16], strides = [1, 1]} : vector<16x256xf32> to vector<16x16xf32>
    %201 = arith.addf %197, %200 : vector<16x16xf32>
    %202 = vector.extract_strided_slice %148 {offsets = [0, 144], sizes = [16, 16], strides = [1, 1]} : vector<16x256xf32> to vector<16x16xf32>
    %203 = arith.addf %199, %202 : vector<16x16xf32>
    %204 = vector.extract_strided_slice %149 {offsets = [0, 144], sizes = [16, 16], strides = [1, 1]} : vector<16x256xf32> to vector<16x16xf32>
    %205 = arith.addf %201, %204 : vector<16x16xf32>
    %206 = vector.shape_cast %203 : vector<16x16xf32> to vector<16x1x16xf32>
    %c16_38 = arith.constant 16 : index
    %c1_39 = arith.constant 1 : index
    %c0_40 = arith.constant 0 : index
    %207 = vector.load %arg6[%c16_38, %c1_39, %c0_40] : memref<64x4x16xf32, #tpu.memory_space<vmem>>, vector<16x1x16xf32>
    tpu.vector_store %arg6[%c16_38, %c1_39, %c0_40], %206 {strides = array<i32>} : memref<64x4x16xf32, #tpu.memory_space<vmem>>, vector<16x1x16xf32>,
    %208 = vector.shape_cast %205 : vector<16x16xf32> to vector<16x1x16xf32>
    %c48_41 = arith.constant 48 : index
    %c1_42 = arith.constant 1 : index
    %c0_43 = arith.constant 0 : index
    %209 = vector.load %arg6[%c48_41, %c1_42, %c0_43] : memref<64x4x16xf32, #tpu.memory_space<vmem>>, vector<16x1x16xf32>
    tpu.vector_store %arg6[%c48_41, %c1_42, %c0_43], %208 {strides = array<i32>} : memref<64x4x16xf32, #tpu.memory_space<vmem>>, vector<16x1x16xf32>,
    %210 = vector.extract_strided_slice %148 {offsets = [0, 96], sizes = [16, 16], strides = [1, 1]} : vector<16x256xf32> to vector<16x16xf32>
    %211 = vector.extract_strided_slice %149 {offsets = [0, 96], sizes = [16, 16], strides = [1, 1]} : vector<16x256xf32> to vector<16x16xf32>
    %212 = vector.extract_strided_slice %148 {offsets = [0, 112], sizes = [16, 16], strides = [1, 1]} : vector<16x256xf32> to vector<16x16xf32>
    %213 = arith.addf %210, %212 : vector<16x16xf32>
    %214 = vector.extract_strided_slice %149 {offsets = [0, 112], sizes = [16, 16], strides = [1, 1]} : vector<16x256xf32> to vector<16x16xf32>
    %215 = arith.addf %211, %214 : vector<16x16xf32>
    %216 = vector.extract_strided_slice %148 {offsets = [0, 128], sizes = [16, 16], strides = [1, 1]} : vector<16x256xf32> to vector<16x16xf32>
    %217 = arith.addf %213, %216 : vector<16x16xf32>
    %218 = vector.extract_strided_slice %149 {offsets = [0, 128], sizes = [16, 16], strides = [1, 1]} : vector<16x256xf32> to vector<16x16xf32>
    %219 = arith.addf %215, %218 : vector<16x16xf32>
    %220 = vector.extract_strided_slice %148 {offsets = [0, 144], sizes = [16, 16], strides = [1, 1]} : vector<16x256xf32> to vector<16x16xf32>
    %221 = arith.addf %217, %220 : vector<16x16xf32>
    %222 = vector.extract_strided_slice %149 {offsets = [0, 144], sizes = [16, 16], strides = [1, 1]} : vector<16x256xf32> to vector<16x16xf32>
    %223 = arith.addf %219, %222 : vector<16x16xf32>
    %224 = vector.extract_strided_slice %148 {offsets = [0, 160], sizes = [16, 16], strides = [1, 1]} : vector<16x256xf32> to vector<16x16xf32>
    %225 = arith.addf %221, %224 : vector<16x16xf32>
    %226 = vector.extract_strided_slice %149 {offsets = [0, 160], sizes = [16, 16], strides = [1, 1]} : vector<16x256xf32> to vector<16x16xf32>
    %227 = arith.addf %223, %226 : vector<16x16xf32>
    %228 = vector.extract_strided_slice %148 {offsets = [0, 176], sizes = [16, 16], strides = [1, 1]} : vector<16x256xf32> to vector<16x16xf32>
    %229 = arith.addf %225, %228 : vector<16x16xf32>
    %230 = vector.extract_strided_slice %149 {offsets = [0, 176], sizes = [16, 16], strides = [1, 1]} : vector<16x256xf32> to vector<16x16xf32>
    %231 = arith.addf %227, %230 : vector<16x16xf32>
    %232 = vector.extract_strided_slice %148 {offsets = [0, 192], sizes = [16, 16], strides = [1, 1]} : vector<16x256xf32> to vector<16x16xf32>
    %233 = arith.addf %229, %232 : vector<16x16xf32>
    %234 = vector.extract_strided_slice %149 {offsets = [0, 192], sizes = [16, 16], strides = [1, 1]} : vector<16x256xf32> to vector<16x16xf32>
    %235 = arith.addf %231, %234 : vector<16x16xf32>
    %236 = vector.shape_cast %233 : vector<16x16xf32> to vector<16x1x16xf32>
    %c16_44 = arith.constant 16 : index
    %c2_45 = arith.constant 2 : index
    %c0_46 = arith.constant 0 : index
    %237 = vector.load %arg6[%c16_44, %c2_45, %c0_46] : memref<64x4x16xf32, #tpu.memory_space<vmem>>, vector<16x1x16xf32>
    tpu.vector_store %arg6[%c16_44, %c2_45, %c0_46], %236 {strides = array<i32>} : memref<64x4x16xf32, #tpu.memory_space<vmem>>, vector<16x1x16xf32>,
    %238 = vector.shape_cast %235 : vector<16x16xf32> to vector<16x1x16xf32>
    %c48_47 = arith.constant 48 : index
    %c2_48 = arith.constant 2 : index
    %c0_49 = arith.constant 0 : index
    %239 = vector.load %arg6[%c48_47, %c2_48, %c0_49] : memref<64x4x16xf32, #tpu.memory_space<vmem>>, vector<16x1x16xf32>
    tpu.vector_store %arg6[%c48_47, %c2_48, %c0_49], %238 {strides = array<i32>} : memref<64x4x16xf32, #tpu.memory_space<vmem>>, vector<16x1x16xf32>,
    %240 = vector.extract_strided_slice %148 {offsets = [0, 144], sizes = [16, 16], strides = [1, 1]} : vector<16x256xf32> to vector<16x16xf32>
    %241 = vector.extract_strided_slice %149 {offsets = [0, 144], sizes = [16, 16], strides = [1, 1]} : vector<16x256xf32> to vector<16x16xf32>
    %242 = vector.extract_strided_slice %148 {offsets = [0, 160], sizes = [16, 16], strides = [1, 1]} : vector<16x256xf32> to vector<16x16xf32>
    %243 = arith.addf %240, %242 : vector<16x16xf32>
    %244 = vector.extract_strided_slice %149 {offsets = [0, 160], sizes = [16, 16], strides = [1, 1]} : vector<16x256xf32> to vector<16x16xf32>
    %245 = arith.addf %241, %244 : vector<16x16xf32>
    %246 = vector.extract_strided_slice %148 {offsets = [0, 176], sizes = [16, 16], strides = [1, 1]} : vector<16x256xf32> to vector<16x16xf32>
    %247 = arith.addf %243, %246 : vector<16x16xf32>
    %248 = vector.extract_strided_slice %149 {offsets = [0, 176], sizes = [16, 16], strides = [1, 1]} : vector<16x256xf32> to vector<16x16xf32>
    %249 = arith.addf %245, %248 : vector<16x16xf32>
    %250 = vector.extract_strided_slice %148 {offsets = [0, 192], sizes = [16, 16], strides = [1, 1]} : vector<16x256xf32> to vector<16x16xf32>
    %251 = arith.addf %247, %250 : vector<16x16xf32>
    %252 = vector.extract_strided_slice %149 {offsets = [0, 192], sizes = [16, 16], strides = [1, 1]} : vector<16x256xf32> to vector<16x16xf32>
    %253 = arith.addf %249, %252 : vector<16x16xf32>
    %254 = vector.extract_strided_slice %148 {offsets = [0, 208], sizes = [16, 16], strides = [1, 1]} : vector<16x256xf32> to vector<16x16xf32>
    %255 = arith.addf %251, %254 : vector<16x16xf32>
    %256 = vector.extract_strided_slice %149 {offsets = [0, 208], sizes = [16, 16], strides = [1, 1]} : vector<16x256xf32> to vector<16x16xf32>
    %257 = arith.addf %253, %256 : vector<16x16xf32>
    %258 = vector.extract_strided_slice %148 {offsets = [0, 224], sizes = [16, 16], strides = [1, 1]} : vector<16x256xf32> to vector<16x16xf32>
    %259 = arith.addf %255, %258 : vector<16x16xf32>
    %260 = vector.extract_strided_slice %149 {offsets = [0, 224], sizes = [16, 16], strides = [1, 1]} : vector<16x256xf32> to vector<16x16xf32>
    %261 = arith.addf %257, %260 : vector<16x16xf32>
    %262 = vector.extract_strided_slice %148 {offsets = [0, 240], sizes = [16, 16], strides = [1, 1]} : vector<16x256xf32> to vector<16x16xf32>
    %263 = arith.addf %259, %262 : vector<16x16xf32>
    %264 = vector.extract_strided_slice %149 {offsets = [0, 240], sizes = [16, 16], strides = [1, 1]} : vector<16x256xf32> to vector<16x16xf32>
    %265 = arith.addf %261, %264 : vector<16x16xf32>
    %266 = vector.shape_cast %263 : vector<16x16xf32> to vector<16x1x16xf32>
    %c16_50 = arith.constant 16 : index
    %c3_51 = arith.constant 3 : index
    %c0_52 = arith.constant 0 : index
    %267 = vector.load %arg6[%c16_50, %c3_51, %c0_52] : memref<64x4x16xf32, #tpu.memory_space<vmem>>, vector<16x1x16xf32>
    tpu.vector_store %arg6[%c16_50, %c3_51, %c0_52], %266 {strides = array<i32>} : memref<64x4x16xf32, #tpu.memory_space<vmem>>, vector<16x1x16xf32>,
    %268 = vector.shape_cast %265 : vector<16x16xf32> to vector<16x1x16xf32>
    %c48_53 = arith.constant 48 : index
    %c3_54 = arith.constant 3 : index
    %c0_55 = arith.constant 0 : index
    %269 = vector.load %arg6[%c48_53, %c3_54, %c0_55] : memref<64x4x16xf32, #tpu.memory_space<vmem>>, vector<16x1x16xf32>
    tpu.vector_store %arg6[%c48_53, %c3_54, %c0_55], %268 {strides = array<i32>} : memref<64x4x16xf32, #tpu.memory_space<vmem>>, vector<16x1x16xf32>,
    %c0_56 = arith.constant 0 : index
    %c0_57 = arith.constant 0 : index
    %c0_58 = arith.constant 0 : index
    %270 = vector.load %arg6[%c0_56, %c0_57, %c0_58] : memref<64x4x16xf32, #tpu.memory_space<vmem>>, vector<64x4x16xf32>
    %271 = vector.shape_cast %270 : vector<64x4x16xf32> to vector<256x16xf32>
    %c0_59 = arith.constant 0 : index
    %c0_60 = arith.constant 0 : index
    %272 = vector.load %arg4[%c0_59, %c0_60] : memref<16x4xf32, #tpu.memory_space<vmem>>, vector<16x4xf32>
    %cst_61 = arith.constant dense<0.000000e+00> : vector<256x4xf32>
    %273 = tpu.matmul %271, %272, %cst_61 {dimension_numbers = #tpu.dot_dimension_numbers<[1], [0], [0], [1], [0, 0, 1, 1], [], []>} : vector<256x16xf32>, vector<16x4xf32>, vector<256x4xf32> -> vector<256x4xf32>
    %274 = vector.extract_strided_slice %273 {offsets = [128, 0], sizes = [128, 4], strides = [1, 1]} : vector<256x4xf32> to vector<128x4xf32>
    %275 = vector.extract_strided_slice %273 {offsets = [0, 0], sizes = [128, 4], strides = [1, 1]} : vector<256x4xf32> to vector<128x4xf32>
    %276 = arith.divf %274, %275 : vector<128x4xf32>
    %277 = vector.shape_cast %276 : vector<128x4xf32> to vector<2x16x4x4xf32>
    %c0_62 = arith.constant 0 : index
    %c0_63 = arith.constant 0 : index
    %c0_64 = arith.constant 0 : index
    %c0_65 = arith.constant 0 : index
    %278 = vector.load %arg5[%c0_62, %c0_63, %c0_64, %c0_65] : memref<2x16x4x4xf32, #tpu.memory_space<vmem>>, vector<2x16x4x4xf32>
    tpu.vector_store %arg5[%c0_62, %c0_63, %c0_64, %c0_65], %277 {strides = array<i32>} : memref<2x16x4x4xf32, #tpu.memory_space<vmem>>, vector<2x16x4x4xf32>,
    return
  }
  func.func @transform_0(%arg0: i32) -> (i32, i32, i32) {
    %c0_i32 = arith.constant 0 : i32
    %c0_i32_0 = arith.constant 0 : i32
    %c0_i32_1 = arith.constant 0 : i32
    return %arg0, %c0_i32, %c0_i32_0 : i32, i32, i32
  }
  func.func @transform_1(%arg0: i32) -> (i32, i32) {
    %c0_i32 = arith.constant 0 : i32
    %c0_i32_0 = arith.constant 0 : i32
    %c0_i32_1 = arith.constant 0 : i32
    return %c0_i32, %c0_i32_0 : i32, i32
  }
  func.func @transform_2(%arg0: i32) -> (i32, i32) {
    %c0_i32 = arith.constant 0 : i32
    %c0_i32_0 = arith.constant 0 : i32
    %c0_i32_1 = arith.constant 0 : i32
    return %c0_i32, %c0_i32_0 : i32, i32
  }
  func.func @transform_3(%arg0: i32) -> (i32, i32) {
    %c0_i32 = arith.constant 0 : i32
    %c0_i32_0 = arith.constant 0 : i32
    %c0_i32_1 = arith.constant 0 : i32
    return %c0_i32, %c0_i32_0 : i32, i32
  }
  func.func @transform_4(%arg0: i32) -> (i32, i32, i32, i32) {
    %c0_i32 = arith.constant 0 : i32
    %c0_i32_0 = arith.constant 0 : i32
    %c0_i32_1 = arith.constant 0 : i32
    %c0_i32_2 = arith.constant 0 : i32
    return %arg0, %c0_i32, %c0_i32_0, %c0_i32_1 : i32, i32, i32, i32
  }
}

module attributes {stable_mosaic.version = 11 : i64} {
  func.func @kernel(%arg0: i32, %arg1: memref<16x144xbf16, #tpu.memory_space<vmem>>, %arg2: memref<16x1xf32, #tpu.memory_space<vmem>>, %arg3: memref<144x128xbf16, #tpu.memory_space<vmem>>, %arg4: memref<16x128xf32, #tpu.memory_space<vmem>>) attributes {dimension_semantics = [#tpu.dimension_semantics<parallel>], iteration_bounds = array<i64: 1>, scalar_prefetch = 0 : i64, scratch_operands = 0 : i64, tpu.core_type = #tpu.core_type<tc>, window_params = [{pipeline_mode = #tpu.pipeline_mode<synchronous>, transform_indices = @transform_0, window_bounds = array<i64: 16, 144>}, {pipeline_mode = #tpu.pipeline_mode<synchronous>, transform_indices = @transform_1, window_bounds = array<i64: 16, 1>}, {transform_indices = @transform_2, window_bounds = array<i64: 144, 128>}, {transform_indices = @transform_3, window_bounds = array<i64: 16, 128>}]} {
    %c0 = arith.constant 0 : index
    %c0_0 = arith.constant 0 : index
    %0 = vector.load %arg1[%c0, %c0_0] : memref<16x144xbf16, #tpu.memory_space<vmem>>, vector<16x144xbf16>
    %c0_1 = arith.constant 0 : index
    %c0_2 = arith.constant 0 : index
    %1 = vector.load %arg3[%c0_1, %c0_2] : memref<144x128xbf16, #tpu.memory_space<vmem>>, vector<144x128xbf16>
    %cst = arith.constant dense<0.000000e+00> : vector<16x128xf32>
    %2 = tpu.matmul %0, %1, %cst {dimension_numbers = #tpu.dot_dimension_numbers<[1], [0], [0], [1], [0, 0, 1, 1], [], []>} : vector<16x144xbf16>, vector<144x128xbf16>, vector<16x128xf32> -> vector<16x128xf32>
    %c0_3 = arith.constant 0 : index
    %c0_4 = arith.constant 0 : index
    %3 = vector.load %arg2[%c0_3, %c0_4] : memref<16x1xf32, #tpu.memory_space<vmem>>, vector<16x1xf32>
    %4 = vector.broadcast %3 : vector<16x1xf32> to vector<16x128xf32>
    %5 = arith.addf %2, %4 : vector<16x128xf32>
    %c0_5 = arith.constant 0 : index
    %c0_6 = arith.constant 0 : index
    %6 = vector.load %arg4[%c0_5, %c0_6] : memref<16x128xf32, #tpu.memory_space<vmem>>, vector<16x128xf32>
    tpu.vector_store %arg4[%c0_5, %c0_6], %5 {strides = array<i32>} : memref<16x128xf32, #tpu.memory_space<vmem>>, vector<16x128xf32>,
    return
  }
  func.func @transform_0(%arg0: i32) -> (i32, i32) {
    %c0_i32 = arith.constant 0 : i32
    %c0_i32_0 = arith.constant 0 : i32
    %c0_i32_1 = arith.constant 0 : i32
    return %c0_i32, %c0_i32_0 : i32, i32
  }
  func.func @transform_1(%arg0: i32) -> (i32, i32) {
    %c0_i32 = arith.constant 0 : i32
    %c0_i32_0 = arith.constant 0 : i32
    %c0_i32_1 = arith.constant 0 : i32
    return %c0_i32, %c0_i32_0 : i32, i32
  }
  func.func @transform_2(%arg0: i32) -> (i32, i32) {
    %c0_i32 = arith.constant 0 : i32
    %c0_i32_0 = arith.constant 0 : i32
    return %c0_i32, %arg0 : i32, i32
  }
  func.func @transform_3(%arg0: i32) -> (i32, i32) {
    %c0_i32 = arith.constant 0 : i32
    %c0_i32_0 = arith.constant 0 : i32
    return %c0_i32, %arg0 : i32, i32
  }
}

module attributes {stable_mosaic.version = 11 : i64} {
  func.func @kernel(%arg0: i32, %arg1: memref<4x144xbf16, #tpu.memory_space<vmem>>, %arg2: memref<4x1xf32, #tpu.memory_space<vmem>>, %arg3: memref<144x128xbf16, #tpu.memory_space<vmem>>, %arg4: memref<4x128xf32, #tpu.memory_space<vmem>>) attributes {dimension_semantics = [#tpu.dimension_semantics<parallel>], iteration_bounds = array<i64: 1>, scalar_prefetch = 0 : i64, scratch_operands = 0 : i64, tpu.core_type = #tpu.core_type<tc>, window_params = [{pipeline_mode = #tpu.pipeline_mode<synchronous>, transform_indices = @transform_0, window_bounds = array<i64: 4, 144>}, {pipeline_mode = #tpu.pipeline_mode<synchronous>, transform_indices = @transform_1, window_bounds = array<i64: 4, 1>}, {transform_indices = @transform_2, window_bounds = array<i64: 144, 128>}, {transform_indices = @transform_3, window_bounds = array<i64: 4, 128>}]} {
    %c0 = arith.constant 0 : index
    %c0_0 = arith.constant 0 : index
    %0 = vector.load %arg1[%c0, %c0_0] : memref<4x144xbf16, #tpu.memory_space<vmem>>, vector<4x144xbf16>
    %c0_1 = arith.constant 0 : index
    %c0_2 = arith.constant 0 : index
    %1 = vector.load %arg3[%c0_1, %c0_2] : memref<144x128xbf16, #tpu.memory_space<vmem>>, vector<144x128xbf16>
    %cst = arith.constant dense<0.000000e+00> : vector<4x128xf32>
    %2 = tpu.matmul %0, %1, %cst {dimension_numbers = #tpu.dot_dimension_numbers<[1], [0], [0], [1], [0, 0, 1, 1], [], []>} : vector<4x144xbf16>, vector<144x128xbf16>, vector<4x128xf32> -> vector<4x128xf32>
    %c0_3 = arith.constant 0 : index
    %c0_4 = arith.constant 0 : index
    %3 = vector.load %arg2[%c0_3, %c0_4] : memref<4x1xf32, #tpu.memory_space<vmem>>, vector<4x1xf32>
    %4 = vector.broadcast %3 : vector<4x1xf32> to vector<4x128xf32>
    %5 = arith.addf %2, %4 : vector<4x128xf32>
    %6 = arith.negf %5 : vector<4x128xf32>
    %7 = math.exp %6 : vector<4x128xf32>
    %cst_5 = arith.constant 1.000000e+00 : f32
    %8 = vector.broadcast %cst_5 : f32 to vector<4x128xf32>
    %9 = arith.addf %8, %7 : vector<4x128xf32>
    %10 = arith.divf %8, %9 : vector<4x128xf32>
    %c0_6 = arith.constant 0 : index
    %c0_7 = arith.constant 0 : index
    %11 = vector.load %arg4[%c0_6, %c0_7] : memref<4x128xf32, #tpu.memory_space<vmem>>, vector<4x128xf32>
    tpu.vector_store %arg4[%c0_6, %c0_7], %10 {strides = array<i32>} : memref<4x128xf32, #tpu.memory_space<vmem>>, vector<4x128xf32>,
    return
  }
  func.func @transform_0(%arg0: i32) -> (i32, i32) {
    %c0_i32 = arith.constant 0 : i32
    %c0_i32_0 = arith.constant 0 : i32
    %c0_i32_1 = arith.constant 0 : i32
    return %c0_i32, %c0_i32_0 : i32, i32
  }
  func.func @transform_1(%arg0: i32) -> (i32, i32) {
    %c0_i32 = arith.constant 0 : i32
    %c0_i32_0 = arith.constant 0 : i32
    %c0_i32_1 = arith.constant 0 : i32
    return %c0_i32, %c0_i32_0 : i32, i32
  }
  func.func @transform_2(%arg0: i32) -> (i32, i32) {
    %c0_i32 = arith.constant 0 : i32
    %c0_i32_0 = arith.constant 0 : i32
    return %c0_i32, %arg0 : i32, i32
  }
  func.func @transform_3(%arg0: i32) -> (i32, i32) {
    %c0_i32 = arith.constant 0 : i32
    %c0_i32_0 = arith.constant 0 : i32
    return %c0_i32, %arg0 : i32, i32
  }
}

module attributes {stable_mosaic.version = 11 : i64} {
  func.func @_fuse_kernel(%arg0: i32, %arg1: memref<2x4x16x16xf32, #tpu.memory_space<vmem>>, %arg2: memref<2x4x2x2xf32, #tpu.memory_space<vmem>>, %arg3: memref<2x16xf32, #tpu.memory_space<vmem>>, %arg4: memref<16x2xf32, #tpu.memory_space<vmem>>, %arg5: memref<2x4x16x16xf32, #tpu.memory_space<vmem>>) attributes {dimension_semantics = [#tpu.dimension_semantics<parallel>], iteration_bounds = array<i64: 1>, scalar_prefetch = 0 : i64, scratch_operands = 0 : i64, tpu.core_type = #tpu.core_type<tc>, window_params = [{transform_indices = @transform_0, window_bounds = array<i64: 2, 4, 16, 16>}, {transform_indices = @transform_1, window_bounds = array<i64: 2, 4, 2, 2>}, {pipeline_mode = #tpu.pipeline_mode<synchronous>, transform_indices = @transform_2, window_bounds = array<i64: 2, 16>}, {pipeline_mode = #tpu.pipeline_mode<synchronous>, transform_indices = @transform_3, window_bounds = array<i64: 16, 2>}, {transform_indices = @transform_4, window_bounds = array<i64: 2, 4, 16, 16>}]} {
    %c0 = arith.constant 0 : index
    %c0_0 = arith.constant 0 : index
    %c0_1 = arith.constant 0 : index
    %c0_2 = arith.constant 0 : index
    %0 = vector.load %arg2[%c0, %c0_0, %c0_1, %c0_2] : memref<2x4x2x2xf32, #tpu.memory_space<vmem>>, vector<2x4x2x2xf32>
    %1 = vector.shape_cast %0 : vector<2x4x2x2xf32> to vector<16x2xf32>
    %c0_3 = arith.constant 0 : index
    %c0_4 = arith.constant 0 : index
    %2 = vector.load %arg3[%c0_3, %c0_4] : memref<2x16xf32, #tpu.memory_space<vmem>>, vector<2x16xf32>
    %cst = arith.constant dense<0.000000e+00> : vector<16x16xf32>
    %3 = tpu.matmul %1, %2, %cst {dimension_numbers = #tpu.dot_dimension_numbers<[1], [0], [0], [1], [0, 0, 1, 1], [], []>} : vector<16x2xf32>, vector<2x16xf32>, vector<16x16xf32> -> vector<16x16xf32>
    %4 = vector.shape_cast %3 : vector<16x16xf32> to vector<8x2x16xf32>
    %c0_5 = arith.constant 0 : index
    %c0_6 = arith.constant 0 : index
    %5 = vector.load %arg4[%c0_5, %c0_6] : memref<16x2xf32, #tpu.memory_space<vmem>>, vector<16x2xf32>
    %6 = vector.shape_cast %5 : vector<16x2xf32> to vector<1x16x2xf32>
    %7 = vector.broadcast %6 : vector<1x16x2xf32> to vector<8x16x2xf32>
    %cst_7 = arith.constant dense<0.000000e+00> : vector<8x16x16xf32>
    %8 = tpu.matmul %7, %4, %cst_7 {dimension_numbers = #tpu.dot_dimension_numbers<[2], [1], [1], [2], [0, 0, 0, 1, 1, 2], [0], [0]>} : vector<8x16x2xf32>, vector<8x2x16xf32>, vector<8x16x16xf32> -> vector<8x16x16xf32>
    %9 = vector.shape_cast %8 : vector<8x16x16xf32> to vector<2x4x16x16xf32>
    %c0_8 = arith.constant 0 : index
    %c0_9 = arith.constant 0 : index
    %c0_10 = arith.constant 0 : index
    %c0_11 = arith.constant 0 : index
    %10 = vector.load %arg1[%c0_8, %c0_9, %c0_10, %c0_11] : memref<2x4x16x16xf32, #tpu.memory_space<vmem>>, vector<2x4x16x16xf32>
    %11 = vector.extract_strided_slice %10 {offsets = [0, 0, 0, 0], sizes = [2, 1, 16, 16], strides = [1, 1, 1, 1]} : vector<2x4x16x16xf32> to vector<2x1x16x16xf32>
    %12 = arith.negf %11 : vector<2x1x16x16xf32>
    %13 = math.exp %12 : vector<2x1x16x16xf32>
    %cst_12 = arith.constant 1.000000e+00 : f32
    %14 = vector.broadcast %cst_12 : f32 to vector<2x1x16x16xf32>
    %15 = arith.addf %14, %13 : vector<2x1x16x16xf32>
    %16 = arith.divf %14, %15 : vector<2x1x16x16xf32>
    %17 = arith.mulf %10, %9 : vector<2x4x16x16xf32>
    %18 = vector.broadcast %16 : vector<2x1x16x16xf32> to vector<2x4x16x16xf32>
    %19 = arith.mulf %17, %18 : vector<2x4x16x16xf32>
    %c0_13 = arith.constant 0 : index
    %c0_14 = arith.constant 0 : index
    %c0_15 = arith.constant 0 : index
    %c0_16 = arith.constant 0 : index
    %20 = vector.load %arg5[%c0_13, %c0_14, %c0_15, %c0_16] : memref<2x4x16x16xf32, #tpu.memory_space<vmem>>, vector<2x4x16x16xf32>
    tpu.vector_store %arg5[%c0_13, %c0_14, %c0_15, %c0_16], %19 {strides = array<i32>} : memref<2x4x16x16xf32, #tpu.memory_space<vmem>>, vector<2x4x16x16xf32>,
    return
  }
  func.func @transform_0(%arg0: i32) -> (i32, i32, i32, i32) {
    %c0_i32 = arith.constant 0 : i32
    %c0_i32_0 = arith.constant 0 : i32
    %c0_i32_1 = arith.constant 0 : i32
    %c0_i32_2 = arith.constant 0 : i32
    return %arg0, %c0_i32, %c0_i32_0, %c0_i32_1 : i32, i32, i32, i32
  }
  func.func @transform_1(%arg0: i32) -> (i32, i32, i32, i32) {
    %c0_i32 = arith.constant 0 : i32
    %c0_i32_0 = arith.constant 0 : i32
    %c0_i32_1 = arith.constant 0 : i32
    %c0_i32_2 = arith.constant 0 : i32
    return %arg0, %c0_i32, %c0_i32_0, %c0_i32_1 : i32, i32, i32, i32
  }
  func.func @transform_2(%arg0: i32) -> (i32, i32) {
    %c0_i32 = arith.constant 0 : i32
    %c0_i32_0 = arith.constant 0 : i32
    %c0_i32_1 = arith.constant 0 : i32
    return %c0_i32, %c0_i32_0 : i32, i32
  }
  func.func @transform_3(%arg0: i32) -> (i32, i32) {
    %c0_i32 = arith.constant 0 : i32
    %c0_i32_0 = arith.constant 0 : i32
    %c0_i32_1 = arith.constant 0 : i32
    return %c0_i32, %c0_i32_0 : i32, i32
  }
  func.func @transform_4(%arg0: i32) -> (i32, i32, i32, i32) {
    %c0_i32 = arith.constant 0 : i32
    %c0_i32_0 = arith.constant 0 : i32
    %c0_i32_1 = arith.constant 0 : i32
    %c0_i32_2 = arith.constant 0 : i32
    return %arg0, %c0_i32, %c0_i32_0, %c0_i32_1 : i32, i32, i32, i32
  }
}

</mosaic_0001>

<bundles_post_ra>
// kernel: tpu_custom_call.1
= control target key start
LH: loop header
LB: loop body
LE: loop exit
PB: predicated region body
PF: predicated region fallthrough
CT: control target
= control target key end

     0   :  { %6 = vsyncpa [#allocation3], 0  ;;  %s125_s0 = inlined_call_operand.hbm [shape: f32[8,128], index: 0, kind: input, shape index: {}]   ;;  %s126_s1 = inlined_call_operand.hbm [shape: f32[8,128], index: 1, kind: output, shape index: {}]  }
   0x1   :  { %7 = vsyncpa [#allocation4], 0  ;;  %s89_s6 = smov [#allocation2]   ;;  %s41_s10 = scalar_lea.hbm %s125_s0, 128 }
   0x2   :  { %s14_s7 = sshll.u32 %s89_s6, 4  ;;  %p42_p0 = scmp.ne.s32.totalorder %s125_s0, %s41_s10  ;;  %s15_s7 = int_to_ptr.vmem [resolvable:$true] %s14_s7 }
   0x3   :  { %p45_p1 = scmp.lt.u32.totalorder %s41_s10, %s125_s0 }
   0x5   :  { %p47_p2 = pnand %p45_p1, %p42_p0 }
   0x7   :  { %50 = shalt.err (!%p47_p2)
}
   0x8   :  { %s51_s15 = scalar_lea.vmem %s15_s7, 128  ;;  %p56_p4 = scmp.lt.s32.totalorder %s15_s7, %s15_s7 }
   0x9   :  { %p52_p3 = scmp.ne.s32.totalorder %s15_s7, %s51_s15  ;;  %p57_p5 = scmp.lt.s32.totalorder %s51_s15, %s51_s15 }
   0xb   :  { %p58_p6 = por %p57_p5, %p56_p4 }
   0xd   :  { %p59_p7 = pnand %p58_p6, %p52_p3 }
   0xf   :  { %62 = shalt.err (!%p59_p7)
}
  0x10   :  { %17 = dma.hbm_to_vmem [thread:$0]  %s125_s0, 128, %s15_s7, [#allocation3]  }
  0x11   :  { %85 = dma.done.wait [#allocation3], 128  }
  0x12   :  { %86 = vsyncadd [#allocation3], 4294967168  ;;  %s90_s18 = smov [#allocation5]   ;;  %v21_v0 = vld [vmem:[#allocation2] sm:$0xff] }
  0x13   :  { %s30_s19 = sshll.u32 %s90_s18, 4  ;;  %v22_v1 = vadd.f32 1.0, %v21_v0  ;;  %s31_s19 = int_to_ptr.vmem [resolvable:$true] %s30_s19 }
  0x14   :  { %s63_s20 = scalar_lea.vmem %s31_s19, 128  ;;  %p68_p9 = scmp.lt.s32.totalorder %s31_s19, %s31_s19 }
  0x15   :  { %23 = vst [vmem:[#allocation5] sm:$0xff] %v22_v1  ;;  %p64_p8 = scmp.ne.s32.totalorder %s31_s19, %s63_s20  ;;  %p69_p10 = scmp.lt.s32.totalorder %s63_s20, %s63_s20 }
  0x17   :  { %p70_p11 = por %p69_p10, %p68_p9 }
  0x19   :  { %p71_p12 = pnand %p70_p11, %p64_p8 }
  0x1b   :  { %74 = shalt.err (!%p71_p12)
}
  0x1c   :  { %s75_s23 = scalar_lea.hbm %s126_s1, 128 }
  0x1d   :  { %p76_p13 = scmp.ne.s32.totalorder %s126_s1, %s75_s23  ;;  %p79_p0 = scmp.lt.u32.totalorder %s75_s23, %s126_s1 }
  0x1f   :  { %p81_p1 = pnand %p79_p0, %p76_p13 }
  0x21   :  { %84 = shalt.err (!%p81_p1)
}
  0x22   :  { %33 = dma.vmem_to_hbm [thread:$0]  %s31_s19, 128, %s126_s1, [#allocation4]  }
  0x23   :  { %87 = dma.done.wait [#allocation4], 128  }
  0x24   :  { %88 = vsyncadd [#allocation4], 4294967168 }
  0x25   :  { %37 = vsyncpa [#allocation3], 1 }
  0x26   :  { %38 = vsyncpa [#allocation4], 1 }

// kernel: local_attention_forward.4
= control target key start
LH: loop header
LB: loop body
LE: loop exit
PB: predicated region body
PF: predicated region fallthrough
CT: control target
= control target key end

     0   :  { %9 = vsyncpa [#allocation4], 0  ;;  %s7123_s0 = inlined_call_operand.hbm [shape: f32[2,4,256], index: 0, kind: input, shape index: {}]   ;;  %s7124_s1 = inlined_call_operand.hbm [shape: bf16[16,4], index: 1, kind: input, shape index: {}]   ;;  %s7125_s2 = inlined_call_operand.hbm [shape: f32[16,1], index: 2, kind: input, shape index: {}]   ;;  %s7126_s3 = inlined_call_operand.hbm [shape: f32[16,4], index: 3, kind: input, shape index: {}]   ;;  %s7127_s4 = inlined_call_operand.hbm [shape: f32[2,16,4,4], index: 4, kind: output, shape index: {}]  }
   0x1   :  { %10 = vsyncpa [#allocation7], 0 }
   0x2   :  { %11 = vsyncpa [#allocation10], 0 }
   0x3   :  { %12 = vsyncpa [#allocation5], 0  ;;  %s4916_s15 = smov [#allocation6]   ;;  %s4798_s19 = scalar_lea.hbm %s7124_s1, 128 }
   0x4   :  { %s30_s16 = sshll.u32 %s4916_s15, 4  ;;  %p4799_p0 = scmp.ne.s32.totalorder %s7124_s1, %s4798_s19  ;;  %s31_s16 = int_to_ptr.vmem [resolvable:$true] %s30_s16 }
   0x5   :  { %p4802_p1 = scmp.lt.u32.totalorder %s4798_s19, %s7124_s1 }
   0x7   :  { %p4804_p2 = pnand %p4802_p1, %p4799_p0 }
   0x9   :  { %4807 = shalt.err (!%p4804_p2)
}
   0xa   :  { %s4808_s24 = scalar_lea.vmem %s31_s16, 128  ;;  %p4813_p4 = scmp.lt.s32.totalorder %s31_s16, %s31_s16 }
   0xb   :  { %p4809_p3 = scmp.ne.s32.totalorder %s31_s16, %s4808_s24  ;;  %p4814_p5 = scmp.lt.s32.totalorder %s4808_s24, %s4808_s24 }
   0xd   :  { %p4815_p6 = por %p4814_p5, %p4813_p4 }
   0xf   :  { %p4816_p7 = pnand %p4815_p6, %p4809_p3 }
  0x11   :  { %4819 = shalt.err (!%p4816_p7)
}
  0x12   :  { %s4917_s25 = smov 64   ;;  %s4918_s26 = smov 4  }
  0x13   :  { %36 = dma.hbm_to_vmem [thread:$0]  %s7124_s1, 128, %s31_s16, [#allocation7], %s4917_s25, %s4917_s25, %s4918_s26  }
  0x14   :  { %s4919_s29 = smov [#allocation3]   ;;  %s4820_s7 = scalar_lea.hbm %s7123_s0, 256 }
  0x15   :  { %s18_s30 = sshll.u32 %s4919_s29, 4  ;;  %p4821_p8 = scmp.ne.s32.totalorder %s7123_s0, %s4820_s7  ;;  %s19_s30 = int_to_ptr.vmem [resolvable:$true] %s18_s30 }
  0x16   :  { %p4824_p9 = scmp.lt.u32.totalorder %s4820_s7, %s7123_s0 }
  0x18   :  { %p4826_p10 = pnand %p4824_p9, %p4821_p8 }
  0x1a   :  { %4829 = shalt.err (!%p4826_p10)
}
  0x1b   :  { %s4830_s12 = scalar_lea.vmem %s19_s30, 256  ;;  %p4835_p12 = scmp.lt.s32.totalorder %s19_s30, %s19_s30 }
  0x1c   :  { %p4831_p11 = scmp.ne.s32.totalorder %s19_s30, %s4830_s12  ;;  %p4836_p13 = scmp.lt.s32.totalorder %s4830_s12, %s4830_s12 }
  0x1e   :  { %p4837_p0 = por %p4836_p13, %p4835_p12 }
  0x20   :  { %p4838_p1 = pnand %p4837_p0, %p4831_p11 }
  0x22   :  { %4841 = shalt.err (!%p4838_p1)
}
  0x23   :  { %s4920_s1 = smov 128   ;;  %s4921_s13 = smov 8  }
  0x24   :  { %24 = dma.hbm_to_vmem [thread:$0]  %s7123_s0, 256, %s19_s30, [#allocation4], %s4920_s1, %s4920_s1, %s4921_s13  }
  0x25   :  { %s4922_s16 = smov [#allocation8]   ;;  %s4923_s18 = smov [#allocation9]  }
  0x26   :  { %s42_s17 = sshll.u32 %s4922_s16, 4  ;;  %s54_s19 = sshll.u32 %s4923_s18, 4  ;;  %s43_s17 = int_to_ptr.vmem [resolvable:$true] %s42_s17  ;;  %s4987_s19 = int_to_ptr.vmem [resolvable:$true] %s54_s19 }
  0x27   :  { %s4842_s22 = scalar_lea.hbm %s7125_s2, 256 }
  0x28   :  { %p4843_p2 = scmp.ne.s32.totalorder %s7125_s2, %s4842_s22  ;;  %p4846_p3 = scmp.lt.u32.totalorder %s4842_s22, %s7125_s2 }
  0x2a   :  { %p4848_p4 = pnand %p4846_p3, %p4843_p2 }
  0x2c   :  { %4851 = shalt.err (!%p4848_p4)
}
  0x2d   :  { %s4852_s0 = scalar_lea.vmem %s43_s17, 256  ;;  %p4857_p6 = scmp.lt.s32.totalorder %s43_s17, %s43_s17 }
  0x2e   :  { %p4853_p5 = scmp.ne.s32.totalorder %s43_s17, %s4852_s0  ;;  %p4858_p7 = scmp.lt.s32.totalorder %s4852_s0, %s4852_s0 }
  0x30   :  { %p4859_p8 = por %p4858_p7, %p4857_p6 }
  0x32   :  { %p4860_p9 = pnand %p4859_p8, %p4853_p5 }
  0x34   :  { %4863 = shalt.err (!%p4860_p9)
}
  0x35   :  { %48 = dma.hbm_to_vmem [thread:$0]  %s7125_s2, 256, %s43_s17, [#allocation7], %s4920_s1, %s4920_s1, %s4921_s13  }
  0x36   :  { %s4864_s7 = scalar_lea.hbm %s7126_s3, 256 }
  0x37   :  { %p4865_p10 = scmp.ne.s32.totalorder %s7126_s3, %s4864_s7  ;;  %p4868_p11 = scmp.lt.u32.totalorder %s4864_s7, %s7126_s3 }
  0x39   :  { %p4870_p12 = pnand %p4868_p11, %p4865_p10 }
  0x3b   :  { %4873 = shalt.err (!%p4870_p12)
}
  0x3c   :  { %s4874_s12 = scalar_lea.vmem %s4987_s19, 256  ;;  %p4879_p0 = scmp.lt.s32.totalorder %s4987_s19, %s4987_s19 }
  0x3d   :  { %p4875_p13 = scmp.ne.s32.totalorder %s4987_s19, %s4874_s12  ;;  %p4880_p1 = scmp.lt.s32.totalorder %s4874_s12, %s4874_s12 }
  0x3f   :  { %p4881_p2 = por %p4880_p1, %p4879_p0 }
  0x41   :  { %p4882_p3 = pnand %p4881_p2, %p4875_p13 }
  0x43   :  { %4885 = shalt.err (!%p4882_p3)
}
  0x44   :  { %60 = dma.hbm_to_vmem [thread:$0]  %s7126_s3, 256, %s4987_s19, [#allocation10], %s4920_s1, %s4920_s1, %s4921_s13  }
  0x45   :  { %4908 = dma.done.wait [#allocation4], 256  }
  0x46   :  { %4909 = vsyncadd [#allocation4], 4294967040 }
  0x47   :  { %4910 = dma.done.wait [#allocation7], 384  }
  0x48   :  { %4911 = vsyncadd [#allocation7], 4294966912 }
  0x49   :  { %4912 = dma.done.wait [#allocation10], 256  }
  0x4a   :  { %4913 = vsyncadd [#allocation10], 4294967040  ;;  %v4924_v0 = vmov 0   ;;  %v78_v1 = vld [vmem:[#allocation3] sm:$0xff]  ;;  %vm103_vm0 = vcmask 1041408   ;;  %v2042_v2 = vld [vmem:[#allocation3 + $0x8] sm:$0xff] }
  0x4b   :  { %142 = vmatprep.mubr.bf16.mxu0 %v4924_v0  ;;  %2086 = vmatprep.mubr.bf16.mxu1 %v4924_v0  ;;  %v80_v3 = vcombine.high %v78_v1, %v78_v1  ;;  %v2044_v4 = vcombine.high %v2042_v2, %v2042_v2  ;;  %v82_v5 = vpack.c.bf16 %v78_v1, %v78_v1  ;;  %v76_v7 = vld [vmem:[#allocation8] sm:$0xff]  ;;  %v77_v12 = vld [vmem:[#allocation8 + $0x8] sm:$0xff]  ;;  %v4717_v13 = vld [vmem:[#allocation6] sm:$0xff]   ;;  %vm99_vm1 = vcmask 31744   ;;  %s4925_s3 = smov 80   ;;  %s4926_s1 = smov 112  }
  0x4c   :  { %4714 = vset.pattern.permute.xlu0 %v4924_v0  ;;  %v2046_v6 = vpack.c.bf16 %v2042_v2, %v2042_v2  ;;  %s4927_s13 = smov 96   ;;  %s4928_s15 = smov 48   ;;  %vm395_vm2 = vcmask 122880   ;;  %vm4147_vm3 = vcmask 130048   ;;  %vm4517_vm4 = vcmask 27648  }
  0x4d   :  { %86 = vperm.xlu0 %4714, %v76_v7   ;;  %v83_v8 = vpack.c.bf16 %v80_v3, %v80_v3  ;;  %v2047_v9 = vpack.c.bf16 %v2044_v4, %v2044_v4  ;;  %v105_v10 = vsel %vm103_vm0, %v82_v5, 0  ;;  %s4929_s16 = smov 32   ;;  %s4931_s17 = smov [#allocation11]  }
  0x4e   :  { %v2049_v11 = vsel %vm103_vm0, %v2046_v6, 0  ;;  %s4555_s18 = sshll.u32 %s4931_s17, 4  ;;  %s4556_s18 = int_to_ptr.vmem [resolvable:$true] %s4555_s18 }
  0x4f   :  { %4570 = vmatprep.subr.msk.bf16.mxu0 %vm103_vm0, %v83_v8  ;;  %4572 = vmatprep.subr.msk.bf16.mxu1 %vm103_vm0, %v2047_v9  ;;  %s4886_s19 = scalar_lea.vmem %s4556_s18, 2048  ;;  %p4891_p5 = scmp.lt.s32.totalorder %s4556_s18, %s4556_s18 }
  0x50   :  { %111 = vmatpush1.bf16.msra.mxu0 %v105_v10  ;;  %2055 = vmatpush1.bf16.msra.mxu1 %v2049_v11  ;;  %p4887_p4 = scmp.ne.s32.totalorder %s4556_s18, %s4886_s19  ;;  %p4892_p6 = scmp.lt.s32.totalorder %s4886_s19, %s4886_s19 }
  0x51   :  { %91 = vperm.xlu0 %4714, %v77_v12  }
  0x52   :  { %p4893_p7 = por %p4892_p6, %p4891_p5 }
  0x53   :  { %4571 = vmatmul.mubr.msk.bf16.vlgmr.msra.gmra.mrb[0].mxu0 %vm99_vm1, %v4717_v13  ;;  %4573 = vmatmul.mubr.msk.bf16.vlgmr.msra.gmra.mrb[0].mxu1 %vm99_vm1, %v4717_v13 }
  0x54   :  { %p4894_p8 = pnand %p4893_p7, %p4887_p4 }
  0xcc   :  { %v87_v14 = vpop.permute.xlu0 %86 }
  0xd0   :  { %v92_v15 = vpop.permute.xlu0 %91 }
 0x126   :  { %v144_v16 = vpop.f32.mrb[0].mxu0  ;;  %v2088_v17 = vpop.f32.mrb[0].mxu1 }
 0x127   :  { %v5024_v18 = vadd.f32 %v144_v16, %v87_v14  ;;  %v5026_v19 = vadd.f32 %v2088_v17, %v87_v14  ;;  %v146_v20 = vpop.f32.mrb[1].mxu0  ;;  %v2090_v21 = vpop.f32.mrb[1].mxu1  ;;  %v285_v17 = vlaneseq }
 0x128   :  { %v5028_v22 = vadd.f32 %v146_v20, %v87_v14  ;;  %v5030_v23 = vadd.f32 %v2090_v21, %v87_v14  ;;  %v148_v24 = vpop.f32.mrb[2].mxu0  ;;  %v2092_v25 = vpop.f32.mrb[2].mxu1 }
 0x129   :  { %v150_v26 = vpop.f32.mrb[3].mxu0  ;;  %v2094_v27 = vpop.f32.mrb[3].mxu1  ;;  %v5032_v28 = vadd.f32 %v148_v24, %v92_v15  ;;  %v5040_v32 = vadd.f32 %v2092_v25, %v92_v15 }
 0x12a   :  { %v5034_v29 = vadd.f32 %v150_v26, %v92_v15  ;;  %v2097_v30 = vmax.f32 %v5026_v19, %v5030_v23  ;;  %v153_v31 = vmax.f32 %v5024_v18, %v5028_v22  ;;  %v5042_v33 = vadd.f32 %v2094_v27, %v92_v15 }
 0x12b   :  { %v4930_v15 = vmov 1966171168  }
 0x12c   :  { %2098 = vmax.xlane.f32.xlu0 %v2097_v30  ;;  %154 = vmax.xlane.f32.xlu1 %v153_v31  ;;  %v156_v34 = vmax.f32 %v5032_v28, %v5034_v29  ;;  %v2100_v35 = vmax.f32 %v5040_v32, %v5042_v33  ;;  %v283_v16 = vunpack.c.l.s4 %v4930_v15 }
 0x130   :  { %157 = vmax.xlane.f32.xlu1 %v156_v34 }
 0x134   :  { %2101 = vmax.xlane.f32.xlu1 %v2100_v35 }
 0x1b9   :  { %v155_v36 = vpop.xlane.xlu1 %154  ;;  %v2099_v38 = vpop.xlane.xlu0 %2098 }
 0x1ba   :  { %v159_v37 = vsub.f32 %v5024_v18, %v155_v36  ;;  %v2104_v40 = vsub.f32 %v5030_v23, %v2099_v38  ;;  %v2103_v43 = vsub.f32 %v5026_v19, %v2099_v38  ;;  %v160_v45 = vsub.f32 %v5028_v22, %v155_v36 }
 0x1bc   :  { %v163_v39 = vmax.f32 %v159_v37, -60.0  ;;  %v2108_v42 = vmax.f32 %v2104_v40, -60.0  ;;  %v2107_v46 = vmax.f32 %v2103_v43, -60.0  ;;  %v164_v47 = vmax.f32 %v160_v45, -60.0 }
 0x1bd   :  { %v158_v52 = vpop.xlane.xlu1 %157 }
 0x1be   :  { %v167_v41 = vmul.f32 1.442695, %v163_v39  ;;  %v2113_v44 = vmul.f32 1.442695, %v2108_v42  ;;  %v2111_v49 = vmul.f32 1.442695, %v2107_v46  ;;  %v161_v53 = vsub.f32 %v5032_v28, %v158_v52 }
 0x1bf   :  { %v169_v50 = vmul.f32 1.442695, %v164_v47  ;;  %v162_v59 = vsub.f32 %v5034_v29, %v158_v52 }
 0x1c0   :  { %4750 = vpow2.f32 %v167_v41  ;;  %v165_v56 = vmax.f32 %v161_v53, -60.0 }
 0x1c1   :  { %4752 = vpow2.f32 %v2113_v44  ;;  %v166_v61 = vmax.f32 %v162_v59, -60.0  ;;  %v2102_v63 = vpop.xlane.xlu1 %2101 }
 0x1c2   :  { %4754 = vpow2.f32 %v2111_v49  ;;  %v171_v57 = vmul.f32 1.442695, %v165_v56  ;;  %v2105_v1 = vsub.f32 %v5040_v32, %v2102_v63  ;;  %v2106_v2 = vsub.f32 %v5042_v33, %v2102_v63 }
 0x1c3   :  { %4756 = vpow2.f32 %v169_v50  ;;  %v173_v62 = vmul.f32 1.442695, %v166_v61 }
 0x1c4   :  { %4758 = vpow2.f32 %v171_v57  ;;  %v2109_v3 = vmax.f32 %v2105_v1, -60.0  ;;  %v2110_v4 = vmax.f32 %v2106_v2, -60.0 }
 0x1c5   :  { %4760 = vpow2.f32 %v173_v62 }
 0x1c6   :  { %v2115_v5 = vmul.f32 1.442695, %v2109_v3  ;;  %v2117_v6 = vmul.f32 1.442695, %v2110_v4 }
 0x1c8   :  { %4762 = vpow2.f32 %v2115_v5 }
 0x1c9   :  { %4764 = vpow2.f32 %v2117_v6 }
 0x1ca   :  { %v5052_v48 = vpop.eup %4750 }
 0x1cb   :  { %215 = vrot.lane.b32.xlu1 %v5052_v48, %s4925_s3  ;;  %181 = vrot.lane.b32.xlu0 %v5052_v48, %s4926_s1  ;;  %v5062_v51 = vpop.eup %4752  ;;  %v5095_v58 = vmul.f32 %v5052_v48, %v5024_v18 }
 0x1cc   :  { %v5073_v54 = vpop.eup %4754  ;;  %v5198_v11 = vmul.f32 %v5062_v51, %v5030_v23  ;;  %v5216_v23 = vshrl.u32 %v285_v17, 7 }
 0x1cd   :  { %v5075_v55 = vpop.eup %4756  ;;  %v5170_v10 = vmul.f32 %v5073_v54, %v5026_v19 }
 0x1ce   :  { %v5102_v60 = vpop.eup %4758  ;;  %v5150_v7 = vmul.f32 %v5075_v55, %v5028_v22  ;;  %v284_v22 = vunpack.c.0.s8 %v283_v16 }
 0x1cf   :  { %231 = vrot.lane.b32.xlu1 %v5052_v48, %s4917_s25  ;;  %199 = vrot.lane.b32.xlu0 %v5052_v48, %s4927_s13  ;;  %v5124_v0 = vpop.eup %4760  ;;  %v5234_v35 = vmul.f32 %v5102_v60, %v5032_v28 }
 0x1d0   :  { %v5228_v30 = vsub.s32 %v284_v22, %v5216_v23  ;;  %v5286_v3 = vmul.f32 %v5124_v0, %v5034_v29 }
 0x1d2   :  { %v5156_v8 = vpop.eup %4762  ;;  %7156 = vst [vmem:[#allocation16_spill] sm:$0xff] %v5286_v3 }
 0x1d3   :  { %247 = vrot.lane.b32.xlu1 %v5052_v48, %s4928_s15  ;;  %3493 = vrot.lane.b32.xlu0 %v5062_v51, %s4926_s1  ;;  %v5162_v9 = vpop.eup %4764 }
 0x1d4   :  { %v5325_v22 = vmul.f32 %v5162_v9, %v5042_v33 }
 0x1d6   :  { %7157 = vst [vmem:[#allocation17_spill] sm:$0xff] %v5325_v22 }
 0x1d7   :  { %263 = vrot.lane.b32.xlu1 %v5052_v48, %s4929_s16  ;;  %2981 = vrot.lane.b32.xlu0 %v5062_v51, %s4927_s13 }
 0x1db   :  { %547 = vrot.lane.b32.xlu1 %v5075_v55, %s4928_s15  ;;  %2159 = vrot.lane.b32.xlu0 %v5073_v54, %s4925_s3 }
 0x1df   :  { %565 = vrot.lane.b32.xlu1 %v5075_v55, %s4929_s16  ;;  %2175 = vrot.lane.b32.xlu0 %v5073_v54, %s4917_s25 }
 0x1e3   :  { %1037 = vrot.lane.b32.xlu1 %v5075_v55, %s4927_s13  ;;  %2509 = vrot.lane.b32.xlu0 %v5062_v51, %s4929_s16 }
 0x1e7   :  { %1053 = vrot.lane.b32.xlu1 %v5075_v55, %s4925_s3  ;;  %2191 = vrot.lane.b32.xlu0 %v5073_v54, %s4928_s15 }
 0x1eb   :  { %1069 = vrot.lane.b32.xlu1 %v5075_v55, %s4917_s25  ;;  %191 = vrot.lane.b32.xlu0 %v5095_v58, %s4926_s1 }
 0x1ef   :  { %1549 = vrot.lane.b32.xlu1 %v5075_v55, %s4926_s1  ;;  %201 = vrot.lane.b32.xlu0 %v5102_v60, %s4927_s13 }
 0x1f3   :  { %2125 = vrot.lane.b32.xlu1 %v5073_v54, %s4926_s1  ;;  %217 = vrot.lane.b32.xlu0 %v5102_v60, %s4925_s3 }
 0x1f7   :  { %2143 = vrot.lane.b32.xlu1 %v5073_v54, %s4927_s13  ;;  %233 = vrot.lane.b32.xlu0 %v5102_v60, %s4917_s25 }
 0x1fb   :  { %2997 = vrot.lane.b32.xlu1 %v5062_v51, %s4925_s3  ;;  %249 = vrot.lane.b32.xlu0 %v5102_v60, %s4928_s15 }
 0x1ff   :  { %3013 = vrot.lane.b32.xlu1 %v5062_v51, %s4917_s25  ;;  %265 = vrot.lane.b32.xlu0 %v5102_v60, %s4929_s16 }
 0x203   :  { %2491 = vrot.lane.b32.xlu1 %v5062_v51, %s4928_s15  ;;  %549 = vrot.lane.b32.xlu0 %v5124_v0, %s4928_s15 }
 0x207   :  { %2207 = vrot.lane.b32.xlu1 %v5073_v54, %s4929_s16  ;;  %567 = vrot.lane.b32.xlu0 %v5124_v0, %s4929_s16 }
 0x20b   :  { %1039 = vrot.lane.b32.xlu0 %v5124_v0, %s4927_s13  ;;  %183 = vrot.lane.b32.xlu1 %v5102_v60, %s4926_s1 }
 0x20f   :  { %1055 = vrot.lane.b32.xlu0 %v5124_v0, %s4925_s3  ;;  %207 = vrot.lane.b32.xlu1 %v5095_v58, %s4927_s13 }
 0x213   :  { %1071 = vrot.lane.b32.xlu0 %v5124_v0, %s4917_s25  ;;  %223 = vrot.lane.b32.xlu1 %v5095_v58, %s4925_s3 }
 0x217   :  { %1557 = vrot.lane.b32.xlu0 %v5150_v7, %s4926_s1  ;;  %239 = vrot.lane.b32.xlu1 %v5095_v58, %s4917_s25 }
 0x21b   :  { %255 = vrot.lane.b32.xlu1 %v5095_v58, %s4928_s15  ;;  %2127 = vrot.lane.b32.xlu0 %v5156_v8, %s4926_s1 }
 0x21f   :  { %271 = vrot.lane.b32.xlu1 %v5095_v58, %s4929_s16  ;;  %3495 = vrot.lane.b32.xlu0 %v5162_v9, %s4926_s1 }
 0x223   :  { %557 = vrot.lane.b32.xlu1 %v5150_v7, %s4928_s15  ;;  %2135 = vrot.lane.b32.xlu0 %v5170_v10, %s4926_s1 }
 0x227   :  { %573 = vrot.lane.b32.xlu1 %v5150_v7, %s4929_s16  ;;  %2161 = vrot.lane.b32.xlu0 %v5156_v8, %s4925_s3 }
 0x22b   :  { %1045 = vrot.lane.b32.xlu1 %v5150_v7, %s4927_s13  ;;  %2151 = vrot.lane.b32.xlu0 %v5170_v10, %s4927_s13 }
 0x22f   :  { %1061 = vrot.lane.b32.xlu1 %v5150_v7, %s4925_s3  ;;  %2177 = vrot.lane.b32.xlu0 %v5156_v8, %s4917_s25 }
 0x233   :  { %1077 = vrot.lane.b32.xlu1 %v5150_v7, %s4917_s25  ;;  %2167 = vrot.lane.b32.xlu0 %v5170_v10, %s4925_s3 }
 0x237   :  { %1551 = vrot.lane.b32.xlu1 %v5124_v0, %s4926_s1  ;;  %2493 = vrot.lane.b32.xlu0 %v5162_v9, %s4928_s15 }
 0x23b   :  { %2145 = vrot.lane.b32.xlu1 %v5156_v8, %s4927_s13  ;;  %3021 = vrot.lane.b32.xlu0 %v5198_v11, %s4917_s25 }
 0x23d   :  { %v182_v12 = vpop.permute.xlu0 %181  ;;  %v216_v13 = vpop.permute.xlu1 %215 }
 0x23e   :  { %v5209_v14 = vadd.f32 %v5052_v48, %v182_v12 }
 0x23f   :  { %2983 = vrot.lane.b32.xlu1 %v5162_v9, %s4927_s13  ;;  %2517 = vrot.lane.b32.xlu0 %v5198_v11, %s4929_s16 }
 0x241   :  { %v200_v18 = vpop.permute.xlu0 %199  ;;  %v232_v19 = vpop.permute.xlu1 %231 }
 0x242   :  { %v205_v20 = vadd.f32 %v200_v18, %v5209_v14  ;;  %v5312_v18 = vmul.f32 %v5156_v8, %v5040_v32 }
 0x243   :  { %3501 = vrot.lane.b32.xlu1 %v5198_v11, %s4926_s1  ;;  %2209 = vrot.lane.b32.xlu0 %v5156_v8, %s4929_s16 }
 0x244   :  { %v221_v21 = vadd.f32 %v216_v13, %v205_v20 }
 0x245   :  { %v5218_v24 = vpop.permute.xlu0 %3493  ;;  %v248_v25 = vpop.permute.xlu1 %247 }
 0x246   :  { %v5220_v26 = vadd.f32 %v232_v19, %v221_v21 }
 0x247   :  { %2999 = vrot.lane.b32.xlu1 %v5162_v9, %s4925_s3  ;;  %2215 = vrot.lane.b32.xlu0 %v5170_v10, %s4929_s16 }
 0x248   :  { %v253_v27 = vadd.f32 %v248_v25, %v5220_v26 }
 0x249   :  { %v5230_v31 = vpop.permute.xlu0 %2981  ;;  %v264_v34 = vpop.permute.xlu1 %263 }
 0x24a   :  { %v269_v36 = vadd.f32 %v264_v34, %v253_v27 }
 0x24b   :  { %2989 = vrot.lane.b32.xlu1 %v5198_v11, %s4927_s13  ;;  %193 = vrot.lane.b32.xlu0 %v5234_v35, %s4926_s1 }
 0x24c   :  { %v281_v37 = vcombine.high %v269_v36, %v269_v36  ;;  %v288_v38 = vrot.slane %v269_v36, %v5228_v30 }
 0x24d   :  { %v2160_v39 = vpop.permute.xlu0 %2159  ;;  %v5241_v40 = vpop.permute.xlu1 %547 }
 0x24e   :  { %v295_v41 = vrot.slane %v281_v37, %v5228_v30  ;;  %v296_v42 = vcombine.high %v288_v38, %v288_v38  ;;  %v304_v28 = vrot.slane %v288_v38, %v5228_v30 }
 0x24f   :  { %3015 = vrot.lane.b32.xlu1 %v5162_v9, %s4917_s25  ;;  %209 = vrot.lane.b32.xlu0 %v5234_v35, %s4927_s13 }
 0x250   :  { %v297_v43 = vcombine.high %v295_v41, %v295_v41  ;;  %v311_v44 = vrot.slane %v295_v41, %v5228_v30  ;;  %v318_v45 = vrot.slane %v296_v42, %v5228_v30  ;;  %v326_v46 = vcombine.high %v304_v28, %v304_v28  ;;  %396 = vst.msk [vmem:[#allocation2] sm:$0x1] %vm395_vm2, %v304_v28 }
 0x251   :  { %v2176_v47 = vpop.permute.xlu0 %2175  ;;  %v5252_v48 = vpop.permute.xlu1 %565 }
 0x252   :  { %v325_v49 = vrot.slane %v297_v43, %v5228_v30  ;;  %v327_v50 = vcombine.high %v311_v44, %v311_v44  ;;  %v328_v52 = vcombine.high %v318_v45, %v318_v45  ;;  %397 = vst.msk [vmem:[#allocation2 + $0x4] sm:$0x1] %vm395_vm2, %v318_v45  ;;  %398 = vst.msk [vmem:[#allocation2 + $0x8] sm:$0x1] %vm395_vm2, %v326_v46 }
 0x253   :  { %400 = vst.msk [vmem:[#allocation2 + $0x10] sm:$0x1] %vm395_vm2, %v311_v44  ;;  %3005 = vrot.lane.b32.xlu1 %v5198_v11, %s4925_s3  ;;  %225 = vrot.lane.b32.xlu0 %v5234_v35, %s4925_s3  ;;  %v3499_v44 = vadd.f32 %v5062_v51, %v5218_v24 }
 0x254   :  { %v329_v53 = vcombine.high %v325_v49, %v325_v49  ;;  %399 = vst.msk [vmem:[#allocation2 + $0xc] sm:$0x1] %vm395_vm2, %v328_v52  ;;  %401 = vst.msk [vmem:[#allocation2 + $0x14] sm:$0x1] %vm395_vm2, %v325_v49 }
 0x255   :  { %402 = vst.msk [vmem:[#allocation2 + $0x18] sm:$0x1] %vm395_vm2, %v327_v50  ;;  %v5265_v56 = vpop.permute.xlu0 %2509  ;;  %v1038_v57 = vpop.permute.xlu1 %1037 }
 0x256   :  { %403 = vst.msk [vmem:[#allocation2 + $0x1c] sm:$0x1] %vm395_vm2, %v329_v53 }
 0x257   :  { %2183 = vrot.lane.b32.xlu1 %v5170_v10, %s4917_s25  ;;  %241 = vrot.lane.b32.xlu0 %v5234_v35, %s4917_s25 }
 0x259   :  { %v2192_v59 = vpop.permute.xlu0 %2191  ;;  %v1054_v61 = vpop.permute.xlu1 %1053 }
 0x25b   :  { %2511 = vrot.lane.b32.xlu1 %v5162_v9, %s4929_s16  ;;  %257 = vrot.lane.b32.xlu0 %v5234_v35, %s4928_s15 }
 0x25d   :  { %v5276_v62 = vpop.permute.xlu0 %191  ;;  %v1070_v63 = vpop.permute.xlu1 %1069 }
 0x25f   :  { %2501 = vrot.lane.b32.xlu1 %v5198_v11, %s4928_s15  ;;  %273 = vrot.lane.b32.xlu0 %v5234_v35, %s4929_s16 }
 0x261   :  { %v5282_v1 = vpop.permute.xlu0 %201  ;;  %v1550_v2 = vpop.permute.xlu1 %1549 }
 0x262   :  { %v1555_v29 = vadd.f32 %v5075_v55, %v1550_v2 }
 0x263   :  { %2193 = vrot.lane.b32.xlu1 %v5156_v8, %s4928_s15  ;;  %559 = vrot.lane.b32.xlu0 %v5286_v3, %s4928_s15 }
 0x264   :  { %v1565_v19 = vadd.f32 %v1555_v29, %v1038_v57 }
 0x265   :  { %v5292_v4 = vpop.permute.xlu0 %217  ;;  %v2126_v5 = vpop.permute.xlu1 %2125 }
 0x266   :  { %v2131_v13 = vadd.f32 %v5073_v54, %v2126_v5  ;;  %v1043_v54 = vadd.f32 %v1038_v57, %v5209_v14  ;;  %v1569_v25 = vadd.f32 %v1565_v19, %v1054_v61  ;;  %v553_v14 = vadd.f32 %v5241_v40, %v5220_v26 }
 0x267   :  { %2199 = vrot.lane.b32.xlu1 %v5170_v10, %s4928_s15  ;;  %575 = vrot.lane.b32.xlu0 %v5286_v3, %s4929_s16 }
 0x268   :  { %v1059_v32 = vadd.f32 %v1054_v61, %v1043_v54  ;;  %v5338_v33 = vadd.f32 %v5252_v48, %v553_v14  ;;  %v1573_v38 = vadd.f32 %v1569_v25, %v1070_v63  ;;  %v2987_v24 = vadd.f32 %v5230_v31, %v2131_v13 }
 0x269   :  { %v5298_v6 = vpop.permute.xlu0 %233  ;;  %v2144_v12 = vpop.permute.xlu1 %2143 }
 0x26a   :  { %v2149_v15 = vadd.f32 %v2144_v12, %v2131_v13  ;;  %v1075_v27 = vadd.f32 %v1070_v63, %v1059_v32  ;;  %v5349_v28 = vrot.slane %v5338_v33, %v5228_v30  ;;  %v1577_v43 = vadd.f32 %v1573_v38, %v5241_v40 }
 0x26b   :  { %1559 = vrot.lane.b32.xlu1 %v5286_v3, %s4926_s1  ;;  %1047 = vrot.lane.b32.xlu0 %v5286_v3, %s4927_s13  ;;  %v583_v54 = vcombine.high %v5338_v33, %v5338_v33 }
 0x26c   :  { %v2165_v55 = vadd.f32 %v2160_v39, %v2149_v15  ;;  %v1085_v39 = vadd.f32 %v1075_v27, %v5241_v40  ;;  %v5366_v51 = vadd.f32 %v1577_v43, %v5252_v48  ;;  %v5374_v57 = vrot.slane %v5349_v28, %v5228_v30 }
 0x26d   :  { %v5306_v16 = vpop.permute.xlu0 %249  ;;  %v5308_v17 = vpop.permute.xlu1 %2997  ;;  %v5432_v43 = vrot.slane %v583_v54, %v5228_v30 }
 0x26e   :  { %v2181_v34 = vadd.f32 %v2176_v47, %v2165_v55  ;;  %v5359_v46 = vadd.f32 %v1085_v39, %v5252_v48  ;;  %v3509_v47 = vadd.f32 %v3499_v44, %v5230_v31  ;;  %v5383_v31 = vsub.s32 0, %v5216_v23 }
 0x26f   :  { %1063 = vrot.lane.b32.xlu0 %v5286_v3, %s4925_s3  ;;  %2153 = vrot.lane.b32.xlu1 %v5312_v18, %s4927_s13  ;;  %v3003_v48 = vadd.f32 %v5308_v17, %v2987_v24 }
 0x270   :  { %v2197_v26 = vadd.f32 %v2192_v59, %v2181_v34 }
 0x271   :  { %v5319_v20 = vpop.permute.xlu0 %265  ;;  %v5321_v21 = vpop.permute.xlu1 %3013 }
 0x272   :  { %v3019_v55 = vadd.f32 %v5321_v21, %v3003_v48  ;;  %v5471_v48 = vrot.slane %v5432_v43, %v5228_v30 }
 0x273   :  { %1079 = vrot.lane.b32.xlu0 %v5286_v3, %s4917_s25  ;;  %2991 = vrot.lane.b32.xlu1 %v5325_v22, %s4927_s13 }
 0x275   :  { %v5333_v36 = vpop.permute.xlu0 %549  ;;  %v5335_v37 = vpop.permute.xlu1 %2491 }
 0x276   :  { %v2497_v2 = vadd.f32 %v5335_v37, %v2181_v34  ;;  %v3029_v39 = vadd.f32 %v3019_v55, %v5335_v37 }
 0x277   :  { %3007 = vrot.lane.b32.xlu1 %v5325_v22, %s4925_s3  ;;  %2137 = vrot.lane.b32.xlu0 %v5312_v18, %s4926_s1 }
 0x278   :  { %v5421_v38 = vadd.f32 %v5265_v56, %v2497_v2  ;;  %v5460_v24 = vadd.f32 %v3029_v39, %v5265_v56 }
 0x279   :  { %v5345_v41 = vpop.permute.xlu0 %567  ;;  %v2208_v42 = vpop.permute.xlu1 %2207 }
 0x27a   :  { %v2213_v45 = vadd.f32 %v2208_v42, %v2197_v26  ;;  %v5486_v54 = vrot.slane %v5460_v24, %v5228_v30 }
 0x27b   :  { %3023 = vrot.lane.b32.xlu1 %v5325_v22, %s4917_s25  ;;  %3503 = vrot.lane.b32.xlu0 %v5325_v22, %s4926_s1 }
 0x27c   :  { %v2225_v49 = vcombine.high %v2213_v45, %v2213_v45  ;;  %v2232_v50 = vrot.slane %v2213_v45, %v5228_v30 }
 0x27d   :  { %v5363_v52 = vpop.permute.xlu0 %1039  ;;  %v184_v40 = vpop.permute.xlu1 %183 }
 0x27e   :  { %v5370_v53 = vadd.f32 %v5102_v60, %v184_v40  ;;  %v2239_v59 = vrot.slane %v2225_v49, %v5228_v30  ;;  %v2240_v61 = vcombine.high %v2232_v50, %v2232_v50  ;;  %v2248_v63 = vrot.slane %v2232_v50, %v5228_v30 }
 0x27f   :  { %2519 = vrot.lane.b32.xlu1 %v5325_v22, %s4929_s16  ;;  %2169 = vrot.lane.b32.xlu0 %v5312_v18, %s4925_s3  ;;  %v5387_v60 = vrot.slane %v5359_v46, %v5228_v30  ;;  %v5439_v49 = vadd.f32 %v5276_v62, %v5095_v58  ;;  %v628_v50 = vcombine.high %v5374_v57, %v5374_v57 }
 0x280   :  { %v206_v5 = vadd.f32 %v5282_v1, %v5370_v53  ;;  %v2241_v12 = vcombine.high %v2239_v59, %v2239_v59  ;;  %v2255_v29 = vrot.slane %v2239_v59, %v5228_v30  ;;  %v2262_v13 = vrot.slane %v2240_v61, %v5228_v30  ;;  %2340 = vst.msk [vmem:[#allocation2 + $0x40] sm:$0x1] %vm395_vm2, %v2248_v63 }
 0x281   :  { %v2270_v15 = vcombine.high %v2248_v63, %v2248_v63  ;;  %v5396_v23 = vpop.permute.xlu0 %1055  ;;  %v208_v19 = vpop.permute.xlu1 %207  ;;  %v5404_v1 = vrot.slane %v5366_v51, %v5228_v30  ;;  %v5418_v33 = vrot.slane %v5387_v60, %v5228_v30  ;;  %v5457_v62 = vrot.slane %v5421_v38, %v5228_v30 }
 0x282   :  { %v222_v32 = vadd.f32 %v5292_v4, %v206_v5  ;;  %v2269_v25 = vrot.slane %v2241_v12, %v5228_v30  ;;  %v2271_v14 = vcombine.high %v2255_v29, %v2255_v29  ;;  %v2272_v27 = vcombine.high %v2262_v13, %v2262_v13  ;;  %2341 = vst.msk [vmem:[#allocation2 + $0x44] sm:$0x1] %vm395_vm2, %v2262_v13 }
 0x283   :  { %2342 = vst.msk [vmem:[#allocation2 + $0x48] sm:$0x1] %vm395_vm2, %v2270_v15  ;;  %2344 = vst.msk [vmem:[#allocation2 + $0x50] sm:$0x1] %vm395_vm2, %v2255_v29  ;;  %2201 = vrot.lane.b32.xlu1 %v5312_v18, %s4928_s15  ;;  %2185 = vrot.lane.b32.xlu0 %v5312_v18, %s4917_s25  ;;  %v3513_v4 = vadd.f32 %v3509_v47, %v5308_v17  ;;  %v1196_v58 = vrot.slane %v5418_v33, %v5383_v31 }
 0x284   :  { %v238_v34 = vadd.f32 %v5298_v6, %v222_v32  ;;  %v2273_v26 = vcombine.high %v2269_v25, %v2269_v25  ;;  %2343 = vst.msk [vmem:[#allocation2 + $0x4c] sm:$0x1] %vm395_vm2, %v2272_v27  ;;  %2345 = vst.msk [vmem:[#allocation2 + $0x54] sm:$0x1] %vm395_vm2, %v2269_v25  ;;  %v684_v6 = vrot.slane %v5374_v57, %v5383_v31 }
 0x285   :  { %2346 = vst.msk [vmem:[#allocation2 + $0x58] sm:$0x1] %vm395_vm2, %v2271_v14  ;;  %v5427_v42 = vpop.permute.xlu0 %1071  ;;  %v224_v17 = vpop.permute.xlu1 %223  ;;  %v3517_v44 = vadd.f32 %v3513_v4, %v5321_v21  ;;  %v5449_v21 = vrot.slane %v5404_v1, %v5228_v30  ;;  %v213_v59 = vadd.f32 %v208_v19, %v5439_v49  ;;  %v692_v5 = vrot.slane %v628_v50, %v5383_v31 }
 0x286   :  { %v254_v45 = vadd.f32 %v5306_v16, %v238_v34  ;;  %v554_v47 = vadd.f32 %v5333_v36, %v238_v34  ;;  %2347 = vst.msk [vmem:[#allocation2 + $0x5c] sm:$0x1] %vm395_vm2, %v2273_v26  ;;  %v5492_v14 = vrot.slane %v5457_v62, %v5228_v30  ;;  %v700_v26 = vrot.slane %v5471_v48, %v5383_v31 }
 0x287   :  { %2503 = vrot.lane.b32.xlu0 %v5325_v22, %s4928_s15  ;;  %745 = vrot.lane.b32.xlu1 %v684_v6, %s4925_s3  ;;  %v3521_v16 = vadd.f32 %v3517_v44, %v5335_v37  ;;  %v229_v2 = vadd.f32 %v224_v17, %v213_v59  ;;  %v1688_v12 = vrot.slane %v5449_v21, %v5383_v31 }
 0x288   :  { %v270_v40 = vadd.f32 %v5319_v20, %v254_v45  ;;  %v5463_v57 = vadd.f32 %v5345_v41, %v554_v47 }
 0x289   :  { %v5466_v61 = vpop.permute.xlu0 %1557  ;;  %v240_v37 = vpop.permute.xlu1 %239  ;;  %v5480_v29 = vadd.f32 %v3521_v16, %v5265_v56 }
 0x28a   :  { %v330_v63 = vcombine.high %v270_v40, %v270_v40  ;;  %v337_v20 = vrot.slane %v270_v40, %v5228_v30  ;;  %v245_v55 = vadd.f32 %v240_v37, %v229_v2  ;;  %v5496_v56 = vrot.slane %v5463_v57, %v5228_v30 }
 0x28b   :  { %2217 = vrot.lane.b32.xlu0 %v5312_v18, %s4929_s16  ;;  %1257 = vrot.lane.b32.xlu1 %v1196_v58, %s4929_s16  ;;  %v5511_v47 = vrot.slane %v5480_v29, %v5228_v30  ;;  %v2628_v40 = vrot.slane %v5492_v14, %v5383_v31  ;;  %v5519_v58 = vrot.slane %v5486_v54, %v5228_v30 }
 0x28c   :  { %v344_v13 = vrot.slane %v330_v63, %v5228_v30  ;;  %v345_v15 = vcombine.high %v337_v20, %v337_v20  ;;  %v353_v19 = vrot.slane %v337_v20, %v5228_v30  ;;  %v5523_v59 = vrot.slane %v5496_v56, %v5228_v30 }
 0x28d   :  { %v5488_v32 = vpop.permute.xlu0 %2127  ;;  %v256_v25 = vpop.permute.xlu1 %255  ;;  %v1044_v20 = vadd.f32 %v5363_v52, %v5370_v53 }
 0x28e   :  { %v346_v27 = vcombine.high %v344_v13, %v344_v13  ;;  %v360_v4 = vrot.slane %v344_v13, %v5228_v30  ;;  %v367_v34 = vrot.slane %v345_v15, %v5228_v30  ;;  %v375_v39 = vcombine.high %v353_v19, %v353_v19  ;;  %404 = vst.msk [vmem:[#allocation2 + $0x20] sm:$0x1] %vm395_vm2, %v353_v19 }
 0x28f   :  { %749 = vrot.lane.b32.xlu1 %v692_v5, %s4925_s3  ;;  %1749 = vrot.lane.b32.xlu0 %v1688_v12, %s4926_s1  ;;  %v261_v45 = vadd.f32 %v256_v25, %v245_v55  ;;  %v598_v12 = vcombine.high %v5349_v28, %v5349_v28  ;;  %v3140_v19 = vrot.slane %v5519_v58, %v5383_v31 }
 0x290   :  { %v374_v17 = vrot.slane %v346_v27, %v5228_v30  ;;  %v376_v6 = vcombine.high %v360_v4, %v360_v4  ;;  %v377_v44 = vcombine.high %v367_v34, %v367_v34  ;;  %405 = vst.msk [vmem:[#allocation2 + $0x24] sm:$0x1] %vm395_vm2, %v367_v34  ;;  %406 = vst.msk [vmem:[#allocation2 + $0x28] sm:$0x1] %vm395_vm2, %v375_v39 }
 0x291   :  { %408 = vst.msk [vmem:[#allocation2 + $0x30] sm:$0x1] %vm395_vm2, %v360_v4  ;;  %v5513_v50 = vpop.permute.xlu0 %3495  ;;  %v272_v16 = vpop.permute.xlu1 %271  ;;  %v716_v53 = vrot.slane %v5523_v59, %v5383_v31  ;;  %v5546_v25 = vrot.slane %v5511_v47, %v5228_v30  ;;  %v1060_v28 = vadd.f32 %v5396_v23, %v1044_v20 }
 0x292   :  { %v378_v37 = vcombine.high %v374_v17, %v374_v17  ;;  %407 = vst.msk [vmem:[#allocation2 + $0x2c] sm:$0x1] %vm395_vm2, %v377_v44  ;;  %409 = vst.msk [vmem:[#allocation2 + $0x34] sm:$0x1] %vm395_vm2, %v374_v17  ;;  %v277_v63 = vadd.f32 %v272_v16, %v261_v45 }
 0x293   :  { %410 = vst.msk [vmem:[#allocation2 + $0x38] sm:$0x1] %vm395_vm2, %v376_v6  ;;  %753 = vrot.lane.b32.xlu1 %v700_v26, %s4925_s3  ;;  %2689 = vrot.lane.b32.xlu0 %v2628_v40, %s4925_s3  ;;  %v1110_v26 = vcombine.high %v5387_v60, %v5387_v60  ;;  %v1076_v16 = vadd.f32 %v5427_v42, %v1060_v28 }
 0x294   :  { %411 = vst.msk [vmem:[#allocation2 + $0x3c] sm:$0x1] %vm395_vm2, %v378_v37  ;;  %v414_v2 = vcombine.high %v277_v63, %v277_v63  ;;  %v421_v5 = vrot.slane %v277_v63, %v5228_v30  ;;  %v3632_v37 = vrot.slane %v5546_v25, %v5383_v31  ;;  %v5567_v63 = vrot.slane %v598_v12, %v5228_v30 }
 0x295   :  { %v5536_v13 = vpop.permute.xlu0 %2135  ;;  %v5538_v15 = vpop.permute.xlu1 %557 }
 0x296   :  { %v428_v27 = vrot.slane %v414_v2, %v5228_v30  ;;  %v429_v4 = vcombine.high %v421_v5, %v421_v5  ;;  %v437_v34 = vrot.slane %v421_v5, %v5228_v30  ;;  %v563_v39 = vadd.f32 %v5538_v15, %v245_v55 }
 0x297   :  { %3201 = vrot.lane.b32.xlu0 %v3140_v19, %s4929_s16  ;;  %761 = vrot.lane.b32.xlu1 %v716_v53, %s4925_s3  ;;  %v1095_v19 = vcombine.high %v5359_v46, %v5359_v46  ;;  %v688_v46 = vrot.slane %v5567_v63, %v5383_v31 }
 0x298   :  { %v430_v17 = vcombine.high %v428_v27, %v428_v27  ;;  %v444_v6 = vrot.slane %v428_v27, %v5228_v30  ;;  %v451_v44 = vrot.slane %v429_v4, %v5228_v30  ;;  %v459_v45 = vcombine.high %v437_v34, %v437_v34  ;;  %529 = vst.msk [vmem:[#allocation2 + $0x80] sm:$0x1] %vm395_vm2, %v437_v34 }
 0x299   :  { %v5560_v40 = vpop.permute.xlu0 %2161  ;;  %v5562_v55 = vpop.permute.xlu1 %573  ;;  %v5587_v27 = vrot.slane %v1110_v26, %v5228_v30  ;;  %v1086_v4 = vadd.f32 %v1076_v16, %v5333_v36 }
 0x29a   :  { %v458_v60 = vrot.slane %v430_v17, %v5228_v30  ;;  %v460_v20 = vcombine.high %v444_v6, %v444_v6  ;;  %v461_v2 = vcombine.high %v451_v44, %v451_v44  ;;  %530 = vst.msk [vmem:[#allocation2 + $0x84] sm:$0x1] %vm395_vm2, %v451_v44  ;;  %531 = vst.msk [vmem:[#allocation2 + $0x88] sm:$0x1] %vm395_vm2, %v459_v45 }
 0x29b   :  { %533 = vst.msk [vmem:[#allocation2 + $0x90] sm:$0x1] %vm395_vm2, %v444_v6  ;;  %v5574_v5 = vadd.f32 %v5562_v55, %v563_v39  ;;  %3693 = vrot.lane.b32.xlu0 %v3632_v37, %s4926_s1  ;;  %v1587_v39 = vcombine.high %v5366_v51, %v5366_v51  ;;  %v1200_v26 = vrot.slane %v5587_v27, %v5383_v31 }
 0x29c   :  { %v462_v12 = vcombine.high %v458_v60, %v458_v60  ;;  %532 = vst.msk [vmem:[#allocation2 + $0x8c] sm:$0x1] %vm395_vm2, %v461_v2  ;;  %534 = vst.msk [vmem:[#allocation2 + $0x94] sm:$0x1] %vm395_vm2, %v458_v60  ;;  %v1140_v6 = vcombine.high %v5418_v33, %v5418_v33  ;;  %v5607_v44 = vrot.slane %v1095_v19, %v5228_v30 }
 0x29d   :  { %535 = vst.msk [vmem:[#allocation2 + $0x98] sm:$0x1] %vm395_vm2, %v460_v20  ;;  %v5584_v53 = vrot.slane %v5574_v5, %v5228_v30  ;;  %v5590_v34 = vpop.permute.xlu0 %2151  ;;  %v1046_v28 = vpop.permute.xlu1 %1045  ;;  %v5610_v45 = vadd.f32 %v1086_v4, %v5345_v41  ;;  %v1632_v60 = vcombine.high %v5449_v21, %v5449_v21  ;;  %v5619_v20 = vrot.slane %v1587_v39, %v5228_v30 }
 0x29e   :  { %536 = vst.msk [vmem:[#allocation2 + $0x9c] sm:$0x1] %vm395_vm2, %v462_v12  ;;  %v5625_v33 = vrot.slane %v5607_v44, %v5228_v30  ;;  %v1204_v21 = vrot.slane %v1140_v6, %v5383_v31  ;;  %v1051_v39 = vadd.f32 %v1046_v28, %v5439_v49  ;;  %v1563_v6 = vadd.f32 %v5466_v61, %v5150_v7 }
 0x29f   :  { %747 = vrot.lane.b32.xlu0 %v688_v46, %s4925_s3  ;;  %v5600_v17 = vrot.slane %v5584_v53, %v5228_v30  ;;  %7158 = vst [vmem:[#allocation18_spill] sm:$0xff] %v5610_v45  ;;  %7159 = vst [vmem:[#allocation19_spill] sm:$0xff] %v5619_v20  ;;  %v5629_v2 = vrot.slane %v5610_v45, %v5228_v30  ;;  %v1696_v4 = vrot.slane %v1632_v60, %v5383_v31 }
 0x2a0   :  { %7160 = vst [vmem:[#allocation20_spill] sm:$0xff] %v5625_v33  ;;  %v5637_v46 = vrot.slane %v5619_v20, %v5228_v30  ;;  %v1567_v20 = vadd.f32 %v1563_v6, %v1046_v28 }
 0x2a1   :  { %v5612_v51 = vpop.permute.xlu0 %2177  ;;  %v1062_v16 = vpop.permute.xlu1 %1061  ;;  %v912_v37 = vrot.slane %v5600_v17, %v5383_v31 }
 0x2a2   :  { %7161 = vst [vmem:[#allocation21_spill] sm:$0xff] %v5637_v46  ;;  %v1067_v60 = vadd.f32 %v1062_v16, %v1051_v39  ;;  %v1704_v49 = vrot.slane %v5637_v46, %v5383_v31 }
 0x2a3   :  { %973 = vrot.lane.b32.xlu1 %v912_v37, %s4925_s3  ;;  %1259 = vrot.lane.b32.xlu0 %v1200_v26, %s4929_s16  ;;  %v1212_v26 = vrot.slane %v5625_v33, %v5383_v31  ;;  %v1602_v37 = vcombine.high %v5404_v1, %v5404_v1  ;;  %v1571_v1 = vadd.f32 %v1567_v20, %v1062_v16 }
 0x2a5   :  { %v5631_v19 = vpop.permute.xlu0 %2167  ;;  %v1078_v12 = vpop.permute.xlu1 %1077  ;;  %v5660_v7 = vrot.slane %v1602_v37, %v5228_v30 }
 0x2a6   :  { %v1083_v33 = vadd.f32 %v1078_v12, %v1067_v60  ;;  %v1575_v28 = vadd.f32 %v1571_v1, %v1078_v12  ;;  %v3039_v1 = vcombine.high %v5460_v24, %v5460_v24 }
 0x2a7   :  { %1261 = vrot.lane.b32.xlu1 %v1204_v21, %s4929_s16  ;;  %1753 = vrot.lane.b32.xlu0 %v1696_v4, %s4926_s1  ;;  %v5654_v21 = vrot.slane %v5629_v2, %v5228_v30  ;;  %v1692_v37 = vrot.slane %v5660_v7, %v5383_v31 }
 0x2a9   :  { %v5648_v22 = vpop.permute.xlu0 %2493  ;;  %v1552_v3 = vpop.permute.xlu1 %1551  ;;  %v1228_v45 = vrot.slane %v5654_v21, %v5383_v31 }
 0x2aa   :  { %v1556_v4 = vadd.f32 %v5124_v0, %v1552_v3  ;;  %v2542_v0 = vcombine.high %v5457_v62, %v5457_v62  ;;  %v1087_v3 = vadd.f32 %v1083_v33, %v5538_v15  ;;  %v3054_v62 = vcombine.high %v5486_v54, %v5486_v54 }
 0x2ab   :  { %1265 = vrot.lane.b32.xlu1 %v1212_v26, %s4929_s16  ;;  %1757 = vrot.lane.b32.xlu0 %v1704_v49, %s4926_s1 }
 0x2ac   :  { %v1566_v61 = vadd.f32 %v1556_v4, %v5363_v52  ;;  %v5680_v6 = vrot.slane %v2542_v0, %v5228_v30  ;;  %v5685_v33 = vadd.f32 %v1087_v3, %v5562_v55  ;;  %v5702_v4 = vrot.slane %v3054_v62, %v5228_v30 }
 0x2ad   :  { %v5663_v39 = vpop.permute.xlu0 %3021  ;;  %v2146_v46 = vpop.permute.xlu1 %2145 }
 0x2ae   :  { %v1570_v26 = vadd.f32 %v1566_v61, %v5396_v23  ;;  %7162 = vst [vmem:[#allocation22_spill] sm:$0xff] %v5680_v6  ;;  %v1579_v23 = vadd.f32 %v1575_v28, %v5538_v15  ;;  %v2632_v54 = vrot.slane %v5680_v6, %v5383_v31  ;;  %7163 = vst [vmem:[#allocation23_spill] sm:$0xff] %v5702_v4 }
 0x2af   :  { %1273 = vrot.lane.b32.xlu1 %v1228_v45, %s4929_s16  ;;  %v2527_v45 = vcombine.high %v5421_v38, %v5421_v38  ;;  %v5708_v15 = vrot.slane %v5685_v33, %v5228_v30  ;;  %v3500_v6 = vadd.f32 %v5162_v9, %v5513_v50 }
 0x2b0   :  { %v1574_v16 = vadd.f32 %v1570_v26, %v5427_v42 }
 0x2b1   :  { %v5673_v20 = vpop.permute.xlu0 %2517  ;;  %v5675_v52 = vpop.permute.xlu1 %2983  ;;  %v5732_v28 = vrot.slane %v2527_v45, %v5228_v30 }
 0x2b2   :  { %v1578_v42 = vadd.f32 %v1574_v16, %v5333_v36  ;;  %v3546_v36 = vcombine.high %v5511_v47, %v5511_v47  ;;  %v3144_v47 = vrot.slane %v5702_v4, %v5383_v31  ;;  %v5743_v16 = vrot.slane %v5708_v15, %v5228_v30 }
 0x2b3   :  { %1751 = vrot.lane.b32.xlu1 %v1692_v37, %s4926_s1  ;;  %7165 = vst [vmem:[#allocation25_spill] sm:$0xff] %v5732_v28  ;;  %v3531_v37 = vcombine.high %v5480_v29, %v5480_v29  ;;  %v5752_v45 = vrot.slane %v5732_v28, %v5228_v30 }
 0x2b4   :  { %v5693_v12 = vadd.f32 %v1578_v42, %v5345_v41  ;;  %v5711_v41 = vadd.f32 %v1579_v23, %v5562_v55  ;;  %v5729_v55 = vrot.slane %v3546_v36, %v5228_v30  ;;  %v2132_v36 = vadd.f32 %v5156_v8, %v5488_v32 }
 0x2b5   :  { %v5695_v60 = vpop.permute.xlu0 %2209  ;;  %v5697_v49 = vpop.permute.xlu1 %3501  ;;  %7166 = vst [vmem:[#allocation26_spill] sm:$0xff] %v5752_v45  ;;  %v1424_v29 = vrot.slane %v5743_v16, %v5383_v31  ;;  %v5774_v32 = vrot.slane %v3531_v37, %v5228_v30 }
 0x2b6   :  { %v5716_v38 = vrot.slane %v5693_v12, %v5228_v30  ;;  %7164 = vst [vmem:[#allocation24_spill] sm:$0xff] %v5729_v55  ;;  %v5736_v26 = vrot.slane %v5711_v41, %v5228_v30  ;;  %v3636_v42 = vrot.slane %v5729_v55, %v5383_v31  ;;  %v2988_v28 = vadd.f32 %v5675_v52, %v2132_v36 }
 0x2b7   :  { %2691 = vrot.lane.b32.xlu1 %v2632_v54, %s4925_s3  ;;  %v5755_v54 = vrot.slane %v3039_v1, %v5228_v30  ;;  %v2644_v1 = vrot.slane %v5752_v45, %v5383_v31  ;;  %7170 = vst [vmem:[#allocation30_spill] sm:$0xff] %v5774_v32 }
 0x2b8   :  { %v5726_v3 = vrot.slane %v5716_v38, %v5228_v30 }
 0x2b9   :  { %v5720_v61 = vpop.permute.xlu0 %2215  ;;  %v3000_v0 = vpop.permute.xlu1 %2999  ;;  %7167 = vst [vmem:[#allocation27_spill] sm:$0xff] %v5755_v54  ;;  %v5771_v8 = vrot.slane %v5755_v54, %v5228_v30 }
 0x2ba   :  { %v1720_v24 = vrot.slane %v5726_v3, %v5383_v31 }
 0x2bb   :  { %3203 = vrot.lane.b32.xlu1 %v3144_v47, %s4929_s16  ;;  %v5764_v47 = vrot.slane %v5736_v26, %v5228_v30  ;;  %7169 = vst [vmem:[#allocation29_spill] sm:$0xff] %v5771_v8  ;;  %v3156_v37 = vrot.slane %v5771_v8, %v5383_v31 }
 0x2bc   :  { %1765 = vrot.lane.b32.xlu0 %v1720_v24, %s4926_s1  ;;  %v2150_v24 = vadd.f32 %v2146_v46, %v2132_v36  ;;  %v2572_v46 = vcombine.high %v5492_v14, %v5492_v14  ;;  %v3510_v36 = vadd.f32 %v3500_v6, %v5675_v52 }
 0x2bd   :  { %v194_v62 = vpop.permute.xlu0 %193  ;;  %v2990_v23 = vpop.permute.xlu1 %2989  ;;  %7168 = vst [vmem:[#allocation28_spill] sm:$0xff] %v5764_v47 }
 0x2be   :  { %v2636_v14 = vrot.slane %v2572_v46, %v5383_v31  ;;  %v3576_v46 = vcombine.high %v5546_v25, %v5546_v25 }
 0x2bf   :  { %3695 = vrot.lane.b32.xlu1 %v3636_v42, %s4926_s1  ;;  %v1916_v42 = vrot.slane %v5764_v47, %v5383_v31  ;;  %v3004_v47 = vadd.f32 %v3000_v0, %v2988_v28  ;;  %v3514_v28 = vadd.f32 %v3510_v36, %v3000_v0  ;;  %v3507_v0 = vadd.f32 %v5697_v49, %v5198_v11 }
 0x2c0   :  { %1485 = vrot.lane.b32.xlu0 %v1424_v29, %s4929_s16  ;;  %v2166_v29 = vadd.f32 %v5560_v40, %v2150_v24  ;;  %v3084_v40 = vcombine.high %v5519_v58, %v5519_v58  ;;  %v2141_v58 = vadd.f32 %v5536_v13, %v5170_v10 }
 0x2c1   :  { %v210_v55 = vpop.permute.xlu0 %209  ;;  %v3016_v4 = vpop.permute.xlu1 %3015 }
 0x2c2   :  { %v2182_v24 = vadd.f32 %v5612_v51, %v2166_v29  ;;  %v3020_v8 = vadd.f32 %v3016_v4, %v3004_v47  ;;  %v3518_v52 = vadd.f32 %v3514_v28, %v3016_v4  ;;  %v3640_v29 = vrot.slane %v3576_v46, %v5383_v31 }
 0x2c3   :  { %2697 = vrot.lane.b32.xlu1 %v2644_v1, %s4925_s3  ;;  %v5788_v1 = vrot.slane %v5774_v32, %v5228_v30 }
 0x2c4   :  { %1977 = vrot.lane.b32.xlu0 %v1916_v42, %s4926_s1  ;;  %v5799_v42 = vadd.f32 %v194_v62, %v5234_v35  ;;  %v3148_v35 = vrot.slane %v3084_v40, %v5383_v31  ;;  %v2498_v6 = vadd.f32 %v5648_v22, %v2182_v24  ;;  %v2157_v62 = vadd.f32 %v5590_v34, %v2141_v58 }
 0x2c5   :  { %v226_v45 = vpop.permute.xlu0 %225  ;;  %v3006_v54 = vpop.permute.xlu1 %3005  ;;  %v3648_v50 = vrot.slane %v5788_v1, %v5383_v31  ;;  %v3030_v47 = vadd.f32 %v3020_v8, %v5648_v22  ;;  %v3522_v11 = vadd.f32 %v3518_v52, %v5648_v22 }
 0x2c6   :  { %v214_v51 = vadd.f32 %v210_v55, %v5799_v42  ;;  %v2995_v55 = vadd.f32 %v2990_v23, %v2141_v58  ;;  %v2173_v4 = vadd.f32 %v5631_v19, %v2157_v62 }
 0x2c7   :  { %3209 = vrot.lane.b32.xlu1 %v3156_v37, %s4929_s16 }
 0x2c8   :  { %2693 = vrot.lane.b32.xlu0 %v2636_v14, %s4925_s3  ;;  %v230_v25 = vadd.f32 %v226_v45, %v214_v51  ;;  %v3511_v14 = vadd.f32 %v3507_v0, %v2990_v23  ;;  %v3011_v49 = vadd.f32 %v3006_v54, %v2995_v55 }
 0x2c9   :  { %v242_v32 = vpop.permute.xlu0 %241  ;;  %v2184_v9 = vpop.permute.xlu1 %2183 }
 0x2ca   :  { %v5821_v40 = vadd.f32 %v242_v32, %v230_v25  ;;  %v3515_v45 = vadd.f32 %v3511_v14, %v3006_v54  ;;  %v2189_v8 = vadd.f32 %v2184_v9, %v2173_v4  ;;  %v3027_v54 = vadd.f32 %v5663_v39, %v3011_v49 }
 0x2cb   :  { %3701 = vrot.lane.b32.xlu1 %v3648_v50, %s4926_s1 }
 0x2cc   :  { %3205 = vrot.lane.b32.xlu0 %v3148_v35, %s4929_s16  ;;  %v3519_v58 = vadd.f32 %v3515_v45, %v5663_v39 }
 0x2cd   :  { %v258_v10 = vpop.permute.xlu0 %257  ;;  %v2512_v13 = vpop.permute.xlu1 %2511 }
 0x2ce   :  { %v5818_v37 = vadd.f32 %v2512_v13, %v2498_v6  ;;  %v5823_v34 = vadd.f32 %v3030_v47, %v2512_v13  ;;  %v262_v36 = vadd.f32 %v258_v10, %v5821_v40  ;;  %v5832_v19 = vadd.f32 %v3522_v11, %v2512_v13 }
 0x2d0   :  { %3697 = vrot.lane.b32.xlu0 %v3640_v29, %s4926_s1  ;;  %v5830_v46 = vrot.slane %v5818_v37, %v5228_v30  ;;  %7171 = vst [vmem:[#allocation31_spill] sm:$0xff] %v5832_v19  ;;  %v5836_v23 = vrot.slane %v5823_v34, %v5228_v30  ;;  %v5852_v0 = vrot.slane %v5832_v19, %v5228_v30 }
 0x2d1   :  { %v274_v50 = vpop.permute.xlu0 %273  ;;  %v2502_v28 = vpop.permute.xlu1 %2501 }
 0x2d2   :  { %v278_v22 = vadd.f32 %v274_v50, %v262_v36  ;;  %v2507_v32 = vadd.f32 %v2502_v28, %v2189_v8  ;;  %v5841_v9 = vrot.slane %v5830_v46, %v5228_v30  ;;  %v3031_v47 = vadd.f32 %v3027_v54, %v2502_v28 }
 0x2d3   :  { %v5860_v29 = vrot.slane %v5836_v23, %v5228_v30  ;;  %v3523_v14 = vadd.f32 %v3519_v58, %v2502_v28  ;;  %v5878_v28 = vrot.slane %v5852_v0, %v5228_v30 }
 0x2d4   :  { %v463_v51 = vcombine.high %v278_v22, %v278_v22  ;;  %v470_v35 = vrot.slane %v278_v22, %v5228_v30  ;;  %v5846_v52 = vadd.f32 %v5673_v20, %v2507_v32  ;;  %v2660_v10 = vrot.slane %v5841_v9, %v5383_v31 }
 0x2d5   :  { %v5848_v6 = vpop.permute.xlu0 %559  ;;  %v2194_v62 = vpop.permute.xlu1 %2193  ;;  %v5873_v22 = vadd.f32 %v3031_v47, %v5673_v20 }
 0x2d6   :  { %7172 = vst [vmem:[#allocation32_spill] sm:$0xff] %v5846_v52  ;;  %v2198_v25 = vadd.f32 %v2194_v62, %v2182_v24  ;;  %v477_v39 = vrot.slane %v463_v51, %v5228_v30  ;;  %v478_v13 = vcombine.high %v470_v35, %v470_v35  ;;  %v486_v55 = vrot.slane %v470_v35, %v5228_v30 }
 0x2d7   :  { %v5864_v4 = vrot.slane %v5846_v52, %v5228_v30  ;;  %2705 = vrot.lane.b32.xlu0 %v2660_v10, %s4925_s3  ;;  %7173 = vst [vmem:[#allocation33_spill] sm:$0xff] %v5873_v22  ;;  %v3172_v62 = vrot.slane %v5860_v29, %v5383_v31 }
 0x2d8   :  { %v479_v24 = vcombine.high %v477_v39, %v477_v39  ;;  %v493_v11 = vrot.slane %v477_v39, %v5228_v30  ;;  %v500_v49 = vrot.slane %v478_v13, %v5228_v30  ;;  %v508_v45 = vcombine.high %v486_v55, %v486_v55  ;;  %537 = vst.msk [vmem:[#allocation2 + $0xa0] sm:$0x1] %vm395_vm2, %v486_v55 }
 0x2d9   :  { %v5870_v36 = vpop.permute.xlu0 %575  ;;  %v2200_v50 = vpop.permute.xlu1 %2199  ;;  %v2214_v32 = vadd.f32 %v5695_v60, %v2198_v25  ;;  %v599_v25 = vcombine.high %v5432_v43, %v5432_v43  ;;  %v5895_v39 = vadd.f32 %v3523_v14, %v5673_v20 }
 0x2da   :  { %v2205_v54 = vadd.f32 %v2200_v50, %v2189_v8  ;;  %v507_v58 = vrot.slane %v479_v24, %v5228_v30  ;;  %v509_v51 = vcombine.high %v493_v11, %v493_v11  ;;  %v510_v35 = vcombine.high %v500_v49, %v500_v49  ;;  %538 = vst.msk [vmem:[#allocation2 + $0xa4] sm:$0x1] %vm395_vm2, %v500_v49 }
 0x2db   :  { %539 = vst.msk [vmem:[#allocation2 + $0xa8] sm:$0x1] %vm395_vm2, %v508_v45  ;;  %541 = vst.msk [vmem:[#allocation2 + $0xb0] sm:$0x1] %vm395_vm2, %v493_v11  ;;  %v2274_v47 = vcombine.high %v2214_v32, %v2214_v32  ;;  %v2281_v60 = vrot.slane %v2214_v32, %v5228_v30  ;;  %v630_v8 = vcombine.high %v5567_v63, %v5567_v63  ;;  %3217 = vrot.lane.b32.xlu0 %v3172_v62, %s4929_s16 }
 0x2dc   :  { %v511_v10 = vcombine.high %v507_v58, %v507_v58  ;;  %540 = vst.msk [vmem:[#allocation2 + $0xac] sm:$0x1] %vm395_vm2, %v510_v35  ;;  %542 = vst.msk [vmem:[#allocation2 + $0xb4] sm:$0x1] %vm395_vm2, %v507_v58  ;;  %v2221_v13 = vadd.f32 %v5720_v61, %v2205_v54  ;;  %v5901_v63 = vrot.slane %v5864_v4, %v5228_v30 }
 0x2dd   :  { %543 = vst.msk [vmem:[#allocation2 + $0xb8] sm:$0x1] %vm395_vm2, %v509_v51  ;;  %7174 = vst [vmem:[#allocation34_spill] sm:$0xff] %v5895_v39  ;;  %v5903_v55 = vpop.permute.xlu0 %1047  ;;  %v5905_v43 = vpop.permute.xlu1 %1559  ;;  %v5909_v24 = vrot.slane %v5873_v22, %v5228_v30  ;;  %v2288_v11 = vrot.slane %v2274_v47, %v5228_v30  ;;  %v2289_v20 = vcombine.high %v2281_v60, %v2281_v60 }
 0x2de   :  { %v2297_v14 = vrot.slane %v2281_v60, %v5228_v30  ;;  %544 = vst.msk [vmem:[#allocation2 + $0xbc] sm:$0x1] %vm395_vm2, %v511_v10  ;;  %v2358_v61 = vcombine.high %v2221_v13, %v2221_v13  ;;  %v2365_v49 = vrot.slane %v2221_v13, %v5228_v30  ;;  %v2856_v45 = vrot.slane %v5901_v63, %v5383_v31 }
 0x2df   :  { %v3664_v50 = vrot.slane %v5878_v28, %v5383_v31  ;;  %v2290_v32 = vcombine.high %v2288_v11, %v2288_v11  ;;  %v2304_v54 = vrot.slane %v2288_v11, %v5228_v30  ;;  %v2311_v58 = vrot.slane %v2289_v20, %v5228_v30 }
 0x2e0   :  { %v2319_v51 = vcombine.high %v2297_v14, %v2297_v14  ;;  %2348 = vst.msk [vmem:[#allocation2 + $0x60] sm:$0x1] %vm395_vm2, %v2297_v14  ;;  %v2372_v35 = vrot.slane %v2358_v61, %v5228_v30  ;;  %v2373_v62 = vcombine.high %v2365_v49, %v2365_v49  ;;  %v2381_v47 = vrot.slane %v2365_v49, %v5228_v30 }
 0x2e1   :  { %2917 = vrot.lane.b32.xlu1 %v2856_v45, %s4925_s3  ;;  %v5925_v60 = vpop.permute.xlu0 %1063  ;;  %v5927_v10 = vpop.permute.xlu1 %2153  ;;  %v5930_v13 = vrot.slane %v599_v25, %v5228_v30  ;;  %v5934_v11 = vrot.slane %v5895_v39, %v5228_v30  ;;  %v2318_v20 = vrot.slane %v2290_v32, %v5228_v30  ;;  %v2320_v14 = vcombine.high %v2304_v54, %v2304_v54 }
 0x2e2   :  { %v2321_v61 = vcombine.high %v2311_v58, %v2311_v58  ;;  %2349 = vst.msk [vmem:[#allocation2 + $0x64] sm:$0x1] %vm395_vm2, %v2311_v58  ;;  %2350 = vst.msk [vmem:[#allocation2 + $0x68] sm:$0x1] %vm395_vm2, %v2319_v51  ;;  %3709 = vrot.lane.b32.xlu0 %v3664_v50, %s4926_s1  ;;  %v2374_v49 = vcombine.high %v2372_v35, %v2372_v35  ;;  %v2388_v25 = vrot.slane %v2372_v35, %v5228_v30 }
 0x2e3   :  { %2352 = vst.msk [vmem:[#allocation2 + $0x70] sm:$0x1] %vm395_vm2, %v2304_v54  ;;  %v2395_v45 = vrot.slane %v2373_v62, %v5228_v30  ;;  %v2403_v22 = vcombine.high %v2381_v47, %v2381_v47  ;;  %2473 = vst.msk [vmem:[#allocation2 + $0xc0] sm:$0x1] %vm395_vm2, %v2381_v47  ;;  %v2322_v39 = vcombine.high %v2318_v20, %v2318_v20 }
 0x2e4   :  { %2351 = vst.msk [vmem:[#allocation2 + $0x6c] sm:$0x1] %vm395_vm2, %v2321_v61  ;;  %2353 = vst.msk [vmem:[#allocation2 + $0x74] sm:$0x1] %vm395_vm2, %v2318_v20  ;;  %v5949_v32 = vrot.slane %v5909_v24, %v5228_v30  ;;  %v696_v50 = vrot.slane %v630_v8, %v5383_v31  ;;  %v647_v54 = vcombine.high %v5496_v56, %v5496_v56 }
 0x2e5   :  { %2354 = vst.msk [vmem:[#allocation2 + $0x78] sm:$0x1] %vm395_vm2, %v2320_v14  ;;  %v2402_v58 = vrot.slane %v2374_v49, %v5228_v30  ;;  %v2404_v51 = vcombine.high %v2388_v25, %v2388_v25  ;;  %v2405_v35 = vcombine.high %v2395_v45, %v2395_v45  ;;  %2474 = vst.msk [vmem:[#allocation2 + $0xc4] sm:$0x1] %vm395_vm2, %v2395_v45  ;;  %v5958_v62 = vpop.permute.xlu0 %1079  ;;  %v5960_v47 = vpop.permute.xlu1 %2991 }
 0x2e6   :  { %7175 = vst [vmem:[#allocation35_spill] sm:$0xff] %v5949_v32  ;;  %2475 = vst.msk [vmem:[#allocation2 + $0xc8] sm:$0x1] %vm395_vm2, %v2403_v22  ;;  %v3368_v8 = vrot.slane %v5949_v32, %v5383_v31  ;;  %751 = vrot.lane.b32.xlu0 %v696_v50, %s4925_s3  ;;  %v5968_v56 = vrot.slane %v5934_v11, %v5228_v30  ;;  %v826_v22 = vcombine.high %v5584_v53, %v5584_v53 }
 0x2e7   :  { %2477 = vst.msk [vmem:[#allocation2 + $0xd0] sm:$0x1] %vm395_vm2, %v2388_v25  ;;  %7176 = vst [vmem:[#allocation36_spill] sm:$0xff] %v5960_v47  ;;  %v2406_v20 = vcombine.high %v2402_v58, %v2402_v58  ;;  %v5979_v14 = vrot.slane %v647_v54, %v5228_v30  ;;  %v629_v53 = vcombine.high %v5471_v48, %v5471_v48  ;;  %v7187_v47 = vld [vmem:[#allocation21_spill] sm:$0xff] }
 0x2e8   :  { %2355 = vst.msk [vmem:[#allocation2 + $0x7c] sm:$0x1] %vm395_vm2, %v2322_v39  ;;  %7177 = vst [vmem:[#allocation37_spill] sm:$0xff] %v5968_v56  ;;  %3429 = vrot.lane.b32.xlu1 %v3368_v8, %s4929_s16  ;;  %v704_v39 = vrot.slane %v5930_v13, %v5383_v31  ;;  %v3860_v25 = vrot.slane %v5968_v56, %v5383_v31  ;;  %v632_v45 = vcombine.high %v5463_v57, %v5463_v57 }
 0x2e9   :  { %2476 = vst.msk [vmem:[#allocation2 + $0xcc] sm:$0x1] %vm395_vm2, %v2405_v35  ;;  %2478 = vst.msk [vmem:[#allocation2 + $0xd4] sm:$0x1] %vm395_vm2, %v2402_v58  ;;  %v2138_v61 = vpop.permute.xlu0 %2137  ;;  %v5982_v49 = vpop.permute.xlu1 %3007  ;;  %v720_v50 = vrot.slane %v5979_v14, %v5383_v31  ;;  %v5995_v54 = vrot.slane %v826_v22, %v5228_v30  ;;  %v708_v35 = vrot.slane %v629_v53, %v5383_v31 }
 0x2ea   :  { %2479 = vst.msk [vmem:[#allocation2 + $0xd8] sm:$0x1] %vm395_vm2, %v2404_v51  ;;  %2480 = vst.msk [vmem:[#allocation2 + $0xdc] sm:$0x1] %vm395_vm2, %v2406_v20  ;;  %755 = vrot.lane.b32.xlu0 %v704_v39, %s4925_s3  ;;  %v677_v48 = vcombine.high %v5523_v59, %v5523_v59  ;;  %v6006_v57 = vrot.slane %v632_v45, %v5228_v30  ;;  %v1142_v20 = vcombine.high %v5587_v27, %v5587_v27 }
 0x2eb   :  { %7178 = vst [vmem:[#allocation38_spill] sm:$0xff] %v5982_v49  ;;  %v916_v8 = vrot.slane %v5995_v54, %v5383_v31  ;;  %v1111_v22 = vcombine.high %v5607_v44, %v5607_v44  ;;  %v6016_v39 = vadd.f32 %v2138_v61, %v5312_v18  ;;  %v811_v59 = vcombine.high %v5574_v5, %v5574_v5 }
 0x2ec   :  { %3921 = vrot.lane.b32.xlu1 %v3860_v25, %s4926_s1  ;;  %v724_v45 = vrot.slane %v677_v48, %v5383_v31  ;;  %v564_v27 = vadd.f32 %v5848_v6, %v5821_v40  ;;  %v1208_v18 = vrot.slane %v1142_v20, %v5383_v31  ;;  %v1159_v5 = vcombine.high %v5629_v2, %v5629_v2 }
 0x2ed   :  { %v5997_v58 = vpop.permute.xlu0 %3503  ;;  %v5999_v51 = vpop.permute.xlu1 %3023  ;;  %7181 = vst [vmem:[#allocation41_spill] sm:$0xff] %v6016_v39  ;;  %v6033_v44 = vrot.slane %v1111_v22, %v5228_v30  ;;  %v2158_v61 = vadd.f32 %v5927_v10, %v6016_v39  ;;  %v856_v22 = vcombine.high %v5600_v17, %v5600_v17  ;;  %v4049_v39 = vld [vmem:[#allocation9] sm:$0xff]  ;;  %v1634_v56 = vcombine.high %v5660_v7, %v5660_v7 }
 0x2ee   :  { %7179 = vst [vmem:[#allocation39_spill] sm:$0xff] %v5997_v58  ;;  %7180 = vst [vmem:[#allocation40_spill] sm:$0xff] %v5999_v51  ;;  %763 = vrot.lane.b32.xlu0 %v720_v50, %s4925_s3  ;;  %v6026_v50 = vrot.slane %v6006_v57, %v5228_v30  ;;  %v6043_v40 = vadd.f32 %v5870_v36, %v564_v27  ;;  %v6056_v27 = vrot.slane %v1159_v5, %v5228_v30  ;;  %v4050_v58 = vld [vmem:[#allocation9 + $0x8] sm:$0xff] }
 0x2f0   :  { %757 = vrot.lane.b32.xlu1 %v708_v35, %s4925_s3  ;;  %v732_v20 = vrot.slane %v6026_v50, %v5383_v31  ;;  %v6064_v17 = vrot.slane %v6043_v40, %v5228_v30  ;;  %v1232_v5 = vrot.slane %v6056_v27, %v5383_v31 }
 0x2f1   :  { %v2170_v25 = vpop.permute.xlu0 %2169  ;;  %v6018_v53 = vpop.permute.xlu1 %2519 }
 0x2f2   :  { %7182 = vst [vmem:[#allocation42_spill] sm:$0xff] %v6018_v53  ;;  %975 = vrot.lane.b32.xlu0 %v916_v8, %s4925_s3  ;;  %v6040_v8 = vrot.slane %v811_v59, %v5228_v30  ;;  %v2174_v2 = vadd.f32 %v2170_v25, %v2158_v61  ;;  %v1216_v59 = vrot.slane %v6033_v44, %v5383_v31 }
 0x2f3   :  { %v920_v25 = vrot.slane %v856_v22, %v5383_v31 }
 0x2f4   :  { %765 = vrot.lane.b32.xlu1 %v724_v45, %s4925_s3  ;;  %v7183_v45 = vld [vmem:[#allocation18_spill] sm:$0xff]  ;;  %v6070_v61 = vrot.slane %v6040_v8, %v5228_v30 }
 0x2f5   :  { %v2186_v35 = vpop.permute.xlu0 %2185  ;;  %v2202_v48 = vpop.permute.xlu1 %2201  ;;  %v1144_v10 = vcombine.high %v7183_v45, %v7183_v45 }
 0x2f6   :  { %1263 = vrot.lane.b32.xlu0 %v1208_v18, %s4929_s16  ;;  %v6058_v53 = vadd.f32 %v2186_v35, %v2174_v2  ;;  %v1189_v35 = vcombine.high %v5654_v21, %v5654_v21 }
 0x2f8   :  { %769 = vrot.lane.b32.xlu1 %v732_v20, %s4925_s3  ;;  %7184 = vst [vmem:[#allocation18_spill] sm:$0xff] %v6058_v53  ;;  %v6079_v20 = vrot.slane %v1144_v10, %v5228_v30  ;;  %v2206_v22 = vadd.f32 %v2202_v48, %v6058_v53  ;;  %v1236_v21 = vrot.slane %v1189_v35, %v5383_v31 }
 0x2f9   :  { %v6060_v51 = vpop.permute.xlu0 %2503  ;;  %v746_v18 = vpop.permute.xlu1 %745 }
 0x2fa   :  { %7185 = vst [vmem:[#allocation43_spill] sm:$0xff] %v6060_v51  ;;  %1267 = vrot.lane.b32.xlu0 %v1216_v59, %s4929_s16  ;;  %793 = vst.msk [vmem:[#allocation2 + $0x1] sm:$0x1] %vm395_vm2, %v746_v18  ;;  %v928_v59 = vrot.slane %v6070_v61, %v5383_v31  ;;  %v6087_v18 = vrot.slane %v6064_v17, %v5228_v30  ;;  %v6094_v48 = vrot.slane %v6079_v20, %v5228_v30 }
 0x2fc   :  { %977 = vrot.lane.b32.xlu1 %v920_v25, %s4925_s3  ;;  %v944_v49 = vrot.slane %v6087_v18, %v5383_v31 }
 0x2fd   :  { %v2218_v2 = vpop.permute.xlu0 %2217  ;;  %v1258_v45 = vpop.permute.xlu1 %1257 }
 0x2fe   :  { %1275 = vrot.lane.b32.xlu0 %v1232_v5, %s4929_s16  ;;  %1305 = vst.msk [vmem:[#allocation2 + $0x2] sm:$0x1] %vm395_vm2, %v1258_v45  ;;  %v2222_v25 = vadd.f32 %v2218_v2, %v2206_v22  ;;  %v7186_v45 = vld [vmem:[#allocation20_spill] sm:$0xff] }
 0x2ff   :  { %v1141_v22 = vcombine.high %v7186_v45, %v7186_v45 }
 0x300   :  { %981 = vrot.lane.b32.xlu1 %v928_v59, %s4925_s3  ;;  %v2407_v10 = vcombine.high %v2222_v25, %v2222_v25  ;;  %v2414_v51 = vrot.slane %v2222_v25, %v5228_v30  ;;  %v1244_v25 = vrot.slane %v6094_v48, %v5383_v31 }
 0x301   :  { %v1750_v53 = vpop.permute.xlu0 %1749  ;;  %v750_v5 = vpop.permute.xlu1 %749 }
 0x302   :  { %1277 = vrot.lane.b32.xlu0 %v1236_v21, %s4929_s16  ;;  %1797 = vst.msk [vmem:[#allocation2 + $0x3] sm:$0x1] %vm395_vm2, %v1750_v53  ;;  %795 = vst.msk [vmem:[#allocation2 + $0x9] sm:$0x1] %vm395_vm2, %v750_v5  ;;  %v2421_v35 = vrot.slane %v2407_v10, %v5228_v30  ;;  %v2422_v2 = vcombine.high %v2414_v51, %v2414_v51  ;;  %v2430_v59 = vrot.slane %v2414_v51, %v5228_v30 }
 0x303   :  { %v1633_v21 = vcombine.high %v7187_v47, %v7187_v47  ;;  %v7188_v47 = vld [vmem:[#allocation19_spill] sm:$0xff] }
 0x304   :  { %989 = vrot.lane.b32.xlu1 %v944_v49, %s4925_s3  ;;  %v2423_v45 = vcombine.high %v2421_v35, %v2421_v35  ;;  %v2437_v53 = vrot.slane %v2421_v35, %v5228_v30  ;;  %v2444_v5 = vrot.slane %v2422_v2, %v5228_v30  ;;  %v2452_v52 = vcombine.high %v2430_v59, %v2430_v59 }
 0x305   :  { %2481 = vst.msk [vmem:[#allocation2 + $0xe0] sm:$0x1] %vm395_vm2, %v2430_v59  ;;  %v2690_v10 = vpop.permute.xlu0 %2689  ;;  %v754_v51 = vpop.permute.xlu1 %753  ;;  %v1220_v49 = vrot.slane %v1141_v22, %v5383_v31  ;;  %v1603_v35 = vcombine.high %v7188_v47, %v7188_v47  ;;  %v4692_v2 = vpack.c.bf16 %v4050_v58, %v4049_v39  ;;  %v1712_v7 = vrot.slane %v1633_v21, %v5383_v31 }
 0x306   :  { %1281 = vrot.lane.b32.xlu0 %v1244_v25, %s4929_s16  ;;  %2737 = vst.msk [vmem:[#allocation2 + $0x41] sm:$0x1] %vm395_vm2, %v2690_v10  ;;  %797 = vst.msk [vmem:[#allocation2 + $0x11] sm:$0x1] %vm395_vm2, %v754_v51  ;;  %v2451_v32 = vrot.slane %v2423_v45, %v5228_v30  ;;  %v2453_v59 = vcombine.high %v2437_v53, %v2437_v53  ;;  %v2454_v19 = vcombine.high %v2444_v5, %v2444_v5  ;;  %v7189_v10 = vld [vmem:[#allocation16_spill] sm:$0xff] }
 0x307   :  { %2482 = vst.msk [vmem:[#allocation2 + $0xe4] sm:$0x1] %vm395_vm2, %v2444_v5  ;;  %2483 = vst.msk [vmem:[#allocation2 + $0xe8] sm:$0x1] %vm395_vm2, %v2452_v52  ;;  %v1681_v22 = vcombine.high %v5726_v3, %v5726_v3  ;;  %v1636_v58 = vcombine.high %v5693_v12, %v5693_v12  ;;  %4693 = vmatprep.subr.bf16.mxu0 %v4692_v2  ;;  %v1700_v45 = vrot.slane %v1634_v56, %v5383_v31 }
 0x308   :  { %2485 = vst.msk [vmem:[#allocation2 + $0xf0] sm:$0x1] %vm395_vm2, %v2437_v53  ;;  %1269 = vrot.lane.b32.xlu1 %v1220_v49, %s4929_s16  ;;  %v2455_v39 = vcombine.high %v2451_v32, %v2451_v32  ;;  %2484 = vst.msk [vmem:[#allocation2 + $0xec] sm:$0x1] %vm395_vm2, %v2454_v19  ;;  %4695 = vmatpush3.bf16.msra.mxu0 %v4692_v2  ;;  %v6138_v3 = vrot.slane %v1603_v35, %v5228_v30 }
 0x309   :  { %2486 = vst.msk [vmem:[#allocation2 + $0xf4] sm:$0x1] %vm395_vm2, %v2451_v32  ;;  %2487 = vst.msk [vmem:[#allocation2 + $0xf8] sm:$0x1] %vm395_vm2, %v2453_v59  ;;  %v3202_v52 = vpop.permute.xlu0 %3201  ;;  %v762_v25 = vpop.permute.xlu1 %761  ;;  %v1651_v12 = vcombine.high %v5716_v38, %v5716_v38  ;;  %4696 = vmatprep.subr.bf16.mxu1 %v4692_v2  ;;  %v1728_v19 = vrot.slane %v1681_v22, %v5383_v31  ;;  %v1368_v32 = vcombine.high %v5743_v16, %v5743_v16 }
 0x30a   :  { %1761 = vrot.lane.b32.xlu0 %v1712_v7, %s4926_s1  ;;  %3249 = vst.msk [vmem:[#allocation2 + $0x42] sm:$0x1] %vm395_vm2, %v3202_v52  ;;  %801 = vst.msk [vmem:[#allocation2 + $0x21] sm:$0x1] %vm395_vm2, %v762_v25  ;;  %v6150_v56 = vrot.slane %v1636_v58, %v5228_v30  ;;  %4697 = vmatpush3.bf16.msra.mxu1 %v4692_v2  ;;  %v1708_v53 = vrot.slane %v6138_v3, %v5383_v31 }
 0x30b   :  { %2488 = vst.msk [vmem:[#allocation2 + $0xfc] sm:$0x1] %vm395_vm2, %v2455_v39  ;;  %v6156_v38 = vrot.slane %v1651_v12, %v5228_v30  ;;  %v1338_v5 = vcombine.high %v5708_v15, %v5708_v15  ;;  %v1323_v16 = vcombine.high %v5685_v33, %v5685_v33  ;;  %v1564_v51 = vadd.f32 %v5905_v43, %v7189_v10  ;;  %v7190_v39 = vld [vmem:[#allocation28_spill] sm:$0xff] }
 0x30c   :  { %1755 = vrot.lane.b32.xlu1 %v1700_v45, %s4926_s1  ;;  %v1432_v49 = vrot.slane %v1368_v32, %v5383_v31  ;;  %v6169_v47 = vrot.slane %v6150_v56, %v5228_v30  ;;  %v1052_v2 = vadd.f32 %v5903_v55, %v5799_v42  ;;  %v1830_v43 = vcombine.high %v5736_v26, %v5736_v26 }
 0x30d   :  { %v3694_v21 = vpop.permute.xlu0 %3693  ;;  %v1724_v15 = vrot.slane %v6156_v38, %v5383_v31  ;;  %v6177_v33 = vrot.slane %v1338_v5, %v5228_v30  ;;  %v1815_v59 = vcombine.high %v5711_v41, %v5711_v41  ;;  %v6185_v7 = vrot.slane %v1323_v16, %v5228_v30 }
 0x30e   :  { %1769 = vrot.lane.b32.xlu0 %v1728_v19, %s4926_s1  ;;  %3741 = vst.msk [vmem:[#allocation2 + $0x43] sm:$0x1] %vm395_vm2, %v3694_v21  ;;  %v1568_v42 = vadd.f32 %v1564_v51, %v5903_v55  ;;  %v1068_v22 = vadd.f32 %v5925_v60, %v1052_v2  ;;  %v1736_v58 = vrot.slane %v6169_v47, %v5383_v31  ;;  %v7191_v51 = vld [vmem:[#allocation22_spill] sm:$0xff]  ;;  %v7192_v2 = vld [vmem:[#allocation25_spill] sm:$0xff] }
 0x30f   :  { %v1860_v52 = vcombine.high %v7190_v39, %v7190_v39  ;;  %v1428_v41 = vrot.slane %v6177_v33, %v5383_v31  ;;  %v6199_v55 = vrot.slane %v1830_v43, %v5228_v30  ;;  %v6208_v32 = vrot.slane %v6185_v7, %v5228_v30  ;;  %v7193_v39 = vld [vmem:[#allocation23_spill] sm:$0xff] }
 0x310   :  { %1759 = vrot.lane.b32.xlu1 %v1708_v53, %s4926_s1  ;;  %v1084_v45 = vadd.f32 %v5958_v62, %v1068_v22  ;;  %v1572_v12 = vadd.f32 %v1568_v42, %v5925_v60  ;;  %v6211_v21 = vrot.slane %v1815_v59, %v5228_v30 }
 0x311   :  { %v748_v35 = vpop.permute.xlu0 %747  ;;  %v1924_v19 = vrot.slane %v1860_v52, %v5383_v31  ;;  %v1920_v60 = vrot.slane %v6199_v55, %v5383_v31  ;;  %v3086_v52 = vcombine.high %v7193_v39, %v7193_v39 }
 0x312   :  { %1489 = vrot.lane.b32.xlu0 %v1432_v49, %s4929_s16  ;;  %794 = vst.msk [vmem:[#allocation2 + $0x5] sm:$0x1] %vm395_vm2, %v748_v35  ;;  %v1088_v16 = vadd.f32 %v1084_v45, %v5848_v6  ;;  %v1576_v10 = vadd.f32 %v1572_v12, %v5958_v62  ;;  %v2574_v49 = vcombine.high %v7191_v51, %v7191_v51  ;;  %v7196_v51 = vld [vmem:[#allocation30_spill] sm:$0xff] }
 0x313   :  { %v1440_v35 = vrot.slane %v6208_v32, %v5383_v31  ;;  %v6227_v62 = vrot.slane %v6211_v21, %v5228_v30 }
 0x314   :  { %1767 = vrot.lane.b32.xlu1 %v1724_v15, %s4926_s1  ;;  %v2543_v15 = vcombine.high %v7192_v2, %v7192_v2  ;;  %v6232_v42 = vadd.f32 %v1088_v16, %v5870_v36  ;;  %v1580_v22 = vadd.f32 %v1576_v10, %v5848_v6  ;;  %v7194_v6 = vld [vmem:[#allocation27_spill] sm:$0xff] }
 0x315   :  { %v974_v25 = vpop.permute.xlu1 %973  ;;  %v1260_v26 = vpop.permute.xlu0 %1259  ;;  %v3055_v45 = vcombine.high %v7194_v6, %v7194_v6 }
 0x316   :  { %1773 = vrot.lane.b32.xlu0 %v1736_v58, %s4926_s1  ;;  %1021 = vst.msk [vmem:[#allocation2 + $0x81] sm:$0x1] %vm395_vm2, %v974_v25  ;;  %1306 = vst.msk [vmem:[#allocation2 + $0x6] sm:$0x1] %vm395_vm2, %v1260_v26  ;;  %v2640_v58 = vrot.slane %v2574_v49, %v5383_v31  ;;  %v1932_v25 = vrot.slane %v6227_v62, %v5383_v31  ;;  %v6245_v26 = vrot.slane %v2543_v15, %v5228_v30 }
 0x317   :  { %v6251_v12 = vrot.slane %v6232_v42, %v5228_v30 }
 0x318   :  { %1487 = vrot.lane.b32.xlu1 %v1428_v41, %s4929_s16  ;;  %v2648_v10 = vrot.slane %v6245_v26, %v5383_v31 }
 0x319   :  { %v1262_v53 = vpop.permute.xlu1 %1261  ;;  %v1754_v5 = vpop.permute.xlu0 %1753  ;;  %v6277_v15 = vrot.slane %v6251_v12, %v5228_v30 }
 0x31a   :  { %1981 = vrot.lane.b32.xlu0 %v1924_v19, %s4926_s1  ;;  %1307 = vst.msk [vmem:[#allocation2 + $0xa] sm:$0x1] %vm395_vm2, %v1262_v53  ;;  %1799 = vst.msk [vmem:[#allocation2 + $0xb] sm:$0x1] %vm395_vm2, %v1754_v5  ;;  %v6254_v19 = vadd.f32 %v1580_v22, %v5870_v36  ;;  %v3152_v53 = vrot.slane %v3086_v52, %v5383_v31  ;;  %v7195_v5 = vld [vmem:[#allocation24_spill] sm:$0xff]  ;;  %v3547_v36 = vcombine.high %v7196_v51, %v7196_v51 }
 0x31b   :  { %v3578_v16 = vcombine.high %v7195_v5, %v7195_v5 }
 0x31c   :  { %1979 = vrot.lane.b32.xlu1 %v1920_v60, %s4926_s1  ;;  %v6265_v60 = vrot.slane %v3055_v45, %v5228_v30 }
 0x31d   :  { %v1266_v43 = vpop.permute.xlu1 %1265  ;;  %v1758_v59 = vpop.permute.xlu0 %1757  ;;  %v3644_v2 = vrot.slane %v3578_v16, %v5383_v31 }
 0x31e   :  { %1493 = vrot.lane.b32.xlu0 %v1440_v35, %s4929_s16  ;;  %1309 = vst.msk [vmem:[#allocation2 + $0x12] sm:$0x1] %vm395_vm2, %v1266_v43  ;;  %1801 = vst.msk [vmem:[#allocation2 + $0x13] sm:$0x1] %vm395_vm2, %v1758_v59  ;;  %v6271_v35 = vrot.slane %v6254_v19, %v5228_v30  ;;  %v3160_v43 = vrot.slane %v6265_v60, %v5383_v31  ;;  %v6284_v59 = vrot.slane %v3547_v36, %v5228_v30 }
 0x320   :  { %2695 = vrot.lane.b32.xlu1 %v2640_v58, %s4925_s3  ;;  %v1456_v58 = vrot.slane %v6277_v15, %v5383_v31  ;;  %v6291_v39 = vrot.slane %v6271_v35, %v5228_v30  ;;  %v3652_v52 = vrot.slane %v6284_v59, %v5383_v31 }
 0x321   :  { %v1274_v41 = vpop.permute.xlu1 %1273 }
 0x322   :  { %1985 = vrot.lane.b32.xlu0 %v1932_v25, %s4926_s1  ;;  %1313 = vst.msk [vmem:[#allocation2 + $0x22] sm:$0x1] %vm395_vm2, %v1274_v41  ;;  %v2621_v25 = vcombine.high %v5841_v9, %v5841_v9  ;;  %v1948_v41 = vrot.slane %v6291_v39, %v5383_v31 }
 0x324   :  { %3207 = vrot.lane.b32.xlu1 %v3152_v53, %s4929_s16  ;;  %v7197_v53 = vld [vmem:[#allocation26_spill] sm:$0xff]  ;;  %v2668_v9 = vrot.slane %v2621_v25, %v5383_v31 }
 0x325   :  { %v1752_v49 = vpop.permute.xlu1 %1751  ;;  %v2573_v5 = vcombine.high %v7197_v53, %v7197_v53  ;;  %v3282_v53 = vcombine.high %v5909_v24, %v5909_v24 }
 0x326   :  { %2699 = vrot.lane.b32.xlu0 %v2648_v10, %s4925_s3  ;;  %1798 = vst.msk [vmem:[#allocation2 + $0x7] sm:$0x1] %vm395_vm2, %v1752_v49  ;;  %v3133_v10 = vcombine.high %v5860_v29, %v5860_v29  ;;  %v7198_v49 = vld [vmem:[#allocation29_spill] sm:$0xff]  ;;  %v3625_v29 = vcombine.high %v5878_v28, %v5878_v28 }
 0x327   :  { %v2652_v36 = vrot.slane %v2573_v5, %v5383_v31 }
 0x328   :  { %3699 = vrot.lane.b32.xlu1 %v3644_v2, %s4926_s1  ;;  %v3085_v2 = vcombine.high %v7198_v49, %v7198_v49  ;;  %v2576_v49 = vcombine.high %v5818_v37, %v5818_v37 }
 0x329   :  { %v2692_v22 = vpop.permute.xlu1 %2691 }
 0x32a   :  { %3211 = vrot.lane.b32.xlu0 %v3160_v43, %s4929_s16  ;;  %2738 = vst.msk [vmem:[#allocation2 + $0x45] sm:$0x1] %vm395_vm2, %v2692_v22  ;;  %v3180_v22 = vrot.slane %v3133_v10, %v5383_v31  ;;  %v3164_v25 = vrot.slane %v3085_v2, %v5383_v31  ;;  %v6351_v10 = vrot.slane %v3282_v53, %v5228_v30 }
 0x32b   :  { %v679_v53 = vcombine.high %v5979_v14, %v5979_v14 }
 0x32c   :  { %1501 = vrot.lane.b32.xlu1 %v1456_v58, %s4929_s16  ;;  %v2770_v58 = vcombine.high %v5864_v4, %v5864_v4  ;;  %v3672_v4 = vrot.slane %v3625_v29, %v5383_v31 }
 0x32d   :  { %v3204_v6 = vpop.permute.xlu1 %3203  ;;  %v4718_v45 = vld [vmem:[#allocation2] sm:$0xff]  }
 0x32e   :  { %3703 = vrot.lane.b32.xlu0 %v3652_v52, %s4926_s1  ;;  %3250 = vst.msk [vmem:[#allocation2 + $0x46] sm:$0x1] %vm395_vm2, %v3204_v6  ;;  %v1766_v16 = vpop.permute.xlu0 %1765  ;;  %4644 = vmatprep.mubr.msk.f32.mxu0 %vm4147_vm3, %v4718_v45  ;;  %v3577_v6 = vcombine.high %v5788_v1, %v5788_v1  ;;  %v2591_v45 = vcombine.high %v5830_v46, %v5830_v46 }
 0x32f   :  { %1805 = vst.msk [vmem:[#allocation2 + $0x23] sm:$0x1] %vm395_vm2, %v1766_v16  ;;  %v6334_v28 = vrot.slane %v2770_v58, %v5228_v30  ;;  %v3103_v1 = vcombine.high %v5836_v23, %v5836_v23  ;;  %v3774_v23 = vcombine.high %v5934_v11, %v5934_v11  ;;  %v6380_v58 = vrot.slane %v2576_v49, %v5228_v30 }
 0x330   :  { %1993 = vrot.lane.b32.xlu1 %v1948_v41, %s4926_s1  ;;  %v3656_v16 = vrot.slane %v3577_v6, %v5383_v31  ;;  %v6343_v46 = vrot.slane %v2591_v45, %v5228_v30  ;;  %v631_v6 = vcombine.high %v5930_v13, %v5930_v13 }
 0x331   :  { %v3696_v51 = vpop.permute.xlu1 %3695  ;;  %v2860_v24 = vrot.slane %v6334_v28, %v5383_v31  ;;  %v6371_v37 = vrot.slane %v3774_v23, %v5228_v30  ;;  %v857_v23 = vcombine.high %v6070_v61, %v6070_v61  ;;  %v905_v61 = vcombine.high %v6087_v18, %v6087_v18 }
 0x332   :  { %2709 = vrot.lane.b32.xlu0 %v2668_v9, %s4925_s3  ;;  %3742 = vst.msk [vmem:[#allocation2 + $0x47] sm:$0x1] %vm395_vm2, %v3696_v51  ;;  %v1486_v43 = vpop.permute.xlu0 %1485  ;;  %v2664_v2 = vrot.slane %v6343_v46, %v5383_v31 }
 0x333   :  { %1533 = vst.msk [vmem:[#allocation2 + $0x82] sm:$0x1] %vm395_vm2, %v1486_v43  ;;  %v6363_v43 = vrot.slane %v3103_v1, %v5228_v30 }
 0x334   :  { %2701 = vrot.lane.b32.xlu1 %v2652_v36, %s4925_s3  ;;  %v3595_v36 = vcombine.high %v5852_v0, %v5852_v0  ;;  %v3372_v0 = vrot.slane %v6351_v10, %v5383_v31 }
 0x335   :  { %v2698_v52 = vpop.permute.xlu1 %2697  ;;  %v3176_v11 = vrot.slane %v6363_v43, %v5383_v31 }
 0x336   :  { %3221 = vrot.lane.b32.xlu0 %v3180_v22, %s4929_s16  ;;  %2741 = vst.msk [vmem:[#allocation2 + $0x51] sm:$0x1] %vm395_vm2, %v2698_v52  ;;  %v1978_v41 = vpop.permute.xlu0 %1977  ;;  %v6377_v29 = vrot.slane %v3595_v36, %v5228_v30  ;;  %v858_v36 = vcombine.high %v5995_v54, %v5995_v54 }
 0x337   :  { %2025 = vst.msk [vmem:[#allocation2 + $0x83] sm:$0x1] %vm395_vm2, %v1978_v41  ;;  %v6393_v41 = vrot.slane %v6380_v58, %v5228_v30 }
 0x338   :  { %3213 = vrot.lane.b32.xlu1 %v3164_v25, %s4929_s16  ;;  %v3864_v25 = vrot.slane %v6371_v37, %v5383_v31  ;;  %v3668_v45 = vrot.slane %v6377_v29, %v5383_v31 }
 0x339   :  { %v3210_v5 = vpop.permute.xlu1 %3209  ;;  %v2676_v13 = vrot.slane %v6393_v41, %v5383_v31 }
 0x33a   :  { %3713 = vrot.lane.b32.xlu0 %v3672_v4, %s4926_s1  ;;  %3253 = vst.msk [vmem:[#allocation2 + $0x52] sm:$0x1] %vm395_vm2, %v3210_v5  ;;  %v2694_v9 = vpop.permute.xlu0 %2693  ;;  %v712_v4 = vrot.slane %v631_v6, %v5383_v31  ;;  %v648_v5 = vcombine.high %v6006_v57, %v6006_v57  ;;  %v860_v57 = vcombine.high %v6043_v40, %v6043_v40 }
 0x33b   :  { %2739 = vst.msk [vmem:[#allocation2 + $0x49] sm:$0x1] %vm395_vm2, %v2694_v9  ;;  %v728_v9 = vrot.slane %v679_v53, %v5383_v31  ;;  %v827_v40 = vcombine.high %v6040_v8, %v6040_v8  ;;  %v924_v8 = vrot.slane %v858_v36, %v5383_v31  ;;  %v1191_v53 = vcombine.high %v6056_v27, %v6056_v27 }
 0x33c   :  { %3705 = vrot.lane.b32.xlu1 %v3656_v16, %s4926_s1  ;;  %v678_v16 = vcombine.high %v6026_v50, %v6026_v50  ;;  %v6410_v14 = vrot.slane %v648_v5, %v5228_v30  ;;  %v6427_v49 = vrot.slane %v860_v57, %v5228_v30  ;;  %v1160_v5 = vcombine.high %v6079_v20, %v6079_v20 }
 0x33d   :  { %v3702_v51 = vpop.permute.xlu1 %3701  ;;  %v1240_v57 = vrot.slane %v1191_v53, %v5383_v31  ;;  %v1635_v36 = vcombine.high %v6138_v3, %v6138_v3  ;;  %v1683_v3 = vcombine.high %v6156_v38, %v6156_v38  ;;  %v1370_v38 = vcombine.high %v6177_v33, %v6177_v33 }
 0x33e   :  { %2919 = vrot.lane.b32.xlu0 %v2860_v24, %s4925_s3  ;;  %3745 = vst.msk [vmem:[#allocation2 + $0x53] sm:$0x1] %vm395_vm2, %v3702_v51  ;;  %v3206_v22 = vpop.permute.xlu0 %3205  ;;  %v740_v24 = vrot.slane %v678_v16, %v5383_v31  ;;  %v736_v51 = vrot.slane %v6410_v14, %v5383_v31  ;;  %v6446_v18 = vrot.slane %v6427_v49, %v5228_v30 }
 0x33f   :  { %3251 = vst.msk [vmem:[#allocation2 + $0x4a] sm:$0x1] %vm395_vm2, %v3206_v22  ;;  %v1143_v16 = vcombine.high %v6033_v44, %v6033_v44  ;;  %v6472_v27 = vrot.slane %v1160_v5, %v5228_v30  ;;  %v1190_v44 = vcombine.high %v6094_v48, %v6094_v48  ;;  %v1436_v5 = vrot.slane %v1370_v38, %v5383_v31 }
 0x340   :  { %2707 = vrot.lane.b32.xlu1 %v2664_v2, %s4925_s3  ;;  %v936_v2 = vrot.slane %v857_v23, %v5383_v31  ;;  %v1387_v23 = vcombine.high %v6251_v12, %v6251_v12  ;;  %v1369_v38 = vcombine.high %v6208_v32, %v6208_v32  ;;  %v1861_v32 = vcombine.high %v6227_v62, %v6227_v62 }
 0x341   :  { %v1252_v48 = vrot.slane %v1190_v44, %v5383_v31 }
 0x342   :  { %3431 = vrot.lane.b32.xlu0 %v3372_v0, %s4929_s16  ;;  %v3698_v52 = vpop.permute.xlu0 %3697  ;;  %v875_v0 = vcombine.high %v6064_v17, %v6064_v17  ;;  %v6491_v12 = vrot.slane %v1387_v23, %v5228_v30  ;;  %v1940_v62 = vrot.slane %v1861_v32, %v5383_v31 }
 0x343   :  { %3743 = vst.msk [vmem:[#allocation2 + $0x4b] sm:$0x1] %vm395_vm2, %v3698_v52  ;;  %v952_v52 = vrot.slane %v905_v61, %v5383_v31 }
 0x344   :  { %3219 = vrot.lane.b32.xlu1 %v3176_v11, %s4929_s16  ;;  %v6439_v11 = vrot.slane %v827_v40, %v5228_v30  ;;  %v6452_v6 = vrot.slane %v875_v0, %v5228_v30 }
 0x346   :  { %3923 = vrot.lane.b32.xlu0 %v3864_v25, %s4926_s1  ;;  %v932_v25 = vrot.slane %v6439_v11, %v5383_v31 }
 0x348   :  { %3711 = vrot.lane.b32.xlu1 %v3668_v45, %s4926_s1 }
 0x349   :  { %v2706_v1 = vpop.permute.xlu0 %2705 }
 0x34a   :  { %759 = vrot.lane.b32.xlu0 %v712_v4, %s4925_s3  ;;  %2745 = vst.msk [vmem:[#allocation2 + $0x61] sm:$0x1] %vm395_vm2, %v2706_v1  ;;  %v960_v4 = vrot.slane %v6446_v18, %v5383_v31  ;;  %v948_v1 = vrot.slane %v6452_v6, %v5383_v31 }
 0x34c   :  { %2713 = vrot.lane.b32.xlu1 %v2676_v13, %s4925_s3 }
 0x34d   :  { %v3218_v50 = vpop.permute.xlu0 %3217 }
 0x34e   :  { %767 = vrot.lane.b32.xlu0 %v728_v9, %s4925_s3  ;;  %3257 = vst.msk [vmem:[#allocation2 + $0x62] sm:$0x1] %vm395_vm2, %v3218_v50 }
 0x350   :  { %773 = vrot.lane.b32.xlu1 %v740_v24, %s4925_s3  ;;  %v1224_v24 = vrot.slane %v1143_v16, %v5383_v31 }
 0x352   :  { %771 = vrot.lane.b32.xlu0 %v736_v51, %s4925_s3  ;;  %v1248_v51 = vrot.slane %v6472_v27, %v5383_v31 }
 0x353   :  { %v2918_v22 = vpop.permute.xlu1 %2917 }
 0x354   :  { %985 = vrot.lane.b32.xlu1 %v936_v2, %s4925_s3  ;;  %2965 = vst.msk [vmem:[#allocation2 + $0xc1] sm:$0x1] %vm395_vm2, %v2918_v22  ;;  %v3710_v54 = vpop.permute.xlu0 %3709  ;;  %v1879_v2 = vcombine.high %v6271_v35, %v6271_v35  ;;  %v1716_v22 = vrot.slane %v1635_v36, %v5383_v31 }
 0x355   :  { %3749 = vst.msk [vmem:[#allocation2 + $0x63] sm:$0x1] %vm395_vm2, %v3710_v54  ;;  %v1460_v54 = vrot.slane %v6491_v12, %v5383_v31 }
 0x356   :  { %979 = vrot.lane.b32.xlu0 %v924_v8, %s4925_s3  ;;  %v6505_v35 = vrot.slane %v1879_v2, %v5228_v30 }
 0x358   :  { %993 = vrot.lane.b32.xlu1 %v952_v52, %s4925_s3  ;;  %v752_v17 = vpop.permute.xlu0 %751  ;;  %v1732_v52 = vrot.slane %v1683_v3, %v5383_v31 }
 0x359   :  { %796 = vst.msk [vmem:[#allocation2 + $0xd] sm:$0x1] %vm395_vm2, %v752_v17  ;;  %v1652_v17 = vcombine.high %v6150_v56, %v6150_v56 }
 0x35a   :  { %v3430_v45 = vpop.permute.xlu1 %3429  ;;  %983 = vrot.lane.b32.xlu0 %v932_v25, %s4925_s3 }
 0x35b   :  { %3477 = vst.msk [vmem:[#allocation2 + $0xc2] sm:$0x1] %vm395_vm2, %v3430_v45  ;;  %v1952_v45 = vrot.slane %v6505_v35, %v5383_v31  ;;  %v6524_v56 = vrot.slane %v1652_v17, %v5228_v30 }
 0x35c   :  { %997 = vrot.lane.b32.xlu1 %v960_v4, %s4925_s3  ;;  %v756_v13 = vpop.permute.xlu0 %755  ;;  %v2575_v4 = vcombine.high %v6245_v26, %v6245_v26  ;;  %v3087_v26 = vcombine.high %v6265_v60, %v6265_v60  ;;  %v3579_v60 = vcombine.high %v6284_v59, %v6284_v59 }
 0x35d   :  { %798 = vst.msk [vmem:[#allocation2 + $0x15] sm:$0x1] %vm395_vm2, %v756_v13  ;;  %v1740_v16 = vrot.slane %v6524_v56, %v5383_v31 }
 0x35e   :  { %v3922_v9 = vpop.permute.xlu1 %3921  ;;  %991 = vrot.lane.b32.xlu0 %v948_v1, %s4925_s3  ;;  %v2656_v13 = vrot.slane %v2575_v4, %v5383_v31 }
 0x35f   :  { %3969 = vst.msk [vmem:[#allocation2 + $0xc3] sm:$0x1] %vm395_vm2, %v3922_v9  ;;  %v1862_v9 = vcombine.high %v6199_v55, %v6199_v55  ;;  %v1682_v55 = vcombine.high %v6169_v47, %v6169_v47 }
 0x360   :  { %1279 = vrot.lane.b32.xlu1 %v1240_v57, %s4929_s16  ;;  %v764_v20 = vpop.permute.xlu0 %763 }
 0x361   :  { %802 = vst.msk [vmem:[#allocation2 + $0x25] sm:$0x1] %vm395_vm2, %v764_v20  ;;  %v3168_v20 = vrot.slane %v3087_v26, %v5383_v31  ;;  %v1928_v23 = vrot.slane %v1862_v9, %v5383_v31 }
 0x362   :  { %v758_v50 = vpop.permute.xlu1 %757  ;;  %1271 = vrot.lane.b32.xlu0 %v1224_v24, %s4929_s16  ;;  %v2592_v24 = vcombine.high %v6380_v58, %v6380_v58  ;;  %v3660_v58 = vrot.slane %v3579_v60, %v5383_v31 }
 0x363   :  { %799 = vst.msk [vmem:[#allocation2 + $0x19] sm:$0x1] %vm395_vm2, %v758_v50  ;;  %v1339_v50 = vcombine.high %v6185_v7, %v6185_v7  ;;  %v1831_v7 = vcombine.high %v6211_v21, %v6211_v21 }
 0x364   :  { %1283 = vrot.lane.b32.xlu1 %v1248_v51, %s4929_s16  ;;  %v976_v40 = vpop.permute.xlu0 %975  ;;  %v6555_v51 = vrot.slane %v2592_v24, %v5228_v30  ;;  %v1909_v24 = vcombine.high %v6291_v39, %v6291_v39 }
 0x365   :  { %1022 = vst.msk [vmem:[#allocation2 + $0x85] sm:$0x1] %vm395_vm2, %v976_v40  ;;  %v1744_v40 = vrot.slane %v1682_v55, %v5383_v31  ;;  %v6561_v47 = vrot.slane %v1339_v50, %v5228_v30  ;;  %v6576_v21 = vrot.slane %v1831_v7, %v5228_v30 }
 0x366   :  { %v766_v61 = vpop.permute.xlu1 %765  ;;  %1285 = vrot.lane.b32.xlu0 %v1252_v48, %s4929_s16  ;;  %v2680_v2 = vrot.slane %v6555_v51, %v5383_v31  ;;  %v1956_v50 = vrot.slane %v1909_v24, %v5383_v31 }
 0x367   :  { %803 = vst.msk [vmem:[#allocation2 + $0x29] sm:$0x1] %vm395_vm2, %v766_v61  ;;  %v680_v61 = vcombine.high %v6410_v14, %v6410_v14  ;;  %v1444_v3 = vrot.slane %v6561_v47, %v5383_v31  ;;  %v859_v14 = vcombine.high %v6439_v11, %v6439_v11  ;;  %v907_v11 = vcombine.high %v6452_v6, %v6452_v6 }
 0x368   :  { %1763 = vrot.lane.b32.xlu1 %v1716_v22, %s4926_s1  ;;  %v1264_v0 = vpop.permute.xlu0 %1263 }
 0x369   :  { %1308 = vst.msk [vmem:[#allocation2 + $0xe] sm:$0x1] %vm395_vm2, %v1264_v0 }
 0x36a   :  { %v770_v8 = vpop.permute.xlu1 %769  ;;  %1503 = vrot.lane.b32.xlu0 %v1460_v54, %s4929_s16  ;;  %v744_v54 = vrot.slane %v680_v61, %v5383_v31 }
 0x36b   :  { %805 = vst.msk [vmem:[#allocation2 + $0x31] sm:$0x1] %vm395_vm2, %v770_v8 }
 0x36c   :  { %1771 = vrot.lane.b32.xlu1 %v1732_v52, %s4926_s1  ;;  %v1268_v25 = vpop.permute.xlu0 %1267  ;;  %v1936_v52 = vrot.slane %v6576_v21, %v5383_v31 }
 0x36d   :  { %1310 = vst.msk [vmem:[#allocation2 + $0x16] sm:$0x1] %vm395_vm2, %v1268_v25  ;;  %v940_v25 = vrot.slane %v859_v14, %v5383_v31 }
 0x36e   :  { %v978_v53 = vpop.permute.xlu1 %977  ;;  %1995 = vrot.lane.b32.xlu0 %v1952_v45, %s4926_s1  ;;  %v876_v45 = vcombine.high %v6427_v49, %v6427_v49  ;;  %v956_v49 = vrot.slane %v907_v11, %v5383_v31 }
 0x36f   :  { %1023 = vst.msk [vmem:[#allocation2 + $0x89] sm:$0x1] %vm395_vm2, %v978_v53  ;;  %v1448_v53 = vrot.slane %v1369_v38, %v5383_v31 }
 0x370   :  { %1491 = vrot.lane.b32.xlu1 %v1436_v5, %s4929_s16  ;;  %v1276_v33 = vpop.permute.xlu0 %1275 }
 0x371   :  { %1314 = vst.msk [vmem:[#allocation2 + $0x26] sm:$0x1] %vm395_vm2, %v1276_v33  ;;  %v6606_v33 = vrot.slane %v876_v45, %v5228_v30 }
 0x372   :  { %v982_v1 = vpop.permute.xlu1 %981  ;;  %2703 = vrot.lane.b32.xlu0 %v2656_v13, %s4925_s3  ;;  %v1372_v13 = vcombine.high %v6232_v42, %v6232_v42  ;;  %v1192_v42 = vcombine.high %v6472_v27, %v6472_v27 }
 0x373   :  { %1025 = vst.msk [vmem:[#allocation2 + $0x91] sm:$0x1] %vm395_vm2, %v982_v1 }
 0x374   :  { %1775 = vrot.lane.b32.xlu1 %v1740_v16, %s4926_s1  ;;  %v1278_v57 = vpop.permute.xlu0 %1277  ;;  %v1417_v16 = vcombine.high %v6277_v15, %v6277_v15 }
 0x375   :  { %1315 = vst.msk [vmem:[#allocation2 + $0x2a] sm:$0x1] %vm395_vm2, %v1278_v57  ;;  %v964_v57 = vrot.slane %v6606_v33, %v5383_v31 }
 0x376   :  { %v990_v44 = vpop.permute.xlu1 %989  ;;  %3215 = vrot.lane.b32.xlu0 %v3168_v20, %s4929_s16  ;;  %v1864_v20 = vcombine.high %v6254_v19, %v6254_v19  ;;  %v1464_v15 = vrot.slane %v1417_v16, %v5383_v31  ;;  %v1684_v19 = vcombine.high %v6524_v56, %v6524_v56  ;;  %v1371_v56 = vcombine.high %v6561_v47, %v6561_v47 }
 0x377   :  { %1029 = vst.msk [vmem:[#allocation2 + $0xa1] sm:$0x1] %vm395_vm2, %v990_v44  ;;  %v1386_v44 = vrot.slane %v1372_v13, %v5228_v30 }
 0x378   :  { %1983 = vrot.lane.b32.xlu1 %v1928_v23, %s4926_s1  ;;  %v1282_v59 = vpop.permute.xlu0 %1281  ;;  %v1256_v23 = vrot.slane %v1192_v42, %v5383_v31  ;;  %v1452_v47 = vrot.slane %v1371_v56, %v5383_v31  ;;  %v908_v42 = vcombine.high %v6606_v33, %v6606_v33 }
 0x379   :  { %1317 = vst.msk [vmem:[#allocation2 + $0x32] sm:$0x1] %vm395_vm2, %v1282_v59  ;;  %v6639_v39 = vrot.slane %v1386_v44, %v5228_v30  ;;  %v1878_v59 = vrot.slane %v1864_v20, %v5228_v30  ;;  %v1388_v11 = vcombine.high %v1386_v44, %v1386_v44  ;;  %v3088_v20 = vcombine.high %v5823_v34, %v5823_v34 }
 0x37a   :  { %v1270_v36 = vpop.permute.xlu1 %1269  ;;  %3707 = vrot.lane.b32.xlu0 %v3660_v58, %s4926_s1  ;;  %v972_v33 = vrot.slane %v908_v42, %v5383_v31 }
 0x37b   :  { %1311 = vst.msk [vmem:[#allocation2 + $0x1a] sm:$0x1] %vm395_vm2, %v1270_v36  ;;  %v1748_v36 = vrot.slane %v1684_v19, %v5383_v31  ;;  %v1472_v7 = vrot.slane %v6639_v39, %v5383_v31  ;;  %v1880_v32 = vcombine.high %v1878_v59, %v1878_v59  ;;  %v3102_v34 = vrot.slane %v3088_v20, %v5228_v30 }
 0x37c   :  { %1777 = vrot.lane.b32.xlu1 %v1744_v40, %s4926_s1  ;;  %v1762_v48 = vpop.permute.xlu0 %1761 }
 0x37d   :  { %1803 = vst.msk [vmem:[#allocation2 + $0x1b] sm:$0x1] %vm395_vm2, %v1762_v48 }
 0x37e   :  { %v1756_v22 = vpop.permute.xlu1 %1755  ;;  %2715 = vrot.lane.b32.xlu0 %v2680_v2, %s4925_s3  ;;  %v6652_v2 = vrot.slane %v1878_v59, %v5228_v30 }
 0x37f   :  { %1800 = vst.msk [vmem:[#allocation2 + $0xf] sm:$0x1] %vm395_vm2, %v1756_v22  ;;  %v1863_v22 = vcombine.high %v6576_v21, %v6576_v21  ;;  %v1419_v21 = vcombine.high %v6491_v12, %v6491_v12  ;;  %v1911_v12 = vcombine.high %v6505_v35, %v6505_v35  ;;  %v1416_v35 = vrot.slane %v1388_v11, %v5228_v30 }
 0x380   :  { %1495 = vrot.lane.b32.xlu1 %v1444_v3, %s4929_s16  ;;  %v1770_v0 = vpop.permute.xlu0 %1769  ;;  %v1910_v24 = vcombine.high %v6652_v2, %v6652_v2 }
 0x381   :  { %1807 = vst.msk [vmem:[#allocation2 + $0x2b] sm:$0x1] %vm395_vm2, %v1770_v0  ;;  %v1964_v0 = vrot.slane %v6652_v2, %v5383_v31  ;;  %v2802_v2 = vcombine.high %v6334_v28, %v6334_v28 }
 0x382   :  { %v1760_v8 = vpop.permute.xlu1 %1759  ;;  %775 = vrot.lane.b32.xlu0 %v744_v54, %s4925_s3  ;;  %v2623_v54 = vcombine.high %v6343_v46, %v6343_v46  ;;  %v3135_v46 = vcombine.high %v6363_v43, %v6363_v43  ;;  %v3627_v43 = vcombine.high %v6377_v29, %v6377_v29  ;;  %v906_v29 = vcombine.high %v6446_v18, %v6446_v18 }
 0x383   :  { %1802 = vst.msk [vmem:[#allocation2 + $0x17] sm:$0x1] %vm395_vm2, %v1760_v8  ;;  %v1944_v8 = vrot.slane %v1863_v22, %v5383_v31  ;;  %v1972_v19 = vrot.slane %v1910_v24, %v5383_v31  ;;  %v2868_v28 = vrot.slane %v2802_v2, %v5383_v31  ;;  %v7206_v2 = vld [vmem:[#allocation39_spill] sm:$0xff] }
 0x384   :  { %1987 = vrot.lane.b32.xlu1 %v1936_v52, %s4926_s1  ;;  %v1490_v17 = vpop.permute.xlu0 %1489  ;;  %v2672_v38 = vrot.slane %v2623_v54, %v5383_v31  ;;  %v968_v16 = vrot.slane %v906_v29, %v5383_v31 }
 0x385   :  { %1535 = vst.msk [vmem:[#allocation2 + $0x8a] sm:$0x1] %vm395_vm2, %v1490_v17 }
 0x386   :  { %v1768_v4 = vpop.permute.xlu1 %1767  ;;  %v4719_v5 = vld [vmem:[#allocation2 + $0x8] sm:$0xff]   ;;  %987 = vrot.lane.b32.xlu0 %v940_v25, %s4925_s3  ;;  %v1468_v25 = vrot.slane %v1419_v21, %v5383_v31 }
 0x387   :  { %1806 = vst.msk [vmem:[#allocation2 + $0x27] sm:$0x1] %vm395_vm2, %v1768_v4  ;;  %4645 = vmatmul.mubr.msk.f32.vlgmr.msra.gmra.mrb[4].mxu0 %vm4147_vm3, %v4719_v5  ;;  %v3184_v4 = vrot.slane %v3135_v46, %v5383_v31  ;;  %v1960_v5 = vrot.slane %v1911_v12, %v5383_v31 }
 0x388   :  { %1497 = vrot.lane.b32.xlu1 %v1448_v53, %s4929_s16  ;;  %v1774_v6 = vpop.permute.xlu0 %1773 }
 0x389   :  { %1809 = vst.msk [vmem:[#allocation2 + $0x33] sm:$0x1] %vm395_vm2, %v1774_v6 }
 0x38a   :  { %v1488_v26 = vpop.permute.xlu1 %1487  ;;  %v4720_v1 = vld [vmem:[#allocation2 + $0x10] sm:$0xff]   ;;  %995 = vrot.lane.b32.xlu0 %v956_v49, %s4925_s3  ;;  %v3676_v49 = vrot.slane %v3627_v43, %v5383_v31 }
 0x38b   :  { %1534 = vst.msk [vmem:[#allocation2 + $0x86] sm:$0x1] %vm395_vm2, %v1488_v26  ;;  %4647 = vmatprep.mubr.msk.f32.mxu0 %vm4147_vm3, %v4720_v1  ;;  %v1476_v26 = vrot.slane %v1416_v35, %v5383_v31 }
 0x38c   :  { %1989 = vrot.lane.b32.xlu1 %v1940_v62, %s4926_s1  ;;  %v1982_v9 = vpop.permute.xlu0 %1981  ;;  %v1908_v62 = vrot.slane %v1880_v32, %v5228_v30 }
 0x38d   :  { %2027 = vst.msk [vmem:[#allocation2 + $0x8b] sm:$0x1] %vm395_vm2, %v1982_v9  ;;  %v1418_v9 = vcombine.high %v6639_v39, %v6639_v39 }
 0x38e   :  { %v1980_v60 = vpop.permute.xlu1 %1979  ;;  %999 = vrot.lane.b32.xlu0 %v964_v57, %s4925_s3  ;;  %v1968_v57 = vrot.slane %v1908_v62, %v5383_v31  ;;  %v1912_v59 = vcombine.high %v1908_v62, %v1908_v62 }
 0x38f   :  { %2026 = vst.msk [vmem:[#allocation2 + $0x87] sm:$0x1] %vm395_vm2, %v1980_v60 }
 0x390   :  { %1505 = vrot.lane.b32.xlu1 %v1464_v15, %s4929_s16  ;;  %v1494_v27 = vpop.permute.xlu0 %1493  ;;  %v1480_v15 = vrot.slane %v1418_v9, %v5383_v31 }
 0x391   :  { %1537 = vst.msk [vmem:[#allocation2 + $0x92] sm:$0x1] %vm395_vm2, %v1494_v27  ;;  %v1420_v27 = vcombine.high %v1416_v35, %v1416_v35 }
 0x392   :  { %v2696_v55 = vpop.permute.xlu1 %2695  ;;  %1287 = vrot.lane.b32.xlu0 %v1256_v23, %s4929_s16 }
 0x393   :  { %2740 = vst.msk [vmem:[#allocation2 + $0x4d] sm:$0x1] %vm395_vm2, %v2696_v55  ;;  %v2800_v55 = vcombine.high %v5901_v63, %v5901_v63  ;;  %v1484_v39 = vrot.slane %v1420_v27, %v5383_v31  ;;  %v6734_v63 = vrot.slane %v3102_v34, %v5228_v30  ;;  %v7204_v27 = vld [vmem:[#allocation34_spill] sm:$0xff] }
 0x394   :  { %1997 = vrot.lane.b32.xlu1 %v1956_v50, %s4926_s1  ;;  %v1986_v58 = vpop.permute.xlu0 %1985 }
 0x395   :  { %2029 = vst.msk [vmem:[#allocation2 + $0x93] sm:$0x1] %vm395_vm2, %v1986_v58  ;;  %v7199_v58 = vld [vmem:[#allocation31_spill] sm:$0xff] }
 0x396   :  { %v3208_v40 = vpop.permute.xlu1 %3207  ;;  %v4721_v48 = vld [vmem:[#allocation2 + $0x80] sm:$0xff]   ;;  %1779 = vrot.lane.b32.xlu0 %v1748_v36, %s4926_s1  ;;  %v3580_v36 = vcombine.high %v7199_v58, %v7199_v58 }
 0x397   :  { %3252 = vst.msk [vmem:[#allocation2 + $0x4e] sm:$0x1] %vm395_vm2, %v3208_v40  ;;  %4668 = vmatprep.mubr.msk.f32.mxu1 %vm4147_vm3, %v4721_v48  ;;  %v2864_v40 = vrot.slane %v2800_v55, %v5383_v31  ;;  %v1976_v48 = vrot.slane %v1912_v59, %v5383_v31 }
 0x398   :  { %1509 = vrot.lane.b32.xlu1 %v1472_v7, %s4929_s16  ;;  %v2700_v61 = vpop.permute.xlu0 %2699 }
 0x399   :  { %2742 = vst.msk [vmem:[#allocation2 + $0x55] sm:$0x1] %vm395_vm2, %v2700_v61  ;;  %v3104_v61 = vcombine.high %v3102_v34, %v3102_v34  ;;  %v3759_v34 = vcombine.high %v7204_v27, %v7204_v27 }
 0x39a   :  { %v3700_v3 = vpop.permute.xlu1 %3699  ;;  %1499 = vrot.lane.b32.xlu0 %v1452_v47, %s4929_s16  ;;  %v3594_v47 = vrot.slane %v3580_v36, %v5228_v30 }
 0x39b   :  { %3744 = vst.msk [vmem:[#allocation2 + $0x4f] sm:$0x1] %vm395_vm2, %v3700_v3  ;;  %v3188_v3 = vrot.slane %v6734_v63, %v5383_v31 }
 0x39c   :  { %2001 = vrot.lane.b32.xlu1 %v1964_v0, %s4926_s1  ;;  %v3212_v14 = vpop.permute.xlu0 %3211  ;;  %v7200_v0 = vld [vmem:[#allocation35_spill] sm:$0xff]  ;;  %v3596_v12 = vcombine.high %v3594_v47, %v3594_v47 }
 0x39d   :  { %3254 = vst.msk [vmem:[#allocation2 + $0x56] sm:$0x1] %vm395_vm2, %v3212_v14  ;;  %v3312_v54 = vcombine.high %v7200_v0, %v7200_v0 }
 0x39e   :  { %v1502_v52 = vpop.permute.xlu1 %1501  ;;  %1991 = vrot.lane.b32.xlu0 %v1944_v8, %s4926_s1  ;;  %v6752_v8 = vrot.slane %v3104_v61, %v5228_v30 }
 0x39f   :  { %1541 = vst.msk [vmem:[#allocation2 + $0xa2] sm:$0x1] %vm395_vm2, %v1502_v52  ;;  %v3376_v52 = vrot.slane %v3312_v54, %v5383_v31 }
 0x3a0   :  { %2711 = vrot.lane.b32.xlu1 %v2672_v38, %s4925_s3  ;;  %v3704_v17 = vpop.permute.xlu0 %3703  ;;  %v3610_v38 = vrot.slane %v3594_v47, %v5228_v30  ;;  %v7207_v47 = vld [vmem:[#allocation41_spill] sm:$0xff] }
 0x3a1   :  { %3746 = vst.msk [vmem:[#allocation2 + $0x57] sm:$0x1] %vm395_vm2, %v3704_v17  ;;  %v3192_v17 = vrot.slane %v6752_v8, %v5383_v31 }
 0x3a2   :  { %v1994_v45 = vpop.permute.xlu1 %1993  ;;  %1507 = vrot.lane.b32.xlu0 %v1468_v25, %s4929_s16  ;;  %v3314_v25 = vcombine.high %v6351_v10, %v6351_v10  ;;  %v3624_v10 = vrot.slane %v3596_v12, %v5228_v30 }
 0x3a3   :  { %2033 = vst.msk [vmem:[#allocation2 + $0xa3] sm:$0x1] %vm395_vm2, %v1994_v45  ;;  %v3680_v45 = vrot.slane %v3610_v38, %v5383_v31 }
 0x3a4   :  { %3223 = vrot.lane.b32.xlu1 %v3184_v4, %s4929_s16  ;;  %v2710_v53 = vpop.permute.xlu0 %2709  ;;  %v7201_v4 = vld [vmem:[#allocation37_spill] sm:$0xff]  ;;  %v3684_v29 = vrot.slane %v3624_v10, %v5383_v31  ;;  %v3628_v58 = vcombine.high %v3624_v10, %v3624_v10 }
 0x3a5   :  { %2747 = vst.msk [vmem:[#allocation2 + $0x69] sm:$0x1] %vm395_vm2, %v2710_v53  ;;  %v3804_v43 = vcombine.high %v7201_v4, %v7201_v4  ;;  %v7210_v4 = vld [vmem:[#allocation18_spill] sm:$0xff] }
 0x3a6   :  { %v2702_v6 = vpop.permute.xlu1 %2701  ;;  %1999 = vrot.lane.b32.xlu0 %v1960_v5, %s4926_s1  ;;  %v3380_v5 = vrot.slane %v3314_v25, %v5383_v31  ;;  %v3692_v54 = vrot.slane %v3628_v58, %v5383_v31 }
 0x3a7   :  { %2743 = vst.msk [vmem:[#allocation2 + $0x59] sm:$0x1] %vm395_vm2, %v2702_v6  ;;  %v3868_v32 = vrot.slane %v3804_v43, %v5383_v31  ;;  %v2622_v6 = vcombine.high %v6393_v41, %v6393_v41  ;;  %v3134_v41 = vcombine.high %v6734_v63, %v6734_v63  ;;  %v7211_v43 = vld [vmem:[#allocation43_spill] sm:$0xff] }
 0x3a8   :  { %3715 = vrot.lane.b32.xlu1 %v3676_v49, %s4926_s1  ;;  %v3222_v13 = vpop.permute.xlu0 %3221 }
 0x3a9   :  { %3259 = vst.msk [vmem:[#allocation2 + $0x6a] sm:$0x1] %vm395_vm2, %v3222_v13  ;;  %v3806_v13 = vcombine.high %v6371_v37, %v6371_v37 }
 0x3aa   :  { %v3214_v1 = vpop.permute.xlu1 %3213  ;;  %1511 = vrot.lane.b32.xlu0 %v1476_v26, %s4929_s16  ;;  %v7202_v26 = vld [vmem:[#allocation32_spill] sm:$0xff] }
 0x3ab   :  { %3255 = vst.msk [vmem:[#allocation2 + $0x5a] sm:$0x1] %vm395_vm2, %v3214_v1  ;;  %v2755_v62 = vcombine.high %v7202_v26, %v7202_v26  ;;  %v3872_v37 = vrot.slane %v3806_v13, %v5383_v31 }
 0x3ac   :  { %1001 = vrot.lane.b32.xlu1 %v968_v16, %s4925_s3  ;;  %v3714_v18 = vpop.permute.xlu0 %3713  ;;  %v2684_v16 = vrot.slane %v2622_v6, %v5383_v31  ;;  %v7212_v6 = vld [vmem:[#allocation40_spill] sm:$0xff] }
 0x3ad   :  { %3751 = vst.msk [vmem:[#allocation2 + $0x6b] sm:$0x1] %vm395_vm2, %v3714_v18  ;;  %v2624_v18 = vcombine.high %v6555_v51, %v6555_v51  ;;  %v2769_v24 = vrot.slane %v2755_v62, %v5228_v30  ;;  %v7213_v62 = vld [vmem:[#allocation42_spill] sm:$0xff] }
 0x3ae   :  { %v3706_v60 = vpop.permute.xlu1 %3705  ;;  %2003 = vrot.lane.b32.xlu0 %v1968_v57, %s4926_s1  ;;  %v7203_v57 = vld [vmem:[#allocation33_spill] sm:$0xff] }
 0x3af   :  { %3747 = vst.msk [vmem:[#allocation2 + $0x5b] sm:$0x1] %vm395_vm2, %v3706_v60  ;;  %v3267_v42 = vcombine.high %v7203_v57, %v7203_v57  ;;  %v3196_v60 = vrot.slane %v3134_v41, %v5383_v31  ;;  %v2688_v51 = vrot.slane %v2624_v18, %v5383_v31  ;;  %v2785_v55 = vrot.slane %v2769_v24, %v5228_v30 }
 0x3b0   :  { %1513 = vrot.lane.b32.xlu1 %v1480_v15, %s4929_s16  ;;  %v2920_v44 = vpop.permute.xlu0 %2919  ;;  %v3626_v15 = vcombine.high %v3610_v38, %v3610_v38  ;;  %v2771_v36 = vcombine.high %v2769_v24, %v2769_v24 }
 0x3b1   :  { %2966 = vst.msk [vmem:[#allocation2 + $0xc5] sm:$0x1] %vm395_vm2, %v2920_v44 }
 0x3b2   :  { %v2708_v23 = vpop.permute.xlu1 %2707  ;;  %1003 = vrot.lane.b32.xlu0 %v972_v33, %s4925_s3  ;;  %v3136_v33 = vcombine.high %v6752_v8, %v6752_v8 }
 0x3b3   :  { %2746 = vst.msk [vmem:[#allocation2 + $0x65] sm:$0x1] %vm395_vm2, %v2708_v23 }
 0x3b4   :  { %2005 = vrot.lane.b32.xlu1 %v1972_v19, %s4926_s1  ;;  %v3432_v50 = vpop.permute.xlu0 %3431  ;;  %v3688_v19 = vrot.slane %v3626_v15, %v5383_v31  ;;  %v3200_v59 = vrot.slane %v3136_v33, %v5383_v31 }
 0x3b5   :  { %3478 = vst.msk [vmem:[#allocation2 + $0xc6] sm:$0x1] %vm395_vm2, %v3432_v50  ;;  %v3281_v50 = vrot.slane %v3267_v42, %v5228_v30  ;;  %v4723_v42 = vld [vmem:[#allocation2 + $0x20] sm:$0xff]  }
 0x3b6   :  { %v3220_v56 = vpop.permute.xlu1 %3219  ;;  %1515 = vrot.lane.b32.xlu0 %v1484_v39, %s4929_s16 }
 0x3b7   :  { %3258 = vst.msk [vmem:[#allocation2 + $0x66] sm:$0x1] %vm395_vm2, %v3220_v56  ;;  %v3297_v63 = vrot.slane %v3281_v50, %v5228_v30 }
 0x3b8   :  { %2921 = vrot.lane.b32.xlu1 %v2864_v40, %s4925_s3  ;;  %v3924_v7 = vpop.permute.xlu0 %3923  ;;  %v2872_v40 = vrot.slane %v2785_v55, %v5383_v31 }
 0x3b9   :  { %3970 = vst.msk [vmem:[#allocation2 + $0xc7] sm:$0x1] %vm395_vm2, %v3924_v7  ;;  %v3773_v7 = vrot.slane %v3759_v34, %v5228_v30  ;;  %v3313_v18 = vcombine.high %v3297_v63, %v3297_v63 }
 0x3ba   :  { %v3712_v22 = vpop.permute.xlu1 %3711  ;;  %2007 = vrot.lane.b32.xlu0 %v1976_v48, %s4926_s1  ;;  %v7205_v48 = vld [vmem:[#allocation17_spill] sm:$0xff] }
 0x3bb   :  { %3750 = vst.msk [vmem:[#allocation2 + $0x67] sm:$0x1] %vm395_vm2, %v3712_v22  ;;  %v3508_v61 = vadd.f32 %v7206_v2, %v7205_v48  ;;  %v7208_v22 = vld [vmem:[#allocation36_spill] sm:$0xff]  ;;  %v3392_v27 = vrot.slane %v3313_v18, %v5383_v31 }
 0x3bc   :  { %3225 = vrot.lane.b32.xlu1 %v3188_v3, %s4929_s16  ;;  %v760_v14 = vpop.permute.xlu0 %759  ;;  %v2996_v3 = vadd.f32 %v7208_v22, %v7207_v47 }
 0x3bd   :  { %800 = vst.msk [vmem:[#allocation2 + $0x1d] sm:$0x1] %vm395_vm2, %v760_v14  ;;  %v2799_v14 = vrot.slane %v2771_v36, %v5228_v30  ;;  %v3512_v38 = vadd.f32 %v3508_v61, %v7208_v22 }
 0x3be   :  { %v2714_v21 = vpop.permute.xlu1 %2713  ;;  %2923 = vrot.lane.b32.xlu0 %v2868_v28, %s4925_s3  ;;  %v3283_v28 = vcombine.high %v3281_v50, %v3281_v50 }
 0x3bf   :  { %2749 = vst.msk [vmem:[#allocation2 + $0x71] sm:$0x1] %vm395_vm2, %v2714_v21  ;;  %v3384_v21 = vrot.slane %v3297_v63, %v5383_v31  ;;  %v2876_v12 = vrot.slane %v2799_v14, %v5383_v31  ;;  %v2803_v15 = vcombine.high %v2799_v14, %v2799_v14 }
 0x3c0   :  { %3433 = vrot.lane.b32.xlu1 %v3376_v52, %s4929_s16  ;;  %v768_v46 = vpop.permute.xlu0 %767  ;;  %v3789_v52 = vrot.slane %v3773_v7, %v5228_v30 }
 0x3c1   :  { %804 = vst.msk [vmem:[#allocation2 + $0x2d] sm:$0x1] %vm395_vm2, %v768_v46  ;;  %v7209_v46 = vld [vmem:[#allocation38_spill] sm:$0xff] }
 0x3c2   :  { %v774_v11 = vpop.permute.xlu1 %773  ;;  %3227 = vrot.lane.b32.xlu0 %v3192_v17, %s4929_s16  ;;  %v3012_v17 = vadd.f32 %v7209_v46, %v2996_v3  ;;  %v3876_v10 = vrot.slane %v3789_v52, %v5383_v31 }
 0x3c3   :  { %807 = vst.msk [vmem:[#allocation2 + $0x39] sm:$0x1] %vm395_vm2, %v774_v11  ;;  %v3311_v11 = vrot.slane %v3283_v28, %v5228_v30 }
 0x3c4   :  { %3717 = vrot.lane.b32.xlu1 %v3680_v45, %s4926_s1  ;;  %v772_v53 = vpop.permute.xlu0 %771  ;;  %v3775_v45 = vcombine.high %v3773_v7, %v3773_v7 }
 0x3c5   :  { %806 = vst.msk [vmem:[#allocation2 + $0x35] sm:$0x1] %vm395_vm2, %v772_v53  ;;  %v2508_v53 = vadd.f32 %v7211_v43, %v7210_v4  ;;  %v3388_v13 = vrot.slane %v3311_v11, %v5383_v31  ;;  %v3315_v50 = vcombine.high %v3311_v11, %v3311_v11 }
 0x3c6   :  { %v986_v35 = vpop.permute.xlu1 %985  ;;  %3435 = vrot.lane.b32.xlu0 %v3380_v5, %s4929_s16  ;;  %v3803_v26 = vrot.slane %v3775_v45, %v5228_v30 }
 0x3c7   :  { %1027 = vst.msk [vmem:[#allocation2 + $0x99] sm:$0x1] %vm395_vm2, %v986_v35  ;;  %v2801_v35 = vcombine.high %v2785_v55, %v2785_v55  ;;  %v2884_v55 = vrot.slane %v2803_v15, %v5383_v31  ;;  %v3396_v63 = vrot.slane %v3315_v50, %v5383_v31 }
 0x3c8   :  { %3925 = vrot.lane.b32.xlu1 %v3868_v32, %s4926_s1  ;;  %v980_v49 = vpop.permute.xlu0 %979  ;;  %v3516_v32 = vadd.f32 %v3512_v38, %v7209_v46  ;;  %v3807_v7 = vcombine.high %v3803_v26, %v3803_v26 }
 0x3c9   :  { %1024 = vst.msk [vmem:[#allocation2 + $0x8d] sm:$0x1] %vm395_vm2, %v980_v49  ;;  %v3028_v49 = vadd.f32 %v7212_v6, %v3012_v17 }
 0x3ca   :  { %v994_v1 = vpop.permute.xlu1 %993  ;;  %3719 = vrot.lane.b32.xlu0 %v3684_v29, %s4926_s1  ;;  %v3520_v57 = vadd.f32 %v3516_v32, %v7212_v6 }
 0x3cb   :  { %1031 = vst.msk [vmem:[#allocation2 + $0xa9] sm:$0x1] %vm395_vm2, %v994_v1  ;;  %v6852_v1 = vadd.f32 %v7213_v62, %v2508_v53 }
 0x3cc   :  { %2717 = vrot.lane.b32.xlu1 %v2684_v16, %s4925_s3  ;;  %v984_v9 = vpop.permute.xlu0 %983  ;;  %v3032_v16 = vadd.f32 %v3028_v49, %v7211_v43  ;;  %v3524_v24 = vadd.f32 %v3520_v57, %v7211_v43 }
 0x3cd   :  { %1026 = vst.msk [vmem:[#allocation2 + $0x95] sm:$0x1] %vm395_vm2, %v984_v9  ;;  %v2880_v9 = vrot.slane %v2801_v35, %v5383_v31 }
 0x3ce   :  { %v998_v20 = vpop.permute.xlu1 %997  ;;  %3927 = vrot.lane.b32.xlu0 %v3872_v37, %s4926_s1 }
 0x3cf   :  { %1033 = vst.msk [vmem:[#allocation2 + $0xb1] sm:$0x1] %vm395_vm2, %v998_v20 }
 0x3d0   :  { %3229 = vrot.lane.b32.xlu1 %v3196_v60, %s4929_s16  ;;  %v992_v44 = vpop.permute.xlu0 %991  ;;  %v3880_v60 = vrot.slane %v3803_v26, %v5383_v31 }
 0x3d1   :  { %1030 = vst.msk [vmem:[#allocation2 + $0xa5] sm:$0x1] %vm395_vm2, %v992_v44  ;;  %v2811_v44 = vrot.slane %v6852_v1, %v5228_v30 }
 0x3d2   :  { %v1280_v23 = vpop.permute.xlu1 %1279  ;;  %2719 = vrot.lane.b32.xlu0 %v2688_v51, %s4925_s3  ;;  %v6868_v51 = vadd.f32 %v3032_v16, %v7213_v62 }
 0x3d3   :  { %1316 = vst.msk [vmem:[#allocation2 + $0x2e] sm:$0x1] %vm395_vm2, %v1280_v23  ;;  %v3805_v23 = vcombine.high %v3789_v52, %v3789_v52  ;;  %v2819_v48 = vcombine.high %v2811_v44, %v2811_v44 }
 0x3d4   :  { %3721 = vrot.lane.b32.xlu1 %v3688_v19, %s4926_s1  ;;  %v1272_v39 = vpop.permute.xlu0 %1271  ;;  %v3316_v26 = vcombine.high %v6868_v51, %v6868_v51 }
 0x3d5   :  { %1312 = vst.msk [vmem:[#allocation2 + $0x1e] sm:$0x1] %vm395_vm2, %v1272_v39  ;;  %v3323_v39 = vrot.slane %v6868_v51, %v5228_v30  ;;  %v3884_v36 = vrot.slane %v3805_v23, %v5383_v31  ;;  %v2841_v14 = vrot.slane %v2819_v48, %v5228_v30 }
 0x3d6   :  { %v1284_v56 = vpop.permute.xlu1 %1283  ;;  %3231 = vrot.lane.b32.xlu0 %v3200_v59, %s4929_s16  ;;  %v6880_v59 = vadd.f32 %v3524_v24, %v7213_v62  ;;  %v3330_v24 = vrot.slane %v3316_v26, %v5228_v30 }
 0x3d7   :  { %1318 = vst.msk [vmem:[#allocation2 + $0x36] sm:$0x1] %vm395_vm2, %v1284_v56  ;;  %v2827_v56 = vrot.slane %v2811_v44, %v5228_v30  ;;  %v3339_v3 = vrot.slane %v3323_v39, %v5228_v30  ;;  %v3331_v28 = vcombine.high %v3323_v39, %v3323_v39  ;;  %v2892_v17 = vrot.slane %v2841_v14, %v5383_v31 }
 0x3d8   :  { %2925 = vrot.lane.b32.xlu1 %v2872_v40, %s4925_s3  ;;  %v1286_v0 = vpop.permute.xlu0 %1285  ;;  %v3815_v2 = vrot.slane %v6880_v59, %v5228_v30 }
 0x3d9   :  { %1319 = vst.msk [vmem:[#allocation2 + $0x3a] sm:$0x1] %vm395_vm2, %v1286_v0  ;;  %v2888_v47 = vrot.slane %v2827_v56, %v5383_v31  ;;  %v2849_v4 = vcombine.high %v2827_v56, %v2827_v56  ;;  %v3361_v6 = vcombine.high %v3339_v3, %v3339_v3 }
 0x3da   :  { %v1764_v8 = vpop.permute.xlu1 %1763  ;;  %3723 = vrot.lane.b32.xlu0 %v3692_v54, %s4926_s1  ;;  %v3888_v54 = vrot.slane %v3807_v7, %v5383_v31  ;;  %v3831_v38 = vrot.slane %v3815_v2, %v5228_v30 }
 0x3db   :  { %1804 = vst.msk [vmem:[#allocation2 + $0x1f] sm:$0x1] %vm395_vm2, %v1764_v8  ;;  %v2896_v32 = vrot.slane %v2849_v4, %v5383_v31 }
 0x3dc   :  { %3437 = vrot.lane.b32.xlu1 %v3384_v21, %s4929_s16  ;;  %v1504_v25 = vpop.permute.xlu0 %1503  ;;  %v3400_v21 = vrot.slane %v3339_v3, %v5383_v31  ;;  %v3892_v45 = vrot.slane %v3831_v38, %v5383_v31 }
 0x3dd   :  { %1542 = vst.msk [vmem:[#allocation2 + $0xa6] sm:$0x1] %vm395_vm2, %v1504_v25  ;;  %v3353_v25 = vrot.slane %v3331_v28, %v5228_v30  ;;  %v4729_v28 = vld [vmem:[#allocation2 + $0x40] sm:$0xff]  }
 0x3de   :  { %v1772_v5 = vpop.permute.xlu1 %1771  ;;  %2927 = vrot.lane.b32.xlu0 %v2876_v12, %s4925_s3  ;;  %v3823_v12 = vcombine.high %v3815_v2, %v3815_v2 }
 0x3df   :  { %1808 = vst.msk [vmem:[#allocation2 + $0x2f] sm:$0x1] %vm395_vm2, %v1772_v5  ;;  %v3404_v53 = vrot.slane %v3353_v25, %v5383_v31  ;;  %v3363_v57 = vcombine.high %v3353_v25, %v3353_v25  ;;  %v4731_v25 = vld [vmem:[#allocation2 + $0x50] sm:$0xff]  }
 0x3e0   :  { %3929 = vrot.lane.b32.xlu1 %v3876_v10, %s4926_s1  ;;  %v1996_v29 = vpop.permute.xlu0 %1995  ;;  %v3845_v5 = vrot.slane %v3823_v12, %v5228_v30  ;;  %v2804_v10 = vcombine.high %v6852_v1, %v6852_v1  ;;  %v3408_v1 = vrot.slane %v3361_v6, %v5383_v31 }
 0x3e1   :  { %2034 = vst.msk [vmem:[#allocation2 + $0xa7] sm:$0x1] %vm395_vm2, %v1996_v29  ;;  %v3412_v51 = vrot.slane %v3363_v57, %v5383_v31 }
 0x3e2   :  { %v1492_v41 = vpop.permute.xlu1 %1491  ;;  %v4722_v37 = vld [vmem:[#allocation2 + $0x18] sm:$0xff]   ;;  %3439 = vrot.lane.b32.xlu0 %v3388_v13, %s4929_s16  ;;  %v3896_v29 = vrot.slane %v3845_v5, %v5383_v31  ;;  %v2851_v13 = vcombine.high %v2841_v14, %v2841_v14 }
 0x3e3   :  { %1536 = vst.msk [vmem:[#allocation2 + $0x8e] sm:$0x1] %vm395_vm2, %v1492_v41  ;;  %4648 = vmatmul.mubr.msk.f32.gmra.mrb[6].mxu0 %vm4147_vm3, %v4722_v37  ;;  %v3853_v41 = vcombine.high %v3831_v38, %v3831_v38 }
 0x3e4   :  { %2929 = vrot.lane.b32.xlu1 %v2880_v9, %s4925_s3  ;;  %v2704_v20 = vpop.permute.xlu0 %2703  ;;  %4650 = vmatprep.mubr.msk.f32.mxu0 %vm4147_vm3, %v4723_v42  ;;  %v2818_v9 = vrot.slane %v2804_v10, %v5228_v30  ;;  %v2900_v18 = vrot.slane %v2851_v13, %v5383_v31  ;;  %v3808_v42 = vcombine.high %v6880_v59, %v6880_v59 }
 0x3e5   :  { %2744 = vst.msk [vmem:[#allocation2 + $0x5d] sm:$0x1] %vm395_vm2, %v2704_v20 }
 0x3e6   :  { %v1776_v33 = vpop.permute.xlu1 %1775  ;;  %v4724_v34 = vld [vmem:[#allocation2 + $0x28] sm:$0xff]   ;;  %3931 = vrot.lane.b32.xlu0 %v3880_v60, %s4926_s1  ;;  %v3900_v60 = vrot.slane %v3853_v41, %v5383_v31  ;;  %v2834_v15 = vrot.slane %v2818_v9, %v5228_v30 }
 0x3e7   :  { %1810 = vst.msk [vmem:[#allocation2 + $0x37] sm:$0x1] %vm395_vm2, %v1776_v33  ;;  %4651 = vmatmul.mubr.msk.f32.gmra.mrb[8].mxu0 %vm4147_vm3, %v4724_v34  ;;  %v3855_v33 = vcombine.high %v3845_v5, %v3845_v5 }
 0x3e8   :  { %3441 = vrot.lane.b32.xlu1 %v3392_v27, %s4929_s16  ;;  %v3216_v19 = vpop.permute.xlu0 %3215  ;;  %v2820_v27 = vcombine.high %v2818_v9, %v2818_v9  ;;  %v2904_v23 = vrot.slane %v2834_v15, %v5383_v31 }
 0x3e9   :  { %3256 = vst.msk [vmem:[#allocation2 + $0x5e] sm:$0x1] %vm395_vm2, %v3216_v19  ;;  %v3346_v19 = vrot.slane %v3330_v24, %v5228_v30  ;;  %v3904_v39 = vrot.slane %v3855_v33, %v5383_v31 }
 0x3ea   :  { %v1984_v58 = vpop.permute.xlu1 %1983  ;;  %2931 = vrot.lane.b32.xlu0 %v2884_v55, %s4925_s3  ;;  %v3822_v55 = vrot.slane %v3808_v42, %v5228_v30  ;;  %v2848_v59 = vrot.slane %v2820_v27, %v5228_v30  ;;  %v4740_v27 = vld [vmem:[#allocation2 + $0xc0] sm:$0xff]  }
 0x3eb   :  { %2028 = vst.msk [vmem:[#allocation2 + $0x8f] sm:$0x1] %vm395_vm2, %v1984_v58  ;;  %v3332_v58 = vcombine.high %v3330_v24, %v3330_v24  ;;  %v3416_v56 = vrot.slane %v3346_v19, %v5383_v31 }
 0x3ec   :  { %3933 = vrot.lane.b32.xlu1 %v3884_v36, %s4926_s1  ;;  %v3708_v40 = vpop.permute.xlu0 %3707  ;;  %v2908_v7 = vrot.slane %v2848_v59, %v5383_v31  ;;  %v3824_v2 = vcombine.high %v3822_v55, %v3822_v55 }
 0x3ed   :  { %3748 = vst.msk [vmem:[#allocation2 + $0x5f] sm:$0x1] %vm395_vm2, %v3708_v40  ;;  %v3838_v40 = vrot.slane %v3822_v55, %v5228_v30  ;;  %v3360_v48 = vrot.slane %v3332_v58, %v5228_v30 }
 0x3ee   :  { %v1778_v61 = vpop.permute.xlu1 %1777  ;;  %v4725_v22 = vld [vmem:[#allocation2 + $0x30] sm:$0xff]   ;;  %3443 = vrot.lane.b32.xlu0 %v3396_v63, %s4929_s16  ;;  %v3852_v14 = vrot.slane %v3824_v2, %v5228_v30 }
 0x3ef   :  { %1811 = vst.msk [vmem:[#allocation2 + $0x3b] sm:$0x1] %vm395_vm2, %v1778_v61  ;;  %4653 = vmatprep.mubr.msk.f32.mxu0 %vm4147_vm3, %v4725_v22  ;;  %v2850_v22 = vcombine.high %v2834_v15, %v2834_v15  ;;  %v3364_v10 = vcombine.high %v3360_v48, %v3360_v48 }
 0x3f0   :  { %2933 = vrot.lane.b32.xlu1 %v2888_v47, %s4925_s3  ;;  %v2716_v0 = vpop.permute.xlu0 %2715  ;;  %v3908_v47 = vrot.slane %v3838_v40, %v5383_v31  ;;  %v3912_v30 = vrot.slane %v3852_v14, %v5383_v31  ;;  %v3856_v26 = vcombine.high %v3852_v14, %v3852_v14 }
 0x3f1   :  { %2750 = vst.msk [vmem:[#allocation2 + $0x75] sm:$0x1] %vm395_vm2, %v2716_v0  ;;  %v3420_v0 = vrot.slane %v3360_v48, %v5383_v31  ;;  %v3428_v13 = vrot.slane %v3364_v10, %v5383_v31 }
 0x3f2   :  { %v1496_v8 = vpop.permute.xlu1 %1495  ;;  %v4726_v52 = vld [vmem:[#allocation2 + $0x88] sm:$0xff]   ;;  %3935 = vrot.lane.b32.xlu0 %v3888_v54, %s4926_s1 }
 0x3f3   :  { %1538 = vst.msk [vmem:[#allocation2 + $0x96] sm:$0x1] %vm395_vm2, %v1496_v8  ;;  %4669 = vmatmul.mubr.msk.f32.vlgmr.msra.gmra.mrb[4].mxu1 %vm4147_vm3, %v4726_v52  ;;  %v3362_v52 = vcombine.high %v3346_v19, %v3346_v19 }
 0x3f4   :  { %3445 = vrot.lane.b32.xlu1 %v3400_v21, %s4929_s16  ;;  %v776_v46 = vpop.permute.xlu0 %775  ;;  %v2912_v21 = vrot.slane %v2850_v22, %v5383_v31 }
 0x3f5   :  { %808 = vst.msk [vmem:[#allocation2 + $0x3d] sm:$0x1] %vm395_vm2, %v776_v46  ;;  %v4730_v46 = vld [vmem:[#allocation2 + $0x48] sm:$0xff]  }
 0x3f6   :  { %v1988_v11 = vpop.permute.xlu1 %1987  ;;  %2935 = vrot.lane.b32.xlu0 %v2892_v17, %s4925_s3  ;;  %v2852_v17 = vcombine.high %v2848_v59, %v2848_v59 }
 0x3f7   :  { %2030 = vst.msk [vmem:[#allocation2 + $0x97] sm:$0x1] %vm395_vm2, %v1988_v11  ;;  %v3424_v11 = vrot.slane %v3362_v52, %v5383_v31 }
 0x3f8   :  { %3937 = vrot.lane.b32.xlu1 %v3892_v45, %s4926_s1  ;;  %v988_v43 = vpop.permute.xlu0 %987  ;;  %v3854_v45 = vcombine.high %v3838_v40, %v3838_v40 }
 0x3f9   :  { %1028 = vst.msk [vmem:[#allocation2 + $0x9d] sm:$0x1] %vm395_vm2, %v988_v43  ;;  %v2916_v43 = vrot.slane %v2852_v17, %v5383_v31 }
 0x3fa   :  { %v1498_v35 = vpop.permute.xlu1 %1497  ;;  %3447 = vrot.lane.b32.xlu0 %v3404_v53, %s4929_s16  ;;  %v4732_v53 = vld [vmem:[#allocation2 + $0x58] sm:$0xff]   ;;  %v3916_v6 = vrot.slane %v3854_v45, %v5383_v31 }
 0x3fb   :  { %1539 = vst.msk [vmem:[#allocation2 + $0x9a] sm:$0x1] %vm395_vm2, %v1498_v35  ;;  %v4734_v35 = vld [vmem:[#allocation2 + $0x60] sm:$0xff]  }
 0x3fc   :  { %2937 = vrot.lane.b32.xlu1 %v2896_v32, %s4925_s3  ;;  %v996_v49 = vpop.permute.xlu0 %995 }
 0x3fd   :  { %1032 = vst.msk [vmem:[#allocation2 + $0xad] sm:$0x1] %vm395_vm2, %v996_v49  ;;  %v4735_v49 = vld [vmem:[#allocation2 + $0xa0] sm:$0xff]  }
 0x3fe   :  { %v1990_v62 = vpop.permute.xlu1 %1989  ;;  %v4727_v16 = vld [vmem:[#allocation2 + $0x90] sm:$0xff]   ;;  %3939 = vrot.lane.b32.xlu0 %v3896_v29, %s4926_s1 }
 0x3ff   :  { %2031 = vst.msk [vmem:[#allocation2 + $0x9b] sm:$0x1] %vm395_vm2, %v1990_v62  ;;  %4671 = vmatprep.mubr.msk.f32.mxu1 %vm4147_vm3, %v4727_v16  ;;  %v3920_v16 = vrot.slane %v3856_v26, %v5383_v31 }
 0x400   :  { %3449 = vrot.lane.b32.xlu1 %v3408_v1, %s4929_s16  ;;  %v1000_v37 = vpop.permute.xlu0 %999 }
 0x401   :  { %1034 = vst.msk [vmem:[#allocation2 + $0xb5] sm:$0x1] %vm395_vm2, %v1000_v37 }
 0x402   :  { %v1506_v20 = vpop.permute.xlu1 %1505  ;;  %2939 = vrot.lane.b32.xlu0 %v2900_v18, %s4925_s3 }
 0x403   :  { %1543 = vst.msk [vmem:[#allocation2 + $0xaa] sm:$0x1] %vm395_vm2, %v1506_v20 }
 0x404   :  { %3941 = vrot.lane.b32.xlu1 %v3900_v60, %s4926_s1  ;;  %v1288_v44 = vpop.permute.xlu0 %1287 }
 0x405   :  { %1320 = vst.msk [vmem:[#allocation2 + $0x3e] sm:$0x1] %vm395_vm2, %v1288_v44 }
 0x406   :  { %v1998_v34 = vpop.permute.xlu1 %1997  ;;  %3451 = vrot.lane.b32.xlu0 %v3412_v51, %s4929_s16 }
 0x407   :  { %2035 = vst.msk [vmem:[#allocation2 + $0xab] sm:$0x1] %vm395_vm2, %v1998_v34 }
 0x408   :  { %2941 = vrot.lane.b32.xlu1 %v2904_v23, %s4925_s3  ;;  %v1780_v50 = vpop.permute.xlu0 %1779 }
 0x409   :  { %1812 = vst.msk [vmem:[#allocation2 + $0x3f] sm:$0x1] %vm395_vm2, %v1780_v50 }
 0x40a   :  { %v1510_v36 = vpop.permute.xlu1 %1509  ;;  %3943 = vrot.lane.b32.xlu0 %v3904_v39, %s4926_s1 }
 0x40b   :  { %1545 = vst.msk [vmem:[#allocation2 + $0xb2] sm:$0x1] %vm395_vm2, %v1510_v36 }
 0x40c   :  { %3453 = vrot.lane.b32.xlu1 %v3416_v56, %s4929_s16  ;;  %v1500_v63 = vpop.permute.xlu0 %1499 }
 0x40d   :  { %1540 = vst.msk [vmem:[#allocation2 + $0x9e] sm:$0x1] %vm395_vm2, %v1500_v63 }
 0x40e   :  { %v2002_v61 = vpop.permute.xlu1 %2001  ;;  %2943 = vrot.lane.b32.xlu0 %v2908_v7, %s4925_s3 }
 0x40f   :  { %2037 = vst.msk [vmem:[#allocation2 + $0xb3] sm:$0x1] %vm395_vm2, %v2002_v61 }
 0x410   :  { %3945 = vrot.lane.b32.xlu1 %v3908_v47, %s4926_s1  ;;  %v1992_v3 = vpop.permute.xlu0 %1991  ;;  %v4728_v54 = vld [vmem:[#allocation2 + $0x38] sm:$0xff]  }
 0x411   :  { %2032 = vst.msk [vmem:[#allocation2 + $0x9f] sm:$0x1] %vm395_vm2, %v1992_v3  ;;  %4654 = vmatmul.mubr.msk.f32.gmra.mrb[10].mxu0 %vm4147_vm3, %v4728_v54 }
 0x412   :  { %v2712_v8 = vpop.permute.xlu1 %2711  ;;  %3455 = vrot.lane.b32.xlu0 %v3420_v0, %s4929_s16  ;;  %4656 = vmatprep.mubr.msk.f32.mxu0 %vm4147_vm3, %v4729_v28 }
 0x413   :  { %2748 = vst.msk [vmem:[#allocation2 + $0x6d] sm:$0x1] %vm395_vm2, %v2712_v8 }
 0x414   :  { %2945 = vrot.lane.b32.xlu1 %v2912_v21, %s4925_s3  ;;  %v1508_v38 = vpop.permute.xlu0 %1507 }
 0x415   :  { %1544 = vst.msk [vmem:[#allocation2 + $0xae] sm:$0x1] %vm395_vm2, %v1508_v38  ;;  %4657 = vmatmul.mubr.msk.f32.gmra.mrb[12].mxu0 %vm4147_vm3, %v4730_v46 }
 0x416   :  { %v3224_v12 = vpop.permute.xlu1 %3223  ;;  %3947 = vrot.lane.b32.xlu0 %v3912_v30, %s4926_s1  ;;  %4659 = vmatprep.mubr.msk.f32.mxu0 %vm4147_vm3, %v4731_v25 }
 0x417   :  { %3260 = vst.msk [vmem:[#allocation2 + $0x6e] sm:$0x1] %vm395_vm2, %v3224_v12 }
 0x418   :  { %3457 = vrot.lane.b32.xlu1 %v3424_v11, %s4929_s16  ;;  %v2000_v4 = vpop.permute.xlu0 %1999  ;;  %v4733_v5 = vld [vmem:[#allocation2 + $0x98] sm:$0xff]  }
 0x419   :  { %2036 = vst.msk [vmem:[#allocation2 + $0xaf] sm:$0x1] %vm395_vm2, %v2000_v4  ;;  %4660 = vmatmul.mubr.msk.f32.gmra.mrb[14].mxu0 %vm4147_vm3, %v4732_v53  ;;  %4672 = vmatmul.mubr.msk.f32.gmra.mrb[6].mxu1 %vm4147_vm3, %v4733_v5 }
 0x41a   :  { %v3716_v32 = vpop.permute.xlu1 %3715  ;;  %2947 = vrot.lane.b32.xlu0 %v2916_v43, %s4925_s3  ;;  %4662 = vmatprep.mubr.msk.f32.mxu0 %vm4147_vm3, %v4734_v35 }
 0x41b   :  { %3752 = vst.msk [vmem:[#allocation2 + $0x6f] sm:$0x1] %vm395_vm2, %v3716_v32  ;;  %4674 = vmatprep.mubr.msk.f32.mxu1 %vm4147_vm3, %v4735_v49 }
 0x41c   :  { %3949 = vrot.lane.b32.xlu1 %v3916_v6, %s4926_s1  ;;  %v1512_v29 = vpop.permute.xlu0 %1511 }
 0x41d   :  { %1546 = vst.msk [vmem:[#allocation2 + $0xb6] sm:$0x1] %vm395_vm2, %v1512_v29 }
 0x41e   :  { %v1002_v62 = vpop.permute.xlu1 %1001  ;;  %3459 = vrot.lane.b32.xlu0 %v3428_v13, %s4929_s16 }
 0x41f   :  { %1035 = vst.msk [vmem:[#allocation2 + $0xb9] sm:$0x1] %vm395_vm2, %v1002_v62 }
 0x420   :  { %v2004_v1 = vpop.permute.xlu0 %2003  ;;  %v4737_v41 = vld [vmem:[#allocation2 + $0xa8] sm:$0xff]  }
 0x421   :  { %2038 = vst.msk [vmem:[#allocation2 + $0xb7] sm:$0x1] %vm395_vm2, %v2004_v1  ;;  %4675 = vmatmul.mubr.msk.f32.gmra.mrb[8].mxu1 %vm4147_vm3, %v4737_v41 }
 0x422   :  { %v1514_v9 = vpop.permute.xlu1 %1513  ;;  %v4736_v37 = vld [vmem:[#allocation2 + $0x68] sm:$0xff]   ;;  %3951 = vrot.lane.b32.xlu0 %v3920_v16, %s4926_s1 }
 0x423   :  { %1547 = vst.msk [vmem:[#allocation2 + $0xba] sm:$0x1] %vm395_vm2, %v1514_v9  ;;  %4663 = vmatmul.mubr.msk.f32.gmra.mrb[16].mxu0 %vm4147_vm3, %v4736_v37 }
 0x424   :  { %v1004_v18 = vpop.permute.xlu0 %1003 }
 0x425   :  { %1036 = vst.msk [vmem:[#allocation2 + $0xbd] sm:$0x1] %vm395_vm2, %v1004_v18 }
 0x426   :  { %v2006_v57 = vpop.permute.xlu1 %2005 }
 0x427   :  { %2039 = vst.msk [vmem:[#allocation2 + $0xbb] sm:$0x1] %vm395_vm2, %v2006_v57 }
 0x428   :  { %v1516_v31 = vpop.permute.xlu0 %1515  ;;  %v4738_v42 = vld [vmem:[#allocation2 + $0xb0] sm:$0xff]  }
 0x429   :  { %1548 = vst.msk [vmem:[#allocation2 + $0xbe] sm:$0x1] %vm395_vm2, %v1516_v31  ;;  %4677 = vmatprep.mubr.msk.f32.mxu1 %vm4147_vm3, %v4738_v42 }
 0x42a   :  { %v2922_v20 = vpop.permute.xlu1 %2921 }
 0x42b   :  { %2967 = vst.msk [vmem:[#allocation2 + $0xc9] sm:$0x1] %vm395_vm2, %v2922_v20 }
 0x42c   :  { %v2008_v60 = vpop.permute.xlu0 %2007 }
 0x42d   :  { %2040 = vst.msk [vmem:[#allocation2 + $0xbf] sm:$0x1] %vm395_vm2, %v2008_v60 }
 0x42e   :  { %v3226_v15 = vpop.permute.xlu1 %3225 }
 0x42f   :  { %3261 = vst.msk [vmem:[#allocation2 + $0x72] sm:$0x1] %vm395_vm2, %v3226_v15 }
 0x430   :  { %v2924_v24 = vpop.permute.xlu0 %2923 }
 0x431   :  { %2968 = vst.msk [vmem:[#allocation2 + $0xcd] sm:$0x1] %vm395_vm2, %v2924_v24 }
 0x432   :  { %v3434_v44 = vpop.permute.xlu1 %3433 }
 0x433   :  { %3479 = vst.msk [vmem:[#allocation2 + $0xca] sm:$0x1] %vm395_vm2, %v3434_v44 }
 0x434   :  { %v3228_v51 = vpop.permute.xlu0 %3227  ;;  %v4739_v33 = vld [vmem:[#allocation2 + $0xb8] sm:$0xff]  }
 0x435   :  { %3262 = vst.msk [vmem:[#allocation2 + $0x76] sm:$0x1] %vm395_vm2, %v3228_v51  ;;  %4678 = vmatmul.mubr.msk.f32.gmra.mrb[10].mxu1 %vm4147_vm3, %v4739_v33 }
 0x436   :  { %v3718_v34 = vpop.permute.xlu1 %3717  ;;  %4680 = vmatprep.mubr.msk.f32.mxu1 %vm4147_vm3, %v4740_v27 }
 0x437   :  { %3753 = vst.msk [vmem:[#allocation2 + $0x73] sm:$0x1] %vm395_vm2, %v3718_v34 }
 0x438   :  { %v3436_v23 = vpop.permute.xlu0 %3435 }
 0x439   :  { %3480 = vst.msk [vmem:[#allocation2 + $0xce] sm:$0x1] %vm395_vm2, %v3436_v23 }
 0x43a   :  { %v3926_v19 = vpop.permute.xlu1 %3925 }
 0x43b   :  { %3971 = vst.msk [vmem:[#allocation2 + $0xcb] sm:$0x1] %vm395_vm2, %v3926_v19 }
 0x43c   :  { %v3720_v55 = vpop.permute.xlu0 %3719 }
 0x43d   :  { %3754 = vst.msk [vmem:[#allocation2 + $0x77] sm:$0x1] %vm395_vm2, %v3720_v55 }
 0x43e   :  { %v2718_v50 = vpop.permute.xlu1 %2717 }
 0x43f   :  { %2751 = vst.msk [vmem:[#allocation2 + $0x79] sm:$0x1] %vm395_vm2, %v2718_v50 }
 0x440   :  { %v3928_v39 = vpop.permute.xlu0 %3927 }
 0x441   :  { %3972 = vst.msk [vmem:[#allocation2 + $0xcf] sm:$0x1] %vm395_vm2, %v3928_v39 }
 0x442   :  { %v3230_v59 = vpop.permute.xlu1 %3229 }
 0x443   :  { %3263 = vst.msk [vmem:[#allocation2 + $0x7a] sm:$0x1] %vm395_vm2, %v3230_v59 }
 0x444   :  { %v2720_v58 = vpop.permute.xlu0 %2719  ;;  %v4741_v36 = vld [vmem:[#allocation2 + $0x70] sm:$0xff]  }
 0x445   :  { %2752 = vst.msk [vmem:[#allocation2 + $0x7d] sm:$0x1] %vm395_vm2, %v2720_v58  ;;  %4665 = vmatprep.mubr.msk.f32.mxu0 %vm4147_vm3, %v4741_v36 }
 0x446   :  { %v3722_v56 = vpop.permute.xlu1 %3721 }
 0x447   :  { %3755 = vst.msk [vmem:[#allocation2 + $0x7b] sm:$0x1] %vm395_vm2, %v3722_v56 }
 0x448   :  { %v3232_v40 = vpop.permute.xlu0 %3231  ;;  %v4742_v63 = vld [vmem:[#allocation2 + $0xc8] sm:$0xff]  }
 0x449   :  { %3264 = vst.msk [vmem:[#allocation2 + $0x7e] sm:$0x1] %vm395_vm2, %v3232_v40  ;;  %4681 = vmatmul.mubr.msk.f32.gmra.mrb[12].mxu1 %vm4147_vm3, %v4742_v63 }
 0x44a   :  { %v2926_v7 = vpop.permute.xlu1 %2925 }
 0x44b   :  { %2969 = vst.msk [vmem:[#allocation2 + $0xd1] sm:$0x1] %vm395_vm2, %v2926_v7 }
 0x44c   :  { %v3724_v48 = vpop.permute.xlu0 %3723 }
 0x44d   :  { %3756 = vst.msk [vmem:[#allocation2 + $0x7f] sm:$0x1] %vm395_vm2, %v3724_v48 }
 0x44e   :  { %v3438_v2 = vpop.permute.xlu1 %3437 }
 0x44f   :  { %3481 = vst.msk [vmem:[#allocation2 + $0xd2] sm:$0x1] %vm395_vm2, %v3438_v2 }
 0x450   :  { %v2928_v61 = vpop.permute.xlu0 %2927 }
 0x451   :  { %2970 = vst.msk [vmem:[#allocation2 + $0xd5] sm:$0x1] %vm395_vm2, %v2928_v61 }
 0x452   :  { %v3930_v47 = vpop.permute.xlu1 %3929 }
 0x453   :  { %3973 = vst.msk [vmem:[#allocation2 + $0xd3] sm:$0x1] %vm395_vm2, %v3930_v47 }
 0x454   :  { %v3440_v22 = vpop.permute.xlu0 %3439  ;;  %v4743_v3 = vld [vmem:[#allocation2 + $0x78] sm:$0xff]  }
 0x455   :  { %3482 = vst.msk [vmem:[#allocation2 + $0xd6] sm:$0x1] %vm395_vm2, %v3440_v22  ;;  %4666 = vmatmul.mubr.msk.f32.gmra.mrb[18].mxu0 %vm4147_vm3, %v4743_v3 }
 0x456   :  { %v2930_v0 = vpop.permute.xlu1 %2929 }
 0x457   :  { %2971 = vst.msk [vmem:[#allocation2 + $0xd9] sm:$0x1] %vm395_vm2, %v2930_v0 }
 0x458   :  { %v3932_v54 = vpop.permute.xlu0 %3931 }
 0x459   :  { %3974 = vst.msk [vmem:[#allocation2 + $0xd7] sm:$0x1] %vm395_vm2, %v3932_v54 }
 0x45a   :  { %v3442_v14 = vpop.permute.xlu1 %3441  ;;  %v7036_v28 = vpop.f32.mrb[4].mxu0 }
 0x45b   :  { %3483 = vst.msk [vmem:[#allocation2 + $0xda] sm:$0x1] %vm395_vm2, %v3442_v14  ;;  %v7038_v8 = vpop.f32.mrb[5].mxu0  ;;  %4766 = vrcp.f32 %v7036_v28 }
 0x45c   :  { %v2932_v21 = vpop.permute.xlu0 %2931  ;;  %4768 = vrcp.f32 %v7038_v8 }
 0x45d   :  { %2972 = vst.msk [vmem:[#allocation2 + $0xdd] sm:$0x1] %vm395_vm2, %v2932_v21 }
 0x45e   :  { %v3934_v52 = vpop.permute.xlu1 %3933 }
 0x45f   :  { %3975 = vst.msk [vmem:[#allocation2 + $0xdb] sm:$0x1] %vm395_vm2, %v3934_v52 }
 0x460   :  { %v3444_v38 = vpop.permute.xlu0 %3443  ;;  %v4744_v30 = vld [vmem:[#allocation2 + $0xd0] sm:$0xff]  }
 0x461   :  { %3484 = vst.msk [vmem:[#allocation2 + $0xde] sm:$0x1] %vm395_vm2, %v3444_v38  ;;  %4683 = vmatprep.mubr.msk.f32.mxu1 %vm4147_vm3, %v4744_v30 }
 0x462   :  { %v2934_v46 = vpop.permute.xlu1 %2933 }
 0x463   :  { %2973 = vst.msk [vmem:[#allocation2 + $0xe1] sm:$0x1] %vm395_vm2, %v2934_v46 }
 0x464   :  { %v3936_v17 = vpop.permute.xlu0 %3935 }
 0x465   :  { %3976 = vst.msk [vmem:[#allocation2 + $0xdf] sm:$0x1] %vm395_vm2, %v3936_v17  ;;  %v4767_v33 = vpop.eup %4766 }
 0x466   :  { %v3446_v25 = vpop.permute.xlu1 %3445  ;;  %v4769_v34 = vpop.eup %4768 }
 0x467   :  { %3485 = vst.msk [vmem:[#allocation2 + $0xe2] sm:$0x1] %vm395_vm2, %v3446_v25 }
 0x468   :  { %v2936_v12 = vpop.permute.xlu0 %2935 }
 0x469   :  { %2974 = vst.msk [vmem:[#allocation2 + $0xe5] sm:$0x1] %vm395_vm2, %v2936_v12 }
 0x46a   :  { %v3938_v11 = vpop.permute.xlu1 %3937 }
 0x46b   :  { %3977 = vst.msk [vmem:[#allocation2 + $0xe3] sm:$0x1] %vm395_vm2, %v3938_v11 }
 0x46c   :  { %v3448_v45 = vpop.permute.xlu0 %3447  ;;  %v4745_v4 = vld [vmem:[#allocation2 + $0xd8] sm:$0xff]  }
 0x46d   :  { %3486 = vst.msk [vmem:[#allocation2 + $0xe6] sm:$0x1] %vm395_vm2, %v3448_v45  ;;  %4684 = vmatmul.mubr.msk.f32.gmra.mrb[14].mxu1 %vm4147_vm3, %v4745_v4 }
 0x46e   :  { %v2938_v43 = vpop.permute.xlu1 %2937 }
 0x46f   :  { %2975 = vst.msk [vmem:[#allocation2 + $0xe9] sm:$0x1] %vm395_vm2, %v2938_v43 }
 0x470   :  { %v3940_v53 = vpop.permute.xlu0 %3939 }
 0x471   :  { %3978 = vst.msk [vmem:[#allocation2 + $0xe7] sm:$0x1] %vm395_vm2, %v3940_v53 }
 0x472   :  { %v3450_v5 = vpop.permute.xlu1 %3449 }
 0x473   :  { %3487 = vst.msk [vmem:[#allocation2 + $0xea] sm:$0x1] %vm395_vm2, %v3450_v5 }
 0x474   :  { %v2940_v10 = vpop.permute.xlu0 %2939 }
 0x475   :  { %2976 = vst.msk [vmem:[#allocation2 + $0xed] sm:$0x1] %vm395_vm2, %v2940_v10 }
 0x476   :  { %v3942_v35 = vpop.permute.xlu1 %3941 }
 0x477   :  { %3979 = vst.msk [vmem:[#allocation2 + $0xeb] sm:$0x1] %vm395_vm2, %v3942_v35 }
 0x478   :  { %v3452_v32 = vpop.permute.xlu0 %3451  ;;  %v4746_v6 = vld [vmem:[#allocation2 + $0xe0] sm:$0xff]  }
 0x479   :  { %3488 = vst.msk [vmem:[#allocation2 + $0xee] sm:$0x1] %vm395_vm2, %v3452_v32  ;;  %4686 = vmatprep.mubr.msk.f32.mxu1 %vm4147_vm3, %v4746_v6 }
 0x47a   :  { %v2942_v49 = vpop.permute.xlu1 %2941 }
 0x47b   :  { %2977 = vst.msk [vmem:[#allocation2 + $0xf1] sm:$0x1] %vm395_vm2, %v2942_v49 }
 0x47c   :  { %v3944_v29 = vpop.permute.xlu0 %3943 }
 0x47d   :  { %3980 = vst.msk [vmem:[#allocation2 + $0xef] sm:$0x1] %vm395_vm2, %v3944_v29 }
 0x47e   :  { %v3454_v13 = vpop.permute.xlu1 %3453 }
 0x47f   :  { %3489 = vst.msk [vmem:[#allocation2 + $0xf2] sm:$0x1] %vm395_vm2, %v3454_v13 }
 0x480   :  { %v2944_v26 = vpop.permute.xlu0 %2943 }
 0x481   :  { %2978 = vst.msk [vmem:[#allocation2 + $0xf5] sm:$0x1] %vm395_vm2, %v2944_v26 }
 0x482   :  { %v3946_v62 = vpop.permute.xlu1 %3945 }
 0x483   :  { %3981 = vst.msk [vmem:[#allocation2 + $0xf3] sm:$0x1] %vm395_vm2, %v3946_v62 }
 0x484   :  { %v3456_v1 = vpop.permute.xlu0 %3455  ;;  %v4747_v16 = vld [vmem:[#allocation2 + $0xe8] sm:$0xff]  }
 0x485   :  { %3490 = vst.msk [vmem:[#allocation2 + $0xf6] sm:$0x1] %vm395_vm2, %v3456_v1  ;;  %4687 = vmatmul.mubr.msk.f32.gmra.mrb[16].mxu1 %vm4147_vm3, %v4747_v16 }
 0x486   :  { %v2946_v41 = vpop.permute.xlu1 %2945 }
 0x487   :  { %2979 = vst.msk [vmem:[#allocation2 + $0xf9] sm:$0x1] %vm395_vm2, %v2946_v41 }
 0x488   :  { %v3948_v9 = vpop.permute.xlu0 %3947 }
 0x489   :  { %3982 = vst.msk [vmem:[#allocation2 + $0xf7] sm:$0x1] %vm395_vm2, %v3948_v9 }
 0x48a   :  { %v3458_v37 = vpop.permute.xlu1 %3457 }
 0x48b   :  { %3491 = vst.msk [vmem:[#allocation2 + $0xfa] sm:$0x1] %vm395_vm2, %v3458_v37 }
 0x48c   :  { %v2948_v18 = vpop.permute.xlu0 %2947 }
 0x48d   :  { %2980 = vst.msk [vmem:[#allocation2 + $0xfd] sm:$0x1] %vm395_vm2, %v2948_v18 }
 0x48e   :  { %v3950_v57 = vpop.permute.xlu1 %3949 }
 0x48f   :  { %3983 = vst.msk [vmem:[#allocation2 + $0xfb] sm:$0x1] %vm395_vm2, %v3950_v57 }
 0x490   :  { %v3460_v31 = vpop.permute.xlu0 %3459  ;;  %v4748_v42 = vld [vmem:[#allocation2 + $0xf0] sm:$0xff]  }
 0x491   :  { %3492 = vst.msk [vmem:[#allocation2 + $0xfe] sm:$0x1] %vm395_vm2, %v3460_v31  ;;  %4689 = vmatprep.mubr.msk.f32.mxu1 %vm4147_vm3, %v4748_v42 }
 0x494   :  { %v3952_v20 = vpop.permute.xlu0 %3951 }
 0x495   :  { %3984 = vst.msk [vmem:[#allocation2 + $0xff] sm:$0x1] %vm395_vm2, %v3952_v20 }
 0x49c   :  { %v4749_v60 = vld [vmem:[#allocation2 + $0xf8] sm:$0xff]  }
 0x49d   :  { %4690 = vmatmul.mubr.msk.f32.gmra.mrb[18].mxu1 %vm4147_vm3, %v4749_v60 }
 0x4b6   :  { %v4649_v15 = vpop.f32.mrb[6].mxu0 }
 0x4b7   :  { %v4288_v24 = vpop.f32.mrb[7].mxu0  ;;  %4770 = vrcp.f32 %v4649_v15 }
 0x4b8   :  { %4772 = vrcp.f32 %v4288_v24 }
 0x4ba   :  { %v4652_v44 = vpop.f32.mrb[8].mxu0 }
 0x4bb   :  { %v4298_v51 = vpop.f32.mrb[9].mxu0  ;;  %4774 = vrcp.f32 %v4652_v44 }
 0x4bc   :  { %4776 = vrcp.f32 %v4298_v51 }
 0x4c1   :  { %v4771_v63 = vpop.eup %4770 }
 0x4c2   :  { %v4773_v2 = vpop.eup %4772 }
 0x4c5   :  { %v4775_v54 = vpop.eup %4774 }
 0x4c6   :  { %v4670_v27 = vpop.f32.mrb[4].mxu1  ;;  %v4777_v28 = vpop.eup %4776 }
 0x4c7   :  { %v4440_v23 = vmul.f32 %v4767_v33, %v4670_v27  ;;  %v4358_v19 = vpop.f32.mrb[5].mxu1 }
 0x4c8   :  { %v4438_v55 = vmul.f32 %v4769_v34, %v4358_v19 }
 0x4c9   :  { %v4486_v50 = vcombine.high %v4440_v23, %v4440_v23  ;;  %4520 = vst.msk [vmem:[#allocation11 + $0x8] sm:$0xf] %vm4517_vm4, %v4440_v23 }
 0x4ca   :  { %v4485_v39 = vcombine.high %v4438_v55, %v4438_v55  ;;  %4518 = vst.msk [vmem:[#allocation11] sm:$0xf] %vm4517_vm4, %v4438_v55 }
 0x4cb   :  { %4521 = vst.msk [vmem:[#allocation11 + $0xc] sm:$0xf] %vm4517_vm4, %v4486_v50 }
 0x4cc   :  { %4519 = vst.msk [vmem:[#allocation11 + $0x4] sm:$0xf] %vm4517_vm4, %v4485_v39 }
 0x4e4   :  { %v4655_v59 = vpop.f32.mrb[10].mxu0 }
 0x4e5   :  { %v4308_v58 = vpop.f32.mrb[11].mxu0  ;;  %4778 = vrcp.f32 %v4655_v59 }
 0x4e6   :  { %4780 = vrcp.f32 %v4308_v58 }
 0x4e8   :  { %v4658_v36 = vpop.f32.mrb[12].mxu0 }
 0x4e9   :  { %v4318_v56 = vpop.f32.mrb[13].mxu0  ;;  %4782 = vrcp.f32 %v4658_v36 }
 0x4ea   :  { %4784 = vrcp.f32 %v4318_v56 }
 0x4ec   :  { %v4661_v40 = vpop.f32.mrb[14].mxu0  ;;  %v4673_v7 = vpop.f32.mrb[6].mxu1 }
 0x4ed   :  { %v4328_v48 = vpop.f32.mrb[15].mxu0  ;;  %v4444_v61 = vmul.f32 %v4771_v63, %v4673_v7  ;;  %v4368_v47 = vpop.f32.mrb[7].mxu1  ;;  %4786 = vrcp.f32 %v4661_v40 }
 0x4ee   :  { %v4442_v22 = vmul.f32 %v4773_v2, %v4368_v47  ;;  %4788 = vrcp.f32 %v4328_v48 }
 0x4ef   :  { %v4488_v3 = vcombine.high %v4444_v61, %v4444_v61  ;;  %4524 = vst.msk [vmem:[#allocation11 + $0x18] sm:$0xf] %vm4517_vm4, %v4444_v61  ;;  %v4779_v25 = vpop.eup %4778 }
 0x4f0   :  { %v4487_v0 = vcombine.high %v4442_v22, %v4442_v22  ;;  %4522 = vst.msk [vmem:[#allocation11 + $0x10] sm:$0xf] %vm4517_vm4, %v4442_v22  ;;  %v4781_v11 = vpop.eup %4780 }
 0x4f1   :  { %4525 = vst.msk [vmem:[#allocation11 + $0x1c] sm:$0xf] %vm4517_vm4, %v4488_v3 }
 0x4f2   :  { %4523 = vst.msk [vmem:[#allocation11 + $0x14] sm:$0xf] %vm4517_vm4, %v4487_v0 }
 0x4f3   :  { %v4783_v10 = vpop.eup %4782 }
 0x4f4   :  { %v4676_v14 = vpop.f32.mrb[8].mxu1  ;;  %v4785_v32 = vpop.eup %4784 }
 0x4f5   :  { %v4448_v8 = vmul.f32 %v4775_v54, %v4676_v14  ;;  %v4378_v21 = vpop.f32.mrb[9].mxu1 }
 0x4f6   :  { %v4664_v52 = vpop.f32.mrb[16].mxu0  ;;  %v4446_v38 = vmul.f32 %v4777_v28, %v4378_v21 }
 0x4f7   :  { %v4338_v30 = vpop.f32.mrb[17].mxu0  ;;  %v4490_v46 = vcombine.high %v4448_v8, %v4448_v8  ;;  %4528 = vst.msk [vmem:[#allocation11 + $0x28] sm:$0xf] %vm4517_vm4, %v4448_v8  ;;  %v4787_v16 = vpop.eup %4786  ;;  %4790 = vrcp.f32 %v4664_v52 }
 0x4f8   :  { %v4489_v17 = vcombine.high %v4446_v38, %v4446_v38  ;;  %4526 = vst.msk [vmem:[#allocation11 + $0x20] sm:$0xf] %vm4517_vm4, %v4446_v38  ;;  %v4789_v9 = vpop.eup %4788  ;;  %4792 = vrcp.f32 %v4338_v30 }
 0x4f9   :  { %4529 = vst.msk [vmem:[#allocation11 + $0x2c] sm:$0xf] %vm4517_vm4, %v4490_v46 }
 0x4fa   :  { %4527 = vst.msk [vmem:[#allocation11 + $0x24] sm:$0xf] %vm4517_vm4, %v4489_v17 }
 0x501   :  { %v4791_v20 = vpop.eup %4790 }
 0x502   :  { %v4793_v15 = vpop.eup %4792 }
 0x508   :  { %v4679_v12 = vpop.f32.mrb[10].mxu1 }
 0x509   :  { %v4452_v45 = vmul.f32 %v4779_v25, %v4679_v12  ;;  %v4388_v4 = vpop.f32.mrb[11].mxu1 }
 0x50a   :  { %v4450_v43 = vmul.f32 %v4781_v11, %v4388_v4 }
 0x50b   :  { %v4492_v53 = vcombine.high %v4452_v45, %v4452_v45  ;;  %4532 = vst.msk [vmem:[#allocation11 + $0x38] sm:$0xf] %vm4517_vm4, %v4452_v45 }
 0x50c   :  { %v4491_v5 = vcombine.high %v4450_v43, %v4450_v43  ;;  %4530 = vst.msk [vmem:[#allocation11 + $0x30] sm:$0xf] %vm4517_vm4, %v4450_v43 }
 0x50d   :  { %4533 = vst.msk [vmem:[#allocation11 + $0x3c] sm:$0xf] %vm4517_vm4, %v4492_v53 }
 0x50e   :  { %4531 = vst.msk [vmem:[#allocation11 + $0x34] sm:$0xf] %vm4517_vm4, %v4491_v5 }
 0x51c   :  { %v4682_v35 = vpop.f32.mrb[12].mxu1 }
 0x51d   :  { %v4456_v6 = vmul.f32 %v4783_v10, %v4682_v35  ;;  %v4398_v49 = vpop.f32.mrb[13].mxu1 }
 0x51e   :  { %v4454_v29 = vmul.f32 %v4785_v32, %v4398_v49 }
 0x51f   :  { %v4494_v13 = vcombine.high %v4456_v6, %v4456_v6  ;;  %4536 = vst.msk [vmem:[#allocation11 + $0x48] sm:$0xf] %vm4517_vm4, %v4456_v6 }
 0x520   :  { %v4493_v26 = vcombine.high %v4454_v29, %v4454_v29  ;;  %4534 = vst.msk [vmem:[#allocation11 + $0x40] sm:$0xf] %vm4517_vm4, %v4454_v29 }
 0x521   :  { %4537 = vst.msk [vmem:[#allocation11 + $0x4c] sm:$0xf] %vm4517_vm4, %v4494_v13 }
 0x522   :  { %4535 = vst.msk [vmem:[#allocation11 + $0x44] sm:$0xf] %vm4517_vm4, %v4493_v26 }
 0x528   :  { %v4667_v62 = vpop.f32.mrb[18].mxu0 }
 0x529   :  { %v4348_v1 = vpop.f32.mrb[19].mxu0  ;;  %4794 = vrcp.f32 %v4667_v62 }
 0x52a   :  { %4796 = vrcp.f32 %v4348_v1 }
 0x533   :  { %v4795_v34 = vpop.eup %4794 }
 0x534   :  { %v4797_v19 = vpop.eup %4796 }
 0x540   :  { %v4685_v41 = vpop.f32.mrb[14].mxu1 }
 0x541   :  { %v4460_v37 = vmul.f32 %v4787_v16, %v4685_v41  ;;  %v4408_v18 = vpop.f32.mrb[15].mxu1 }
 0x542   :  { %v4458_v57 = vmul.f32 %v4789_v9, %v4408_v18 }
 0x543   :  { %v4496_v31 = vcombine.high %v4460_v37, %v4460_v37  ;;  %4540 = vst.msk [vmem:[#allocation11 + $0x58] sm:$0xf] %vm4517_vm4, %v4460_v37 }
 0x544   :  { %v4495_v42 = vcombine.high %v4458_v57, %v4458_v57  ;;  %4538 = vst.msk [vmem:[#allocation11 + $0x50] sm:$0xf] %vm4517_vm4, %v4458_v57 }
 0x545   :  { %4541 = vst.msk [vmem:[#allocation11 + $0x5c] sm:$0xf] %vm4517_vm4, %v4496_v31 }
 0x546   :  { %4539 = vst.msk [vmem:[#allocation11 + $0x54] sm:$0xf] %vm4517_vm4, %v4495_v42 }
 0x558   :  { %v4688_v60 = vpop.f32.mrb[16].mxu1 }
 0x559   :  { %v4464_v24 = vmul.f32 %v4791_v20, %v4688_v60  ;;  %v4418_v44 = vpop.f32.mrb[17].mxu1 }
 0x55a   :  { %v4462_v51 = vmul.f32 %v4793_v15, %v4418_v44 }
 0x55b   :  { %v4498_v33 = vcombine.high %v4464_v24, %v4464_v24  ;;  %4544 = vst.msk [vmem:[#allocation11 + $0x68] sm:$0xf] %vm4517_vm4, %v4464_v24 }
 0x55c   :  { %v4497_v27 = vcombine.high %v4462_v51, %v4462_v51  ;;  %4542 = vst.msk [vmem:[#allocation11 + $0x60] sm:$0xf] %vm4517_vm4, %v4462_v51 }
 0x55d   :  { %4545 = vst.msk [vmem:[#allocation11 + $0x6c] sm:$0xf] %vm4517_vm4, %v4498_v33 }
 0x55e   :  { %4543 = vst.msk [vmem:[#allocation11 + $0x64] sm:$0xf] %vm4517_vm4, %v4497_v27 }
 0x570   :  { %v4691_v23 = vpop.f32.mrb[18].mxu1 }
 0x571   :  { %v4468_v55 = vmul.f32 %v4795_v34, %v4691_v23  ;;  %v4428_v50 = vpop.f32.mrb[19].mxu1 }
 0x572   :  { %v4466_v39 = vmul.f32 %v4797_v19, %v4428_v50 }
 0x573   :  { %v4500_v59 = vcombine.high %v4468_v55, %v4468_v55  ;;  %4548 = vst.msk [vmem:[#allocation11 + $0x78] sm:$0xf] %vm4517_vm4, %v4468_v55 }
 0x574   :  { %v4499_v58 = vcombine.high %v4466_v39, %v4466_v39  ;;  %4546 = vst.msk [vmem:[#allocation11 + $0x70] sm:$0xf] %vm4517_vm4, %v4466_v39 }
 0x575   :  { %4549 = vst.msk [vmem:[#allocation11 + $0x7c] sm:$0xf] %vm4517_vm4, %v4500_v59 }
 0x576   :  { %4547 = vst.msk [vmem:[#allocation11 + $0x74] sm:$0xf] %vm4517_vm4, %v4499_v58 }
 0x577   :  { %4897 = shalt.err (!%p4894_p8)
}
 0x578   :  { %s4898_s22 = scalar_lea.hbm %s7127_s4, 2048 }
 0x579   :  { %p4899_p9 = scmp.ne.s32.totalorder %s7127_s4, %s4898_s22  ;;  %p4902_p10 = scmp.lt.u32.totalorder %s4898_s22, %s7127_s4 }
 0x57b   :  { %p4904_p11 = pnand %p4902_p10, %p4899_p9 }
 0x57d   :  { %4907 = shalt.err (!%p4904_p11)
}
 0x57e   :  { %4561 = dma.vmem_to_hbm [thread:$0]  %s4556_s18, 2048, %s7127_s4, [#allocation5], %s4917_s25, %s4917_s25, %s4918_s26  }
 0x57f   :  { %4914 = dma.done.wait [#allocation5], 2048  }
 0x580   :  { %4915 = vsyncadd [#allocation5], 4294965248 }
 0x581   :  { %4565 = vsyncpa [#allocation4], 1 }
 0x582   :  { %4566 = vsyncpa [#allocation7], 1 }
 0x583   :  { %4567 = vsyncpa [#allocation10], 1 }
 0x584   :  { %4568 = vsyncpa [#allocation5], 1 }

// kernel: local_attention_forward.5
= control target key start
LH: loop header
LB: loop body
LE: loop exit
PB: predicated region body
PF: predicated region fallthrough
CT: control target
= control target key end

     0   :  { %8 = vsyncpa [#allocation3], 0  ;;  %s438_s0 = inlined_call_operand.hbm [shape: bf16[16,144], index: 0, kind: input, shape index: {}]   ;;  %s439_s1 = inlined_call_operand.hbm [shape: f32[16,1], index: 1, kind: input, shape index: {}]   ;;  %s440_s2 = inlined_call_operand.hbm [shape: bf16[144,128], index: 2, kind: input, shape index: {}]   ;;  %s441_s3 = inlined_call_operand.hbm [shape: f32[16,128], index: 3, kind: output, shape index: {}]  }
   0x1   :  { %9 = vsyncpa [#allocation6], 0 }
   0x2   :  { %10 = vsyncpa [#allocation4], 0  ;;  %s345_s12 = smov [#allocation5]   ;;  %s346_s14 = smov [#allocation2]  }
   0x3   :  { %s28_s13 = sshll.u32 %s345_s12, 4  ;;  %s16_s15 = sshll.u32 %s346_s14, 4  ;;  %s29_s13 = int_to_ptr.vmem [resolvable:$true] %s28_s13  ;;  %s374_s15 = int_to_ptr.vmem [resolvable:$true] %s16_s15 }
   0x4   :  { %s251_s18 = scalar_lea.hbm %s439_s1, 256 }
   0x5   :  { %p252_p0 = scmp.ne.s32.totalorder %s439_s1, %s251_s18  ;;  %p255_p1 = scmp.lt.u32.totalorder %s251_s18, %s439_s1 }
   0x7   :  { %p257_p2 = pnand %p255_p1, %p252_p0 }
   0x9   :  { %260 = shalt.err (!%p257_p2)
}
   0xa   :  { %s261_s23 = scalar_lea.vmem %s29_s13, 256  ;;  %p266_p4 = scmp.lt.s32.totalorder %s29_s13, %s29_s13 }
   0xb   :  { %p262_p3 = scmp.ne.s32.totalorder %s29_s13, %s261_s23  ;;  %p267_p5 = scmp.lt.s32.totalorder %s261_s23, %s261_s23 }
   0xd   :  { %p268_p6 = por %p267_p5, %p266_p4 }
   0xf   :  { %p269_p7 = pnand %p268_p6, %p262_p3 }
  0x11   :  { %272 = shalt.err (!%p269_p7)
}
  0x12   :  { %s347_s24 = smov 128   ;;  %s348_s25 = smov 8  }
  0x13   :  { %34 = dma.hbm_to_vmem [thread:$0]  %s439_s1, 256, %s29_s13, [#allocation6], %s347_s24, %s347_s24, %s348_s25  }
  0x14   :  { %s273_s30 = scalar_lea.hbm %s438_s0, 256 }
  0x15   :  { %p274_p8 = scmp.ne.s32.totalorder %s438_s0, %s273_s30  ;;  %p277_p9 = scmp.lt.u32.totalorder %s273_s30, %s438_s0 }
  0x17   :  { %p279_p10 = pnand %p277_p9, %p274_p8 }
  0x19   :  { %282 = shalt.err (!%p279_p10)
}
  0x1a   :  { %s283_s8 = scalar_lea.vmem %s374_s15, 256  ;;  %p288_p12 = scmp.lt.s32.totalorder %s374_s15, %s374_s15 }
  0x1b   :  { %p284_p11 = scmp.ne.s32.totalorder %s374_s15, %s283_s8  ;;  %p289_p13 = scmp.lt.s32.totalorder %s283_s8, %s283_s8 }
  0x1d   :  { %p290_p0 = por %p289_p13, %p288_p12 }
  0x1f   :  { %p291_p1 = pnand %p290_p0, %p284_p11 }
  0x21   :  { %294 = shalt.err (!%p291_p1)
}
  0x22   :  { %22 = dma.hbm_to_vmem [thread:$0]  %s438_s0, 256, %s374_s15, [#allocation3], %s347_s24, %s347_s24, %s348_s25  }
  0x23   :  { %s349_s10 = smov [#allocation7]   ;;  %s295_s14 = scalar_lea.hbm %s440_s2, 1152 }
  0x24   :  { %s40_s11 = sshll.u32 %s349_s10, 4  ;;  %p296_p2 = scmp.ne.s32.totalorder %s440_s2, %s295_s14  ;;  %s41_s11 = int_to_ptr.vmem [resolvable:$true] %s40_s11 }
  0x25   :  { %p299_p3 = scmp.lt.u32.totalorder %s295_s14, %s440_s2 }
  0x27   :  { %p301_p4 = pnand %p299_p3, %p296_p2 }
  0x29   :  { %304 = shalt.err (!%p301_p4)
}
  0x2a   :  { %s305_s20 = scalar_lea.vmem %s41_s11, 1152  ;;  %p310_p6 = scmp.lt.s32.totalorder %s41_s11, %s41_s11 }
  0x2b   :  { %p306_p5 = scmp.ne.s32.totalorder %s41_s11, %s305_s20  ;;  %p311_p7 = scmp.lt.s32.totalorder %s305_s20, %s305_s20 }
  0x2d   :  { %p312_p8 = por %p311_p7, %p310_p6 }
  0x2f   :  { %p313_p9 = pnand %p312_p8, %p306_p5 }
  0x31   :  { %316 = shalt.err (!%p313_p9)
}
  0x32   :  { %s350_s0 = smov 64   ;;  %s351_s15 = smov 4  }
  0x33   :  { %46 = dma.hbm_to_vmem [thread:$0]  %s440_s2, 1152, %s41_s11, [#allocation6], %s350_s0, %s350_s0, %s351_s15  }
  0x34   :  { %339 = dma.done.wait [#allocation3], 256  }
  0x35   :  { %340 = vsyncadd [#allocation3], 4294967040 }
  0x36   :  { %341 = dma.done.wait [#allocation6], 1408  }
  0x37   :  { %342 = vsyncadd [#allocation6], 4294965888  ;;  %v352_v0 = vmov 0   ;;  %v239_v1 = vld [vmem:[#allocation7] sm:$0xff]   ;;  %v240_v2 = vld [vmem:[#allocation7 + $0x8] sm:$0xff]   ;;  %vm152_vm0 = vcmask 130048  }
  0x38   :  { %156 = vmatprep.subr.bf16.mxu0 %v352_v0  ;;  %238 = vset.pattern.permute.xlu0 %v352_v0  ;;  %v241_v3 = vld [vmem:[#allocation7 + $0x10] sm:$0xff]   ;;  %v242_v4 = vld [vmem:[#allocation7 + $0x18] sm:$0xff]   ;;  %v250_v5 = vld [vmem:[#allocation2 + $0x4] ss:$8 sps:$4 sm:$0xff]   ;;  %s353_s2 = smov [#allocation8]  }
  0x39   :  { %157 = vmatpush1.bf16.msra.mxu0 %v239_v1  ;;  %v77_v6 = vld [vmem:[#allocation5] sm:$0xff]  ;;  %228 = vmatprep.mubr.msk.bf16.mxu0 %vm152_vm0, %v250_v5  ;;  %v78_v7 = vld [vmem:[#allocation5 + $0x8] sm:$0xff]  ;;  %v243_v8 = vld [vmem:[#allocation7 + $0x20] sm:$0xff]   ;;  %s204_s23 = sshll.u32 %s353_s2, 4  ;;  %s205_s23 = int_to_ptr.vmem [resolvable:$true] %s204_s23 }
  0x3a   :  { %158 = vmatprep.subr.bf16.mxu0 %v352_v0  ;;  %81 = vperm.xlu0 %238, %v77_v6   ;;  %v244_v9 = vld [vmem:[#allocation7 + $0x28] sm:$0xff]   ;;  %v245_v10 = vld [vmem:[#allocation7 + $0x30] sm:$0xff]   ;;  %v246_v11 = vld [vmem:[#allocation7 + $0x38] sm:$0xff]   ;;  %s317_s26 = scalar_lea.vmem %s205_s23, 256  ;;  %p322_p11 = scmp.lt.s32.totalorder %s205_s23, %s205_s23 }
  0x3b   :  { %v247_v12 = vld [vmem:[#allocation7 + $0x40] sm:$0xff]   ;;  %p318_p10 = scmp.ne.s32.totalorder %s205_s23, %s317_s26  ;;  %p323_p12 = scmp.lt.s32.totalorder %s317_s26, %s317_s26 }
  0x3c   :  { %v248_v13 = vld [vmem:[#allocation2] ss:$8 sps:$4 sm:$0xff]  }
  0x3d   :  { %159 = vmatpush1.bf16.msra.mxu0 %v240_v2  ;;  %p324_p13 = por %p323_p12, %p322_p11 }
  0x3e   :  { %160 = vmatprep.subr.bf16.mxu0 %v352_v0  ;;  %86 = vperm.xlu0 %238, %v78_v7  }
  0x3f   :  { %p325_p0 = pnand %p324_p13, %p318_p10 }
  0x41   :  { %161 = vmatpush1.bf16.msra.mxu0 %v241_v3 }
  0x42   :  { %162 = vmatprep.subr.bf16.mxu0 %v352_v0 }
  0x45   :  { %163 = vmatpush1.bf16.msra.mxu0 %v242_v4 }
  0x46   :  { %164 = vmatprep.subr.bf16.mxu0 %v352_v0 }
  0x49   :  { %165 = vmatpush1.bf16.msra.mxu0 %v243_v8 }
  0x4a   :  { %166 = vmatprep.subr.bf16.mxu0 %v352_v0 }
  0x4d   :  { %167 = vmatpush1.bf16.msra.mxu0 %v244_v9 }
  0x4e   :  { %168 = vmatprep.subr.bf16.mxu0 %v352_v0 }
  0x51   :  { %169 = vmatpush1.bf16.msra.mxu0 %v245_v10 }
  0x52   :  { %170 = vmatprep.subr.bf16.mxu0 %v352_v0 }
  0x55   :  { %171 = vmatpush1.bf16.msra.mxu0 %v246_v11 }
  0x56   :  { %172 = vmatprep.subr.bf16.mxu0 %v352_v0 }
  0x59   :  { %173 = vmatpush1.bf16.msra.mxu0 %v247_v12 }
  0x5c   :  { %189 = vmatmul.mubr.bf16.vlgmr.msra.gmra.mrb[0].mxu0 %v248_v13 }
  0xb9   :  { %v82_v14 = vpop.permute.xlu0 %81 }
  0xbd   :  { %v87_v18 = vpop.permute.xlu0 %86 }
 0x12f   :  { %v190_v15 = vpop.f32.mrb[0].mxu0 }
 0x130   :  { %v191_v16 = vadd.f32 %v190_v15, %v82_v14  ;;  %v192_v17 = vpop.f32.mrb[1].mxu0 }
 0x131   :  { %v193_v19 = vpop.f32.mrb[2].mxu0 }
 0x132   :  { %197 = vst [vmem:[#allocation8] sm:$0xff] %v191_v16  ;;  %v194_v20 = vadd.f32 %v193_v19, %v87_v18  ;;  %v195_v21 = vpop.f32.mrb[3].mxu0 }
 0x134   :  { %198 = vst [vmem:[#allocation8 + $0x8] sm:$0xff] %v194_v20 }
 0x135   :  { %328 = shalt.err (!%p325_p0)
}
 0x136   :  { %s329_s29 = scalar_lea.hbm %s441_s3, 256 }
 0x137   :  { %p330_p1 = scmp.ne.s32.totalorder %s441_s3, %s329_s29  ;;  %p333_p2 = scmp.lt.u32.totalorder %s329_s29, %s441_s3 }
 0x139   :  { %p335_p3 = pnand %p333_p2, %p330_p1 }
 0x13b   :  { %338 = shalt.err (!%p335_p3)
}
 0x13c   :  { %210 = dma.vmem_to_hbm [thread:$0]  %s205_s23, 256, %s441_s3, [#allocation4], %s347_s24, %s347_s24, %s348_s25  }
 0x13d   :  { %343 = dma.done.wait [#allocation4], 256  }
 0x13e   :  { %344 = vsyncadd [#allocation4], 4294967040 }
 0x13f   :  { %214 = vsyncpa [#allocation3], 1 }
 0x140   :  { %215 = vsyncpa [#allocation6], 1 }
 0x141   :  { %216 = vsyncpa [#allocation4], 1 }

// kernel: local_attention_forward.6
= control target key start
LH: loop header
LB: loop body
LE: loop exit
PB: predicated region body
PF: predicated region fallthrough
CT: control target
= control target key end

     0   :  { %8 = vsyncpa [#allocation3], 0  ;;  %s411_s0 = inlined_call_operand.hbm [shape: bf16[4,144], index: 0, kind: input, shape index: {}]   ;;  %s412_s1 = inlined_call_operand.hbm [shape: f32[4,1], index: 1, kind: input, shape index: {}]   ;;  %s413_s2 = inlined_call_operand.hbm [shape: bf16[144,128], index: 2, kind: input, shape index: {}]   ;;  %s414_s3 = inlined_call_operand.hbm [shape: f32[4,128], index: 3, kind: output, shape index: {}]  }
   0x1   :  { %9 = vsyncpa [#allocation6], 0 }
   0x2   :  { %10 = vsyncpa [#allocation4], 0  ;;  %s336_s12 = smov [#allocation5]   ;;  %s337_s14 = smov [#allocation2]  }
   0x3   :  { %s27_s13 = sshll.u32 %s336_s12, 4  ;;  %s17_s15 = sshll.u32 %s337_s14, 4  ;;  %s28_s13 = int_to_ptr.vmem [resolvable:$true] %s27_s13  ;;  %s18_s15 = int_to_ptr.vmem [resolvable:$true] %s17_s15 }
   0x4   :  { %s242_s18 = scalar_lea.hbm %s412_s1, 64 }
   0x5   :  { %p243_p0 = scmp.ne.s32.totalorder %s412_s1, %s242_s18  ;;  %p246_p1 = scmp.lt.u32.totalorder %s242_s18, %s412_s1 }
   0x7   :  { %p248_p2 = pnand %p246_p1, %p243_p0 }
   0x9   :  { %251 = shalt.err (!%p248_p2)
}
   0xa   :  { %s252_s23 = scalar_lea.vmem %s28_s13, 64  ;;  %p257_p4 = scmp.lt.s32.totalorder %s28_s13, %s28_s13 }
   0xb   :  { %p253_p3 = scmp.ne.s32.totalorder %s28_s13, %s252_s23  ;;  %p258_p5 = scmp.lt.s32.totalorder %s252_s23, %s252_s23 }
   0xd   :  { %p259_p6 = por %p258_p5, %p257_p4 }
   0xf   :  { %p260_p7 = pnand %p259_p6, %p253_p3 }
  0x11   :  { %263 = shalt.err (!%p260_p7)
}
  0x12   :  { %30 = dma.hbm_to_vmem [thread:$0]  %s412_s1, 64, %s28_s13, [#allocation6]  }
  0x13   :  { %s264_s28 = scalar_lea.hbm %s411_s0, 64 }
  0x14   :  { %p265_p8 = scmp.ne.s32.totalorder %s411_s0, %s264_s28  ;;  %p268_p9 = scmp.lt.u32.totalorder %s264_s28, %s411_s0 }
  0x16   :  { %p270_p10 = pnand %p268_p9, %p265_p8 }
  0x18   :  { %273 = shalt.err (!%p270_p10)
}
  0x19   :  { %s274_s6 = scalar_lea.vmem %s18_s15, 64  ;;  %p279_p12 = scmp.lt.s32.totalorder %s18_s15, %s18_s15 }
  0x1a   :  { %p275_p11 = scmp.ne.s32.totalorder %s18_s15, %s274_s6  ;;  %p280_p13 = scmp.lt.s32.totalorder %s274_s6, %s274_s6 }
  0x1c   :  { %p281_p0 = por %p280_p13, %p279_p12 }
  0x1e   :  { %p282_p1 = pnand %p281_p0, %p275_p11 }
  0x20   :  { %285 = shalt.err (!%p282_p1)
}
  0x21   :  { %20 = dma.hbm_to_vmem [thread:$0]  %s411_s0, 64, %s18_s15, [#allocation3]  }
  0x22   :  { %s338_s8 = smov [#allocation7]   ;;  %s286_s12 = scalar_lea.hbm %s413_s2, 1152 }
  0x23   :  { %s36_s9 = sshll.u32 %s338_s8, 4  ;;  %p287_p2 = scmp.ne.s32.totalorder %s413_s2, %s286_s12  ;;  %s37_s9 = int_to_ptr.vmem [resolvable:$true] %s36_s9 }
  0x24   :  { %p290_p3 = scmp.lt.u32.totalorder %s286_s12, %s413_s2 }
  0x26   :  { %p292_p4 = pnand %p290_p3, %p287_p2 }
  0x28   :  { %295 = shalt.err (!%p292_p4)
}
  0x29   :  { %s296_s18 = scalar_lea.vmem %s37_s9, 1152  ;;  %p301_p6 = scmp.lt.s32.totalorder %s37_s9, %s37_s9 }
  0x2a   :  { %p297_p5 = scmp.ne.s32.totalorder %s37_s9, %s296_s18  ;;  %p302_p7 = scmp.lt.s32.totalorder %s296_s18, %s296_s18 }
  0x2c   :  { %p303_p8 = por %p302_p7, %p301_p6 }
  0x2e   :  { %p304_p9 = pnand %p303_p8, %p297_p5 }
  0x30   :  { %307 = shalt.err (!%p304_p9)
}
  0x31   :  { %s339_s0 = smov 64   ;;  %s340_s15 = smov 4  }
  0x32   :  { %42 = dma.hbm_to_vmem [thread:$0]  %s413_s2, 1152, %s37_s9, [#allocation6], %s339_s0, %s339_s0, %s340_s15  }
  0x33   :  { %330 = dma.done.wait [#allocation3], 64  }
  0x34   :  { %331 = vsyncadd [#allocation3], 4294967232 }
  0x35   :  { %332 = dma.done.wait [#allocation6], 1216  }
  0x36   :  { %333 = vsyncadd [#allocation6], 4294966080  ;;  %v341_v0 = vmov 0   ;;  %v229_v1 = vld [vmem:[#allocation7] sm:$0xff]   ;;  %v230_v2 = vld [vmem:[#allocation7 + $0x8] sm:$0xff]   ;;  %vm142_vm0 = vcmask 130048  }
  0x37   :  { %146 = vmatprep.subr.bf16.mxu0 %v341_v0  ;;  %228 = vset.pattern.permute.xlu0 %v341_v0  ;;  %v231_v3 = vld [vmem:[#allocation7 + $0x10] sm:$0xff]   ;;  %v209_v4 = vld.sshfl [vmem:[#allocation2] sm:$0x33 pattern:$0x76325410]  ;;  %v233_v8 = vld [vmem:[#allocation7 + $0x20] sm:$0xff]  }
  0x38   :  { %147 = vmatpush1.bf16.msra.mxu0 %v229_v1  ;;  %v72_v5 = vld [vmem:[#allocation5] sm:$0xf]  ;;  %v86_v7 = vcombine.high %v209_v4, %v209_v4  ;;  %v234_v9 = vld [vmem:[#allocation7 + $0x28] sm:$0xff]   ;;  %v235_v10 = vld [vmem:[#allocation7 + $0x30] sm:$0xff]   ;;  %s342_s2 = smov [#allocation8]  }
  0x39   :  { %148 = vmatprep.subr.bf16.mxu0 %v341_v0  ;;  %v232_v6 = vld [vmem:[#allocation7 + $0x18] sm:$0xff]   ;;  %75 = vperm.xlu0 %228, %v72_v5   ;;  %v237_v12 = vld [vmem:[#allocation7 + $0x40] sm:$0xff]   ;;  %s199_s21 = sshll.u32 %s342_s2, 4  ;;  %s200_s21 = int_to_ptr.vmem [resolvable:$true] %s199_s21 }
  0x3a   :  { %219 = vmatprep.mubr.msk.bf16.mxu0 %vm142_vm0, %v86_v7  ;;  %v236_v11 = vld [vmem:[#allocation7 + $0x38] sm:$0xff]   ;;  %s308_s22 = scalar_lea.vmem %s200_s21, 64  ;;  %p313_p11 = scmp.lt.s32.totalorder %s200_s21, %s200_s21 }
  0x3b   :  { %p309_p10 = scmp.ne.s32.totalorder %s200_s21, %s308_s22  ;;  %p314_p12 = scmp.lt.s32.totalorder %s308_s22, %s308_s22 }
  0x3c   :  { %149 = vmatpush1.bf16.msra.mxu0 %v230_v2 }
  0x3d   :  { %150 = vmatprep.subr.bf16.mxu0 %v341_v0  ;;  %p315_p13 = por %p314_p12, %p313_p11 }
  0x3f   :  { %p316_p0 = pnand %p315_p13, %p309_p10 }
  0x40   :  { %151 = vmatpush1.bf16.msra.mxu0 %v231_v3 }
  0x41   :  { %152 = vmatprep.subr.bf16.mxu0 %v341_v0 }
  0x44   :  { %153 = vmatpush1.bf16.msra.mxu0 %v232_v6 }
  0x45   :  { %154 = vmatprep.subr.bf16.mxu0 %v341_v0 }
  0x48   :  { %155 = vmatpush1.bf16.msra.mxu0 %v233_v8 }
  0x49   :  { %156 = vmatprep.subr.bf16.mxu0 %v341_v0 }
  0x4c   :  { %157 = vmatpush1.bf16.msra.mxu0 %v234_v9 }
  0x4d   :  { %158 = vmatprep.subr.bf16.mxu0 %v341_v0 }
  0x50   :  { %159 = vmatpush1.bf16.msra.mxu0 %v235_v10 }
  0x51   :  { %160 = vmatprep.subr.bf16.mxu0 %v341_v0 }
  0x54   :  { %161 = vmatpush1.bf16.msra.mxu0 %v236_v11 }
  0x55   :  { %162 = vmatprep.subr.bf16.mxu0 %v341_v0 }
  0x58   :  { %163 = vmatpush1.bf16.msra.mxu0 %v237_v12 }
  0x5b   :  { %179 = vmatmul.mubr.bf16.vlgmr.msra.gmra.mrb[0].mxu0 %v209_v4 }
  0xb8   :  { %v76_v13 = vpop.permute.xlu0 %75 }
 0x12e   :  { %v180_v14 = vpop.f32.mrb[0].mxu0 }
 0x12f   :  { %v181_v15 = vadd.f32 %v180_v14, %v76_v13  ;;  %v182_v16 = vpop.f32.mrb[1].mxu0 }
 0x130   :  { %v183_v17 = vpop.f32.mrb[2].mxu0 }
 0x131   :  { %v220_v18 = vmul.f32 -1.442695, %v181_v15  ;;  %v184_v19 = vpop.f32.mrb[3].mxu0 }
 0x133   :  { %238 = vpow2.f32 %v220_v18 }
 0x13d   :  { %v239_v20 = vpop.eup %238 }
 0x13e   :  { %v189_v21 = vadd.f32 1.0, %v239_v20 }
 0x140   :  { %240 = vrcp.f32 %v189_v21 }
 0x14a   :  { %v241_v22 = vpop.eup %240 }
 0x14b   :  { %192 = vst [vmem:[#allocation8] sm:$0xf] %v241_v22 }
 0x14c   :  { %319 = shalt.err (!%p316_p0)
}
 0x14d   :  { %s320_s25 = scalar_lea.hbm %s414_s3, 64 }
 0x14e   :  { %p321_p1 = scmp.ne.s32.totalorder %s414_s3, %s320_s25  ;;  %p324_p2 = scmp.lt.u32.totalorder %s320_s25, %s414_s3 }
 0x150   :  { %p326_p3 = pnand %p324_p2, %p321_p1 }
 0x152   :  { %329 = shalt.err (!%p326_p3)
}
 0x153   :  { %202 = dma.vmem_to_hbm [thread:$0]  %s200_s21, 64, %s414_s3, [#allocation4]  }
 0x154   :  { %334 = dma.done.wait [#allocation4], 64  }
 0x155   :  { %335 = vsyncadd [#allocation4], 4294967232 }
 0x156   :  { %206 = vsyncpa [#allocation3], 1 }
 0x157   :  { %207 = vsyncpa [#allocation6], 1 }
 0x158   :  { %208 = vsyncpa [#allocation4], 1 }

// kernel: local_attention_forward.7
= control target key start
LH: loop header
LB: loop body
LE: loop exit
PB: predicated region body
PF: predicated region fallthrough
CT: control target
= control target key end

     0   :  { %9 = vsyncpa [#allocation3], 0  ;;  %s1388_s0 = inlined_call_operand.hbm [shape: f32[2,4,16,16], index: 0, kind: input, shape index: {}]   ;;  %s1389_s1 = inlined_call_operand.hbm [shape: f32[2,4,2,2], index: 1, kind: input, shape index: {}]   ;;  %s1390_s2 = inlined_call_operand.hbm [shape: f32[2,16], index: 2, kind: input, shape index: {}]   ;;  %s1391_s3 = inlined_call_operand.hbm [shape: f32[16,2], index: 3, kind: input, shape index: {}]   ;;  %s1392_s4 = inlined_call_operand.hbm [shape: f32[2,4,16,16], index: 4, kind: output, shape index: {}]  }
   0x1   :  { %10 = vsyncpa [#allocation6], 0 }
   0x2   :  { %11 = vsyncpa [#allocation9], 0 }
   0x3   :  { %12 = vsyncpa [#allocation4], 0  ;;  %s1221_s15 = smov [#allocation5]   ;;  %s1103_s19 = scalar_lea.hbm %s1389_s1, 256 }
   0x4   :  { %s30_s16 = sshll.u32 %s1221_s15, 4  ;;  %p1104_p0 = scmp.ne.s32.totalorder %s1389_s1, %s1103_s19  ;;  %s31_s16 = int_to_ptr.vmem [resolvable:$true] %s30_s16 }
   0x5   :  { %p1107_p1 = scmp.lt.u32.totalorder %s1103_s19, %s1389_s1 }
   0x7   :  { %p1109_p2 = pnand %p1107_p1, %p1104_p0 }
   0x9   :  { %1112 = shalt.err (!%p1109_p2)
}
   0xa   :  { %s1113_s24 = scalar_lea.vmem %s31_s16, 256  ;;  %p1118_p4 = scmp.lt.s32.totalorder %s31_s16, %s31_s16 }
   0xb   :  { %p1114_p3 = scmp.ne.s32.totalorder %s31_s16, %s1113_s24  ;;  %p1119_p5 = scmp.lt.s32.totalorder %s1113_s24, %s1113_s24 }
   0xd   :  { %p1120_p6 = por %p1119_p5, %p1118_p4 }
   0xf   :  { %p1121_p7 = pnand %p1120_p6, %p1114_p3 }
  0x11   :  { %1124 = shalt.err (!%p1121_p7)
}
  0x12   :  { %s1222_s25 = smov 32   ;;  %s1223_s26 = smov 2  }
  0x13   :  { %36 = dma.hbm_to_vmem [thread:$0]  %s1389_s1, 256, %s31_s16, [#allocation6], %s1222_s25, %s1222_s25, %s1223_s26  }
  0x14   :  { %s1224_s29 = smov [#allocation2]   ;;  %s1125_s7 = scalar_lea.hbm %s1388_s0, 2048 }
  0x15   :  { %s18_s30 = sshll.u32 %s1224_s29, 4  ;;  %p1126_p8 = scmp.ne.s32.totalorder %s1388_s0, %s1125_s7  ;;  %s19_s30 = int_to_ptr.vmem [resolvable:$true] %s18_s30 }
  0x16   :  { %p1129_p9 = scmp.lt.u32.totalorder %s1125_s7, %s1388_s0 }
  0x18   :  { %p1131_p10 = pnand %p1129_p9, %p1126_p8 }
  0x1a   :  { %1134 = shalt.err (!%p1131_p10)
}
  0x1b   :  { %s1135_s12 = scalar_lea.vmem %s19_s30, 2048  ;;  %p1140_p12 = scmp.lt.s32.totalorder %s19_s30, %s19_s30 }
  0x1c   :  { %p1136_p11 = scmp.ne.s32.totalorder %s19_s30, %s1135_s12  ;;  %p1141_p13 = scmp.lt.s32.totalorder %s1135_s12, %s1135_s12 }
  0x1e   :  { %p1142_p0 = por %p1141_p13, %p1140_p12 }
  0x20   :  { %p1143_p1 = pnand %p1142_p0, %p1136_p11 }
  0x22   :  { %1146 = shalt.err (!%p1143_p1)
}
  0x23   :  { %s1225_s1 = smov 128   ;;  %s1226_s13 = smov 8  }
  0x24   :  { %24 = dma.hbm_to_vmem [thread:$0]  %s1388_s0, 2048, %s19_s30, [#allocation3], %s1225_s1, %s1225_s1, %s1226_s13  }
  0x25   :  { %s1227_s16 = smov [#allocation7]   ;;  %s1228_s18 = smov [#allocation8]  }
  0x26   :  { %s43_s17 = sshll.u32 %s1227_s16, 4  ;;  %s52_s19 = sshll.u32 %s1228_s18, 4  ;;  %s44_s17 = int_to_ptr.vmem [resolvable:$true] %s43_s17  ;;  %s1283_s19 = int_to_ptr.vmem [resolvable:$true] %s52_s19 }
  0x27   :  { %s1147_s22 = scalar_lea.hbm %s1390_s2, 32 }
  0x28   :  { %p1148_p2 = scmp.ne.s32.totalorder %s1390_s2, %s1147_s22  ;;  %p1151_p3 = scmp.lt.u32.totalorder %s1147_s22, %s1390_s2 }
  0x2a   :  { %p1153_p4 = pnand %p1151_p3, %p1148_p2 }
  0x2c   :  { %1156 = shalt.err (!%p1153_p4)
}
  0x2d   :  { %s1157_s0 = scalar_lea.vmem %s44_s17, 32  ;;  %p1162_p6 = scmp.lt.s32.totalorder %s44_s17, %s44_s17 }
  0x2e   :  { %p1158_p5 = scmp.ne.s32.totalorder %s44_s17, %s1157_s0  ;;  %p1163_p7 = scmp.lt.s32.totalorder %s1157_s0, %s1157_s0 }
  0x30   :  { %p1164_p8 = por %p1163_p7, %p1162_p6 }
  0x32   :  { %p1165_p9 = pnand %p1164_p8, %p1158_p5 }
  0x34   :  { %1168 = shalt.err (!%p1165_p9)
}
  0x35   :  { %46 = dma.hbm_to_vmem [thread:$0]  %s1390_s2, 32, %s44_s17, [#allocation6]  }
  0x36   :  { %s1169_s5 = scalar_lea.hbm %s1391_s3, 256 }
  0x37   :  { %p1170_p10 = scmp.ne.s32.totalorder %s1391_s3, %s1169_s5  ;;  %p1173_p11 = scmp.lt.u32.totalorder %s1169_s5, %s1391_s3 }
  0x39   :  { %p1175_p12 = pnand %p1173_p11, %p1170_p10 }
  0x3b   :  { %1178 = shalt.err (!%p1175_p12)
}
  0x3c   :  { %s1179_s10 = scalar_lea.vmem %s1283_s19, 256  ;;  %p1184_p0 = scmp.lt.s32.totalorder %s1283_s19, %s1283_s19 }
  0x3d   :  { %p1180_p13 = scmp.ne.s32.totalorder %s1283_s19, %s1179_s10  ;;  %p1185_p1 = scmp.lt.s32.totalorder %s1179_s10, %s1179_s10 }
  0x3f   :  { %p1186_p2 = por %p1185_p1, %p1184_p0 }
  0x41   :  { %p1187_p3 = pnand %p1186_p2, %p1180_p13 }
  0x43   :  { %1190 = shalt.err (!%p1187_p3)
}
  0x44   :  { %58 = dma.hbm_to_vmem [thread:$0]  %s1391_s3, 256, %s1283_s19, [#allocation9], %s1225_s1, %s1225_s1, %s1226_s13  }
  0x45   :  { %1213 = dma.done.wait [#allocation3], 2048  }
  0x46   :  { %1214 = vsyncadd [#allocation3], 4294965248 }
  0x47   :  { %1215 = dma.done.wait [#allocation6], 288  }
  0x48   :  { %1216 = vsyncadd [#allocation6], 4294967008 }
  0x49   :  { %1217 = dma.done.wait [#allocation9], 256  }
  0x4a   :  { %1218 = vsyncadd [#allocation9], 4294967040  ;;  %v93_v0 = vlaneseq  ;;  %v1229_v1 = vmov 1983009808   ;;  %vm127_vm0 = vcmask 1041408   ;;  %vm122_vm1 = vcmask 15360  }
  0x4b   :  { %v91_v2 = vunpack.c.l.s4 %v1229_v1  ;;  %v79_v6 = vld [vmem:[#allocation7] sm:$0x3]  ;;  %v71_v7 = vld [vmem:[#allocation5] sm:$0x3]  ;;  %v72_v8 = vld [vmem:[#allocation5 + $0x2] sm:$0x3] }
  0x4c   :  { %v94_v3 = vshrl.u32 %v93_v0, 7  ;;  %1032 = vmatprep.subr.msk.mxu0 %vm127_vm0, %v79_v6  ;;  %v73_v9 = vld [vmem:[#allocation5 + $0x4] sm:$0x3]  ;;  %v74_v10 = vld [vmem:[#allocation5 + $0x6] sm:$0x3]  ;;  %v88_v11 = vcombine.low %v71_v7, %v72_v8  ;;  %v242_v25 = vld [vmem:[#allocation8] sm:$0xff] }
  0x4d   :  { %v92_v4 = vunpack.c.0.s8 %v91_v2  ;;  %v75_v12 = vld [vmem:[#allocation5 + $0x8] sm:$0x3]  ;;  %1033 = vmatpush3.msk.msra.mxu0 %vm127_vm0, %v79_v6  ;;  %v89_v13 = vcombine.low %v73_v9, %v74_v10  ;;  %v76_v14 = vld [vmem:[#allocation5 + $0xa] sm:$0x3]  ;;  %v77_v15 = vld [vmem:[#allocation5 + $0xc] sm:$0x3]  ;;  %1039 = vmatprep.mubr.msk.f32.mxu1 %vm122_vm1, %v242_v25 }
  0x4e   :  { %v78_v16 = vld [vmem:[#allocation5 + $0xe] sm:$0x3]  ;;  %v105_v18 = vcombine.low %v75_v12, %v76_v14  ;;  %v243_v30 = vld [vmem:[#allocation8 + $0x8] sm:$0xff]  ;;  %v868_v61 = vld [vmem:[#allocation2 + $0x10] sm:$0xff]  ;;  %vm938_vm2 = vcmask 130048   ;;  %s1230_s3 = smov [#allocation10]  }
  0x4f   :  { %v95_v5 = vsub.s32 %v92_v4, %v94_v3  ;;  %v106_v19 = vcombine.low %v77_v15, %v78_v16  ;;  %v867_v39 = vld [vmem:[#allocation2 + $0x8] sm:$0xff]  ;;  %v866_v40 = vld [vmem:[#allocation2] sm:$0xff]  ;;  %v869_v57 = vld [vmem:[#allocation2 + $0x18] sm:$0xff]  ;;  %s960_s12 = sshll.u32 %s1230_s3, 4  ;;  %s961_s12 = int_to_ptr.vmem [resolvable:$true] %s960_s12 }
  0x50   :  { %v1002_v41 = vmul.f32 -1.442695, %v867_v39  ;;  %v1001_v42 = vmul.f32 -1.442695, %v866_v40  ;;  %v875_v43 = vld [vmem:[#allocation2 + $0x48] sm:$0xff]  ;;  %v1353_v44 = vld [vmem:[#allocation2 + $0x40] sm:$0xff]  ;;  %p1196_p5 = scmp.lt.s32.totalorder %s961_s12, %s961_s12 }
  0x51   :  { %v96_v17 = vrot.slane %v88_v11, %v95_v5  ;;  %v103_v20 = vrot.slane %v89_v13, %v95_v5  ;;  %v113_v21 = vrot.slane %v105_v18, %v95_v5  ;;  %v120_v22 = vrot.slane %v106_v19, %v95_v5  ;;  %v871_v3 = vld [vmem:[#allocation2 + $0x28] sm:$0xff]  ;;  %v870_v6 = vld [vmem:[#allocation2 + $0x20] sm:$0xff]  ;;  %v873_v9 = vld [vmem:[#allocation2 + $0x38] sm:$0xff]  ;;  %s1191_s14 = scalar_lea.vmem %s961_s12, 2048 }
  0x52   :  { %1087 = vpow2.f32 %v1002_v41  ;;  %v1004_v45 = vmul.f32 -1.442695, %v875_v43  ;;  %v1003_v46 = vmul.f32 -1.442695, %v1353_v44  ;;  %v872_v13 = vld [vmem:[#allocation2 + $0x30] sm:$0xff]  ;;  %p1192_p4 = scmp.ne.s32.totalorder %s961_s12, %s1191_s14  ;;  %p1197_p6 = scmp.lt.s32.totalorder %s1191_s14, %s1191_s14 }
  0x53   :  { %v104_v23 = vcombine.low %v96_v17, %v103_v20  ;;  %v121_v24 = vcombine.low %v113_v21, %v120_v22  ;;  %1089 = vpow2.f32 %v1001_v42 }
  0x54   :  { %1091 = vpow2.f32 %v1004_v45  ;;  %v880_v45 = vld [vmem:[#allocation2 + $0x70] sm:$0xff]  ;;  %p1198_p7 = por %p1197_p6, %p1196_p5 }
  0x55   :  { %1034 = vmatprep.mubr.msk.f32.mxu0 %vm122_vm1, %v104_v23  ;;  %1093 = vpow2.f32 %v1003_v46  ;;  %v877_v23 = vld [vmem:[#allocation2 + $0x58] sm:$0xff] }
  0x56   :  { %1035 = vmatmul.mubr.msk.f32.vlgmr.msra.gmra.mrb[0].mxu0 %vm122_vm1, %v121_v24  ;;  %p1199_p8 = pnand %p1198_p7, %p1192_p4 }
  0x57   :  { %1044 = vmatprep.mubr.msk.f32.mxu0 %vm122_vm1, %v242_v25 }
  0x5c   :  { %v1088_v47 = vpop.eup %1087 }
  0x5d   :  { %v1090_v48 = vpop.eup %1089  ;;  %v895_v49 = vadd.f32 1.0, %v1088_v47 }
  0x5e   :  { %v894_v50 = vadd.f32 1.0, %v1090_v48  ;;  %v1092_v51 = vpop.eup %1091 }
  0x5f   :  { %1095 = vrcp.f32 %v895_v49  ;;  %v1094_v52 = vpop.eup %1093  ;;  %v897_v53 = vadd.f32 1.0, %v1092_v51 }
  0x60   :  { %1097 = vrcp.f32 %v894_v50  ;;  %v896_v54 = vadd.f32 1.0, %v1094_v52 }
  0x61   :  { %1099 = vrcp.f32 %v897_v53 }
  0x62   :  { %1101 = vrcp.f32 %v896_v54 }
  0x69   :  { %v1096_v55 = vpop.eup %1095 }
  0x6a   :  { %v1098_v58 = vpop.eup %1097 }
  0x6b   :  { %v1100_v19 = vpop.eup %1099 }
  0x6c   :  { %v1102_v24 = vpop.eup %1101 }
 0x129   :  { %v1036_v26 = vpop.f32.mrb[0].mxu0 }
 0x12a   :  { %v197_v27 = vpop.f32.mrb[1].mxu0  ;;  %v225_v33 = vcombine.high %v1036_v26, %v1036_v26  ;;  %v232_v34 = vrot.slane %v1036_v26, %v95_v5 }
 0x12b   :  { %v208_v28 = vcombine.high %v197_v27, %v197_v27  ;;  %v215_v29 = vrot.slane %v197_v27, %v95_v5 }
 0x12c   :  { %v239_v36 = vrot.slane %v225_v33, %v95_v5  ;;  %v240_v37 = vcombine.high %v232_v34, %v232_v34 }
 0x12d   :  { %v222_v31 = vrot.slane %v208_v28, %v95_v5  ;;  %v223_v32 = vcombine.high %v215_v29, %v215_v29  ;;  %1037 = vmatprep.subr.msk.mxu1 %vm127_vm0, %v215_v29  ;;  %v876_v28 = vld [vmem:[#allocation2 + $0x50] sm:$0xff] }
 0x12e   :  { %1038 = vmatpush3.msk.msra.mxu1 %vm127_vm0, %v215_v29  ;;  %v241_v38 = vcombine.high %v239_v36, %v239_v36 }
 0x12f   :  { %1040 = vmatmul.mubr.msk.f32.vlgmr.msra.gmra.mrb[0].mxu1 %vm122_vm1, %v243_v30  ;;  %1042 = vmatprep.subr.msk.mxu0 %vm127_vm0, %v223_v32  ;;  %v224_v35 = vcombine.high %v222_v31, %v222_v31 }
 0x130   :  { %1047 = vmatprep.subr.msk.mxu1 %vm127_vm0, %v222_v31  ;;  %1043 = vmatpush3.msk.msra.mxu0 %vm127_vm0, %v223_v32  ;;  %v879_v32 = vld [vmem:[#allocation2 + $0x68] sm:$0xff] }
 0x131   :  { %1048 = vmatpush3.msk.msra.mxu1 %vm127_vm0, %v222_v31  ;;  %1045 = vmatmul.mubr.msk.f32.vlgmr.msra.gmra.mrb[2].mxu0 %vm122_vm1, %v243_v30 }
 0x132   :  { %1052 = vmatprep.subr.msk.mxu0 %vm127_vm0, %v224_v35  ;;  %1057 = vmatprep.subr.msk.mxu1 %vm127_vm0, %v232_v34 }
 0x133   :  { %1049 = vmatprep.mubr.msk.f32.mxu1 %vm122_vm1, %v242_v25  ;;  %1053 = vmatpush3.msk.msra.mxu0 %vm127_vm0, %v224_v35 }
 0x134   :  { %1050 = vmatmul.mubr.msk.f32.vlgmr.msra.gmra.mrb[2].mxu1 %vm122_vm1, %v243_v30  ;;  %1062 = vmatprep.subr.msk.mxu0 %vm127_vm0, %v240_v37 }
 0x135   :  { %1058 = vmatpush3.msk.msra.mxu1 %vm127_vm0, %v232_v34  ;;  %1054 = vmatprep.mubr.msk.f32.mxu0 %vm122_vm1, %v242_v25 }
 0x136   :  { %1067 = vmatprep.subr.msk.mxu1 %vm127_vm0, %v239_v36  ;;  %1055 = vmatmul.mubr.msk.f32.vlgmr.msra.gmra.mrb[4].mxu0 %vm122_vm1, %v243_v30 }
 0x137   :  { %1063 = vmatpush3.msk.msra.mxu0 %vm127_vm0, %v240_v37  ;;  %1059 = vmatprep.mubr.msk.f32.mxu1 %vm122_vm1, %v242_v25 }
 0x138   :  { %1072 = vmatprep.subr.msk.mxu0 %vm127_vm0, %v241_v38  ;;  %1060 = vmatmul.mubr.msk.f32.vlgmr.msra.gmra.mrb[4].mxu1 %vm122_vm1, %v243_v30 }
 0x139   :  { %1068 = vmatpush3.msk.msra.mxu1 %vm127_vm0, %v239_v36  ;;  %1064 = vmatprep.mubr.msk.f32.mxu0 %vm122_vm1, %v242_v25  ;;  %v878_v36 = vld [vmem:[#allocation2 + $0x60] sm:$0xff] }
 0x13a   :  { %1065 = vmatmul.mubr.msk.f32.vlgmr.msra.gmra.mrb[6].mxu0 %vm122_vm1, %v243_v30  ;;  %1069 = vmatprep.mubr.msk.f32.mxu1 %vm122_vm1, %v242_v25 }
 0x13b   :  { %1073 = vmatpush3.msk.msra.mxu0 %vm127_vm0, %v241_v38  ;;  %1074 = vmatprep.mubr.msk.f32.mxu0 %vm122_vm1, %v242_v25 }
 0x13c   :  { %1070 = vmatmul.mubr.msk.f32.vlgmr.msra.gmra.mrb[6].mxu1 %vm122_vm1, %v243_v30 }
 0x13e   :  { %1075 = vmatmul.mubr.msk.f32.vlgmr.msra.gmra.mrb[8].mxu0 %vm122_vm1, %v243_v30 }
 0x202   :  { %v1041_v56 = vpop.f32.mrb[0].mxu1 }
 0x203   :  { %v907_v59 = vmul.f32 %v1041_v56, %v867_v39  ;;  %v318_v60 = vpop.f32.mrb[1].mxu1 }
 0x204   :  { %v1046_v62 = vpop.f32.mrb[2].mxu0  ;;  %v906_v63 = vmul.f32 %v866_v40, %v318_v60  ;;  %v881_v40 = vld [vmem:[#allocation2 + $0x78] sm:$0xff] }
 0x205   :  { %v923_v0 = vmul.f32 %v1096_v55, %v907_v59  ;;  %v909_v1 = vmul.f32 %v1046_v62, %v869_v57  ;;  %v395_v2 = vpop.f32.mrb[3].mxu0 }
 0x206   :  { %v922_v4 = vmul.f32 %v1098_v58, %v906_v63  ;;  %v908_v5 = vmul.f32 %v868_v61, %v395_v2 }
 0x207   :  { %940 = vst.msk [vmem:[#allocation10 + $0x8] sm:$0xff] %vm938_vm2, %v923_v0  ;;  %v925_v7 = vmul.f32 %v1096_v55, %v909_v1  ;;  %v1051_v8 = vpop.f32.mrb[2].mxu1 }
 0x208   :  { %939 = vst.msk [vmem:[#allocation10] sm:$0xff] %vm938_vm2, %v922_v4  ;;  %v924_v10 = vmul.f32 %v1098_v58, %v908_v5  ;;  %v911_v11 = vmul.f32 %v1051_v8, %v871_v3  ;;  %v472_v12 = vpop.f32.mrb[3].mxu1 }
 0x209   :  { %942 = vst.msk [vmem:[#allocation10 + $0x18] sm:$0xff] %vm938_vm2, %v925_v7  ;;  %v1056_v14 = vpop.f32.mrb[4].mxu0  ;;  %v910_v15 = vmul.f32 %v870_v6, %v472_v12 }
 0x20a   :  { %941 = vst.msk [vmem:[#allocation10 + $0x10] sm:$0xff] %vm938_vm2, %v924_v10  ;;  %v927_v16 = vmul.f32 %v1096_v55, %v911_v11  ;;  %v913_v17 = vmul.f32 %v1056_v14, %v873_v9  ;;  %v549_v18 = vpop.f32.mrb[5].mxu0 }
 0x20b   :  { %v926_v20 = vmul.f32 %v1098_v58, %v910_v15  ;;  %v912_v21 = vmul.f32 %v872_v13, %v549_v18  ;;  %v1061_v22 = vpop.f32.mrb[4].mxu1 }
 0x20c   :  { %944 = vst.msk [vmem:[#allocation10 + $0x28] sm:$0xff] %vm938_vm2, %v927_v16  ;;  %v929_v25 = vmul.f32 %v1096_v55, %v913_v17  ;;  %v915_v26 = vmul.f32 %v1061_v22, %v875_v43  ;;  %v626_v27 = vpop.f32.mrb[5].mxu1 }
 0x20d   :  { %943 = vst.msk [vmem:[#allocation10 + $0x20] sm:$0xff] %vm938_vm2, %v926_v20  ;;  %v928_v29 = vmul.f32 %v1098_v58, %v912_v21  ;;  %v1066_v30 = vpop.f32.mrb[6].mxu0  ;;  %v914_v31 = vmul.f32 %v1353_v44, %v626_v27 }
 0x20e   :  { %946 = vst.msk [vmem:[#allocation10 + $0x38] sm:$0xff] %vm938_vm2, %v929_v25  ;;  %v931_v33 = vmul.f32 %v1100_v19, %v915_v26  ;;  %v917_v34 = vmul.f32 %v1066_v30, %v877_v23  ;;  %v703_v35 = vpop.f32.mrb[7].mxu0 }
 0x20f   :  { %945 = vst.msk [vmem:[#allocation10 + $0x30] sm:$0xff] %vm938_vm2, %v928_v29  ;;  %v930_v37 = vmul.f32 %v1102_v24, %v914_v31  ;;  %v916_v38 = vmul.f32 %v876_v28, %v703_v35  ;;  %v1071_v39 = vpop.f32.mrb[6].mxu1 }
 0x210   :  { %948 = vst.msk [vmem:[#allocation10 + $0x48] sm:$0xff] %vm938_vm2, %v931_v33  ;;  %v933_v41 = vmul.f32 %v1100_v19, %v917_v34  ;;  %v919_v42 = vmul.f32 %v1071_v39, %v879_v32  ;;  %v780_v43 = vpop.f32.mrb[7].mxu1 }
 0x211   :  { %947 = vst.msk [vmem:[#allocation10 + $0x40] sm:$0xff] %vm938_vm2, %v930_v37  ;;  %v932_v44 = vmul.f32 %v1102_v24, %v916_v38  ;;  %v1076_v46 = vpop.f32.mrb[8].mxu0  ;;  %v918_v47 = vmul.f32 %v878_v36, %v780_v43 }
 0x212   :  { %950 = vst.msk [vmem:[#allocation10 + $0x58] sm:$0xff] %vm938_vm2, %v933_v41  ;;  %v935_v48 = vmul.f32 %v1100_v19, %v919_v42  ;;  %v921_v49 = vmul.f32 %v1076_v46, %v881_v40  ;;  %v857_v50 = vpop.f32.mrb[9].mxu0 }
 0x213   :  { %949 = vst.msk [vmem:[#allocation10 + $0x50] sm:$0xff] %vm938_vm2, %v932_v44  ;;  %v934_v51 = vmul.f32 %v1102_v24, %v918_v47  ;;  %v920_v52 = vmul.f32 %v880_v45, %v857_v50 }
 0x214   :  { %952 = vst.msk [vmem:[#allocation10 + $0x68] sm:$0xff] %vm938_vm2, %v935_v48  ;;  %v937_v53 = vmul.f32 %v1100_v19, %v921_v49 }
 0x215   :  { %951 = vst.msk [vmem:[#allocation10 + $0x60] sm:$0xff] %vm938_vm2, %v934_v51  ;;  %v936_v54 = vmul.f32 %v1102_v24, %v920_v52 }
 0x216   :  { %954 = vst.msk [vmem:[#allocation10 + $0x78] sm:$0xff] %vm938_vm2, %v937_v53 }
 0x217   :  { %953 = vst.msk [vmem:[#allocation10 + $0x70] sm:$0xff] %vm938_vm2, %v936_v54 }
 0x218   :  { %1202 = shalt.err (!%p1199_p8)
}
 0x219   :  { %s1203_s17 = scalar_lea.hbm %s1392_s4, 2048 }
 0x21a   :  { %p1204_p9 = scmp.ne.s32.totalorder %s1392_s4, %s1203_s17  ;;  %p1207_p10 = scmp.lt.u32.totalorder %s1203_s17, %s1392_s4 }
 0x21c   :  { %p1209_p11 = pnand %p1207_p10, %p1204_p9 }
 0x21e   :  { %1212 = shalt.err (!%p1209_p11)
}
 0x21f   :  { %966 = dma.vmem_to_hbm [thread:$0]  %s961_s12, 2048, %s1392_s4, [#allocation4], %s1225_s1, %s1225_s1, %s1226_s13  }
 0x220   :  { %1219 = dma.done.wait [#allocation4], 2048  }
 0x221   :  { %1220 = vsyncadd [#allocation4], 4294965248 }
 0x222   :  { %970 = vsyncpa [#allocation3], 1 }
 0x223   :  { %971 = vsyncpa [#allocation6], 1 }
 0x224   :  { %972 = vsyncpa [#allocation9], 1 }
 0x225   :  { %973 = vsyncpa [#allocation4], 1 }

</bundles_post_ra>
